<compile_context>
chip_gen: v6e
topology: v6e:2x2x1
jax: 0.10.0
libtpu: 0.0.40
codegen_flags: <defaults>
</compile_context>

<pallas_src>
import functools

import jax
import jax.numpy as jnp
from jax.experimental import pallas as pl
from jax.experimental.pallas import tpu as pltpu

LANE = 128
_COL0 = 8          # sublane-aligned column where the scratch interior starts


def _round_up(x, m):
    return (x + m - 1) // m * m


def _vmem_limit_bytes():
    """Generation-aware VMEM budget."""
    try:
        kind = jax.devices()[0].device_kind.lower()
    except Exception:
        kind = ""
    if "v7" in kind:                       # 64 MiB / TensorCore
        return 48 * 1024 * 1024
    if "v5" in kind or "v6" in kind:       # 128 MiB
        return 100 * 1024 * 1024
    return 48 * 1024 * 1024                # unknown: conservative


def _estimate_vmem(H, W, TH, Cp, Pp, single_buffer_x):
    x_buf = H * W * Cp * 2 * (1 if single_buffer_x else 2)   # bf16 full image
    out_buf = TH * W * Cp * 2 * 2                            # bf16, double buf
    scratch = (TH + 2) * (W + 2 * _COL0) * Pp * 2
    weights = (Cp * Pp + 9 * Pp * Pp + Pp * Cp) * 2          # Buffered(1)
    temps = TH * W * (4 * Pp + 2 * Pp + 4 * Cp)              # acc, y2, y3/out
    return x_buf + out_buf + scratch + weights + temps


def _pick_row_tile(H, W, Cp, Pp, budget, single_buffer_x):
    # Whole image per grid step whenever it fits (no halo recompute, fewer
    # grid steps); otherwise the largest divisor of H whose footprint fits.
    for th in sorted((d for d in range(1, H + 1) if H % d == 0), reverse=True):
        if _estimate_vmem(H, W, th, Cp, Pp, single_buffer_x) <= budget:
            return th
    return 1


def _spec(shape, index_map, *, single_buffer=False):
    """BlockSpec, optionally single-buffered (constant / huge blocks)."""
    if single_buffer:
        try:
            return pl.BlockSpec(shape, index_map, pipeline_mode=pl.Buffered(1))
        except Exception:     # older jax without pipeline_mode / Buffered
            pass
    return pl.BlockSpec(shape, index_map)


def _mm_last(a, w):
    """Contract trailing (lane) axis of a (TH, W, K) with w (K, N) -> (TH, W, N) f32."""
    th, wd, k = a.shape
    if wd % 8 == 0:
        # Merging (TH, W) keeps the (8,128) tiling: the reshape is layout-free.
        y = jnp.dot(a.reshape(th * wd, k), w, preferred_element_type=jnp.float32)
        return y.reshape(th, wd, w.shape[1])
    # W % 8 != 0 (ResNet 14 / 7): avoid the re-tiling reshape copies.
    return jax.lax.dot_general(a, w, (((2,), (0,)), ((), ())),
                               preferred_element_type=jnp.float32)


def _bottleneck_kernel(x_ref, w1_ref, b1_ref, w2_ref, b2_ref, w3_ref, b3_ref,
                       out_ref, pad_ref, *, row_tile, n_row_tiles):
    # Static shapes:
    #   x_ref   : (1, H, W, Cp)        bf16  full image of this batch element
    #   w1_ref  : (Cp, Pp)             bf16  BN1 scale folded in
    #   b1_ref  : (1, Pp)              f32
    #   w2_ref  : (3, 3, Pp, Pp)       bf16  HWIO, BN2 folded
    #   b2_ref  : (1, Pp)              f32
    #   w3_ref  : (Pp, Cp)             bf16  BN3 folded
    #   b3_ref  : (1, Cp)              f32
    #   out_ref : (1, TH, W, Cp)       bf16 (or f32)
    #   pad_ref : (TH+2, W+16, Pp)     bf16  y1 tile + 1-px halo, interior @ col 8
    _, H, W, Cp = x_ref.shape
    TH = row_tile
    Pp = w1_ref.shape[1]
    C0 = _COL0

    r = pl.program_id(1)
    row0 = pl.multiple_of(r * TH, TH)

    w1 = w1_ref[...]
    b1 = b1_ref[...]

    def conv1(rows_bf16):   # (M, W, Cp) bf16 -> (M, W, Pp) bf16, BN1 bias + ReLU
        y = _mm_last(rows_bf16, w1)
        return jnp.maximum(y + b1, 0.0).astype(jnp.bfloat16)

    # ---- zero only the two halo columns of the scratch (tiny) --------------
    zcol = jnp.zeros((TH + 2, 1, Pp), jnp.bfloat16)
    pad_ref[:, C0 - 1:C0, :] = zcol
    pad_ref[:, C0 + W:C0 + W + 1, :] = zcol

    # ---- conv1 (1x1) + BN1 + ReLU on this row tile -> aligned interior -----
    x_tile = x_ref[0, pl.ds(row0, TH)]                        # (TH, W, Cp) bf16
    pad_ref[1:TH + 1, C0:C0 + W, :] = conv1(x_tile)

    # ---- top / bottom halo rows ---------------------------------------------
    zrow = jnp.zeros((1, W, Pp), jnp.bfloat16)
    if n_row_tiles == 1:
        # whole image per step: both halos are image-edge padding (static)
        pad_ref[0:1, C0:C0 + W, :] = zrow
        pad_ref[TH + 1:TH + 2, C0:C0 + W, :] = zrow
    else:
        n_r = pl.num_programs(1)

        @pl.when(r == 0)
        def _():
            pad_ref[0:1, C0:C0 + W, :] = zrow

        @pl.when(r > 0)
        def _():
            pad_ref[0:1, C0:C0 + W, :] = conv1(x_ref[0, pl.ds(row0 - 1, 1)])

        @pl.when(r == n_r - 1)
        def _():
            pad_ref[TH + 1:TH + 2, C0:C0 + W, :] = zrow

        @pl.when(r < n_r - 1)
        def _():
            pad_ref[TH + 1:TH + 2, C0:C0 + W, :] = conv1(
                x_ref[0, pl.ds(row0 + TH, 1)])

    # ---- conv2 (3x3) + BN2 + ReLU: 9 accumulating dots off the scratch -----
    acc = None
    for dh in range(3):
        for dw in range(3):
            patch = pad_ref[dh:dh + TH, C0 - 1 + dw:C0 - 1 + dw + W, :]
            d = _mm_last(patch, w2_ref[dh, dw])
            acc = d if acc is None else acc + d
    y2 = jnp.maximum(acc + b2_ref[...], 0.0).astype(jnp.bfloat16)

    # ---- conv3 (1x1) + BN3, residual add (bf16 skip), final ReLU ------------
    y3 = _mm_last(y2, w3_ref[...])
    out = jnp.maximum(y3 + b3_ref[...] + x_tile.astype(jnp.float32), 0.0)
    out_ref[0] = out.astype(out_ref.dtype)


def bottleneck_pallas(x_padded, kern, *, row_tile=None, out_dtype=jnp.bfloat16,
                      vmem_limit=None):
    """x_padded: (N, H, W, Cp) bf16 (channel-padded NHWC). Returns (N,H,W,Cp) out_dtype."""
    N, H, W, Cp = x_padded.shape
    Pp = kern["w1"].shape[1]
    if vmem_limit is None:
        vmem_limit = _vmem_limit_bytes()
    budget = int(vmem_limit * 0.7)

    # Single-buffer the full-image x block when it would eat the budget
    # (its block index only changes with the batch axis).
    single_x = 2 * (H * W * Cp * 2) > budget // 4
    if row_tile is None:
        row_tile = _pick_row_tile(H, W, Cp, Pp, budget, single_x)
    assert H % row_tile == 0
    TH = row_tile
    nR = H // TH   # megacore hygiene: N*nR even keeps both v7x TCs busy

    cin, p, cout = kern["cin"], kern["p"], kern["cout"]
    flops = int(2 * N * H * W * (cin * p + 9 * p * p + p * cout))
    bytes_accessed = int(
        x_padded.size * 2 + N * H * W * Cp * jnp.dtype(out_dtype).itemsize +
        (kern["w1"].size + kern["w2"].size + kern["w3"].size) * 2 +
        (kern["b1"].size + kern["b2"].size + kern["b3"].size) * 4)

    grid_spec = pltpu.PrefetchScalarGridSpec(
        num_scalar_prefetch=0,
        grid=(N, nR),
        in_specs=[
            _spec((1, H, W, Cp), lambda b, r: (b, 0, 0, 0),
                  single_buffer=single_x),                              # x
            _spec((Cp, Pp), lambda b, r: (0, 0), single_buffer=True),   # w1
            _spec((1, Pp), lambda b, r: (0, 0), single_buffer=True),    # b1
            _spec((3, 3, Pp, Pp), lambda b, r: (0, 0, 0, 0),
                  single_buffer=True),                                  # w2
            _spec((1, Pp), lambda b, r: (0, 0), single_buffer=True),    # b2
            _spec((Pp, Cp), lambda b, r: (0, 0), single_buffer=True),   # w3
            _spec((1, Cp), lambda b, r: (0, 0), single_buffer=True),    # b3
        ],
        out_specs=pl.BlockSpec((1, TH, W, Cp), lambda b, r: (b, r, 0, 0)),
        scratch_shapes=[pltpu.VMEM((TH + 2, W + 2 * _COL0, Pp), jnp.bfloat16)],
    )

    return pl.pallas_call(
        functools.partial(_bottleneck_kernel, row_tile=TH, n_row_tiles=nR),
        out_shape=jax.ShapeDtypeStruct((N, H, W, Cp), out_dtype),
        grid_spec=grid_spec,
        compiler_params=pltpu.CompilerParams(
            dimension_semantics=("parallel", "parallel"),
            vmem_limit_bytes=int(vmem_limit)),
        cost_estimate=pl.CostEstimate(
            flops=flops, transcendentals=0, bytes_accessed=bytes_accessed),
    )(x_padded, kern["w1"], kern["b1"], kern["w2"], kern["b2"],
      kern["w3"], kern["b3"])


# ----------------------------- host-side prep -------------------------------

def make_module_params(key, inplanes, planes, expansion=4, eps=1e-5):
    """Random parameters in the PyTorch Bottleneck layout (OIHW conv + BN)."""
    cout = planes * expansion
    ks = jax.random.split(key, 6)

    def bn(k, c):
        kg, kb, km, kv = jax.random.split(k, 4)
        return dict(
            gamma=1.0 + 0.1 * jax.random.normal(kg, (c,), jnp.float32),
            beta=0.1 * jax.random.normal(kb, (c,), jnp.float32),
            mean=0.1 * jax.random.normal(km, (c,), jnp.float32),
            var=jnp.abs(jax.random.normal(kv, (c,), jnp.float32)) + 0.5)

    return dict(
        conv1_w=0.1 * jax.random.normal(ks[0], (planes, inplanes, 1, 1), jnp.float32),
        bn1=bn(ks[1], planes),
        conv2_w=0.1 * jax.random.normal(ks[2], (planes, planes, 3, 3), jnp.float32),
        bn2=bn(ks[3], planes),
        conv3_w=0.1 * jax.random.normal(ks[4], (cout, planes, 1, 1), jnp.float32),
        bn3=bn(ks[5], cout),
        eps=eps)


def prepare_params(mp):
    """Fold BN scales into weights, convert layouts, lane-pad, cast to bf16."""
    eps = mp["eps"]

    def fold(bn):
        s = bn["gamma"] / jnp.sqrt(bn["var"] + eps)
        return s, bn["beta"] - bn["mean"] * s

    s1, b1 = fold(mp["bn1"])
    s2, b2 = fold(mp["bn2"])
    s3, b3 = fold(mp["bn3"])

    # OIHW -> channels-last matmul / HWIO layouts, BN scale folded into weights.
    w1 = jnp.transpose(mp["conv1_w"][:, :, 0, 0], (1, 0)) * s1[None, :]          # (Cin,P)
    w2 = jnp.transpose(mp["conv2_w"], (2, 3, 1, 0)) * s2[None, None, None, :]    # HWIO
    w3 = jnp.transpose(mp["conv3_w"][:, :, 0, 0], (1, 0)) * s3[None, :]          # (P,Cout)

    cin, p = w1.shape
    cout = w3.shape[1]
    assert cout == cin, "residual add requires inplanes == planes * expansion"
    cp, pp = _round_up(cin, LANE), _round_up(p, LANE)

    ref = dict(w1=w1.astype(jnp.bfloat16), w2=w2.astype(jnp.bfloat16),
               w3=w3.astype(jnp.bfloat16), b1=b1, b2=b2, b3=b3)

    # Lane-pad channel dims to multiples of 128 (zero padding is exact).
    w1p = jnp.zeros((cp, pp), jnp.float32).at[:cin, :p].set(w1)
    w2p = jnp.zeros((3, 3, pp, pp), jnp.float32).at[:, :, :p, :p].set(w2)
    w3p = jnp.zeros((pp, cp), jnp.float32).at[:p, :cout].set(w3)
    b1p = jnp.zeros((1, pp), jnp.float32).at[0, :p].set(b1)
    b2p = jnp.zeros((1, pp), jnp.float32).at[0, :p].set(b2)
    b3p = jnp.zeros((1, cp), jnp.float32).at[0, :cout].set(b3)

    kern = dict(w1=w1p.astype(jnp.bfloat16), w2=w2p.astype(jnp.bfloat16),
                w3=w3p.astype(jnp.bfloat16), b1=b1p, b2=b2p, b3=b3p,
                cin=cin, p=p, cout=cout, cp=cp, pp=pp)
    return kern, ref


def nchw_to_padded_nhwc(x_nchw, cp):
    """One-time layout conversion at the network boundary.  Between stacked
    Bottleneck blocks, activations stay NHWC, channel-padded, bf16 — no
    per-block NCHW / pad / slice round trips."""
    n, c, h, w = x_nchw.shape
    x = jnp.transpose(x_nchw, (0, 2, 3, 1)).astype(jnp.bfloat16)
    return jnp.zeros((n, h, w, cp), jnp.bfloat16).at[..., :c].set(x)


def bottleneck_reference_nhwc(x_nhwc_f32, ref):
    """Pure-JAX reference mirroring the kernel's precision (bf16 in/act, f32 acc)."""
    x = x_nhwc_f32.astype(jnp.bfloat16)

    def conv(v, w, padding):
        return jax.lax.conv_general_dilated(
            v, w, window_strides=(1, 1), padding=padding,
            dimension_numbers=("NHWC", "HWIO", "NHWC"),
            preferred_element_type=jnp.float32)

    y = conv(x, ref["w1"][None, None], "VALID")
    y = jnp.maximum(y + ref["b1"], 0.0).astype(jnp.bfloat16)
    y = conv(y, ref["w2"], ((1, 1), (1, 1)))
    y = jnp.maximum(y + ref["b2"], 0.0).astype(jnp.bfloat16)
    y = conv(y, ref["w3"][None, None], "VALID")
    y = jnp.maximum(y + ref["b3"] + x.astype(jnp.float32), 0.0)
    return y


if __name__ == "__main__":
    key = jax.random.PRNGKey(0)
    k_x, k_p = jax.random.split(key)

    N, H, W = 2, 16, 16
    planes, expansion = 8, 4
    inplanes = planes * expansion            # residual add requires this

    x_nchw = jax.random.normal(k_x, (N, inplanes, H, W), jnp.float32)  # like PyTorch
    module_params = make_module_params(k_p, inplanes, planes, expansion)
    kern, ref = prepare_params(module_params)

    # One-time boundary conversion; the kernel itself consumes/produces
    # channel-padded NHWC bf16 so stacked blocks chain with zero relayout.
    x_pad = nchw_to_padded_nhwc(x_nchw, kern["cp"])
    out_pad = bottleneck_pallas(x_pad, kern)              # (N, H, W, Cp) bf16
    out_pad = jax.block_until_ready(out_pad)

    out = out_pad[..., :kern["cout"]].astype(jnp.float32)
    expect = bottleneck_reference_nhwc(jnp.transpose(x_nchw, (0, 2, 3, 1)), ref)
    assert out.shape == (N, H, W, inplanes)
    err = float(jnp.max(jnp.abs(out - expect)))
    assert jnp.allclose(out, expect, rtol=3e-2, atol=3e-2), f"mismatch, max err {err}"

    print("KERNEL_OK")
</pallas_src>

<mosaic_0001>
module attributes {stable_mosaic.version = 11 : i64} {
  func.func @_bottleneck_kernel(%arg0: i32, %arg1: i32, %arg2: memref<1x16x16x128xbf16, #tpu.memory_space<vmem>>, %arg3: memref<128x128xbf16, #tpu.memory_space<vmem>>, %arg4: memref<1x128xf32, #tpu.memory_space<vmem>>, %arg5: memref<3x3x128x128xbf16, #tpu.memory_space<vmem>>, %arg6: memref<1x128xf32, #tpu.memory_space<vmem>>, %arg7: memref<128x128xbf16, #tpu.memory_space<vmem>>, %arg8: memref<1x128xf32, #tpu.memory_space<vmem>>, %arg9: memref<1x16x16x128xbf16, #tpu.memory_space<vmem>>, %arg10: memref<18x32x128xbf16, #tpu.memory_space<vmem>>) attributes {dimension_semantics = [#tpu.dimension_semantics<parallel>, #tpu.dimension_semantics<parallel>], iteration_bounds = array<i64: 2, 1>, scalar_prefetch = 0 : i64, scratch_operands = 1 : i64, tpu.core_type = #tpu.core_type<tc>, window_params = [{transform_indices = @transform_0, window_bounds = array<i64: 1, 16, 16, 128>}, {pipeline_mode = #tpu.pipeline_mode<synchronous>, transform_indices = @transform_1, window_bounds = array<i64: 128, 128>}, {pipeline_mode = #tpu.pipeline_mode<synchronous>, transform_indices = @transform_2, window_bounds = array<i64: 1, 128>}, {pipeline_mode = #tpu.pipeline_mode<synchronous>, transform_indices = @transform_3, window_bounds = array<i64: 3, 3, 128, 128>}, {pipeline_mode = #tpu.pipeline_mode<synchronous>, transform_indices = @transform_4, window_bounds = array<i64: 1, 128>}, {pipeline_mode = #tpu.pipeline_mode<synchronous>, transform_indices = @transform_5, window_bounds = array<i64: 128, 128>}, {pipeline_mode = #tpu.pipeline_mode<synchronous>, transform_indices = @transform_6, window_bounds = array<i64: 1, 128>}, {transform_indices = @transform_7, window_bounds = array<i64: 1, 16, 16, 128>}]} {
    %c16_i32 = arith.constant 16 : i32
    %0 = arith.muli %arg1, %c16_i32 : i32
    %1 = tpu.assume_multiple %0, 16 : i32
    %c0 = arith.constant 0 : index
    %c0_0 = arith.constant 0 : index
    %2 = vector.load %arg3[%c0, %c0_0] : memref<128x128xbf16, #tpu.memory_space<vmem>>, vector<128x128xbf16>
    %c0_1 = arith.constant 0 : index
    %c0_2 = arith.constant 0 : index
    %3 = vector.load %arg4[%c0_1, %c0_2] : memref<1x128xf32, #tpu.memory_space<vmem>>, vector<1x128xf32>
    %cst = arith.constant 0.000000e+00 : bf16
    %4 = vector.broadcast %cst : bf16 to vector<18x1x128xbf16>
    %c0_3 = arith.constant 0 : index
    %c7 = arith.constant 7 : index
    %c0_4 = arith.constant 0 : index
    %5 = vector.load %arg10[%c0_3, %c7, %c0_4] : memref<18x32x128xbf16, #tpu.memory_space<vmem>>, vector<18x1x128xbf16>
    tpu.vector_store %arg10[%c0_3, %c7, %c0_4], %4 {strides = array<i32>} : memref<18x32x128xbf16, #tpu.memory_space<vmem>>, vector<18x1x128xbf16>,
    %c0_5 = arith.constant 0 : index
    %c24 = arith.constant 24 : index
    %c0_6 = arith.constant 0 : index
    %6 = vector.load %arg10[%c0_5, %c24, %c0_6] : memref<18x32x128xbf16, #tpu.memory_space<vmem>>, vector<18x1x128xbf16>
    tpu.vector_store %arg10[%c0_5, %c24, %c0_6], %4 {strides = array<i32>} : memref<18x32x128xbf16, #tpu.memory_space<vmem>>, vector<18x1x128xbf16>,
    %c0_7 = arith.constant 0 : index
    %7 = arith.index_cast %1 : i32 to index
    %c0_8 = arith.constant 0 : index
    %c0_9 = arith.constant 0 : index
    %8 = vector.load %arg2[%c0_7, %7, %c0_8, %c0_9] : memref<1x16x16x128xbf16, #tpu.memory_space<vmem>>, vector<1x16x16x128xbf16>
    %9 = vector.shape_cast %8 : vector<1x16x16x128xbf16> to vector<16x16x128xbf16>
    %10 = vector.shape_cast %9 : vector<16x16x128xbf16> to vector<256x128xbf16>
    %cst_10 = arith.constant dense<0.000000e+00> : vector<256x128xf32>
    %11 = tpu.matmul %10, %2, %cst_10 {dimension_numbers = #tpu.dot_dimension_numbers<[1], [0], [0], [1], [0, 0, 1, 1], [], []>} : vector<256x128xbf16>, vector<128x128xbf16>, vector<256x128xf32> -> vector<256x128xf32>
    %12 = vector.shape_cast %11 : vector<256x128xf32> to vector<16x16x128xf32>
    %13 = vector.shape_cast %3 : vector<1x128xf32> to vector<1x1x128xf32>
    %14 = vector.broadcast %13 : vector<1x1x128xf32> to vector<16x16x128xf32>
    %15 = arith.addf %12, %14 : vector<16x16x128xf32>
    %cst_11 = arith.constant 0.000000e+00 : f32
    %16 = vector.broadcast %cst_11 : f32 to vector<16x16x128xf32>
    %17 = arith.maximumf %15, %16 : vector<16x16x128xf32>
    %18 = arith.truncf %17 : vector<16x16x128xf32> to vector<16x16x128xbf16>
    %c1 = arith.constant 1 : index
    %c8 = arith.constant 8 : index
    %c0_12 = arith.constant 0 : index
    %19 = vector.load %arg10[%c1, %c8, %c0_12] : memref<18x32x128xbf16, #tpu.memory_space<vmem>>, vector<16x16x128xbf16>
    tpu.vector_store %arg10[%c1, %c8, %c0_12], %18 {strides = array<i32>} : memref<18x32x128xbf16, #tpu.memory_space<vmem>>, vector<16x16x128xbf16>,
    %cst_13 = arith.constant 0.000000e+00 : bf16
    %20 = vector.broadcast %cst_13 : bf16 to vector<1x16x128xbf16>
    %c0_14 = arith.constant 0 : index
    %c8_15 = arith.constant 8 : index
    %c0_16 = arith.constant 0 : index
    %21 = vector.load %arg10[%c0_14, %c8_15, %c0_16] : memref<18x32x128xbf16, #tpu.memory_space<vmem>>, vector<1x16x128xbf16>
    tpu.vector_store %arg10[%c0_14, %c8_15, %c0_16], %20 {strides = array<i32>} : memref<18x32x128xbf16, #tpu.memory_space<vmem>>, vector<1x16x128xbf16>,
    %c17 = arith.constant 17 : index
    %c8_17 = arith.constant 8 : index
    %c0_18 = arith.constant 0 : index
    %22 = vector.load %arg10[%c17, %c8_17, %c0_18] : memref<18x32x128xbf16, #tpu.memory_space<vmem>>, vector<1x16x128xbf16>
    tpu.vector_store %arg10[%c17, %c8_17, %c0_18], %20 {strides = array<i32>} : memref<18x32x128xbf16, #tpu.memory_space<vmem>>, vector<1x16x128xbf16>,
    %c0_19 = arith.constant 0 : index
    %c7_20 = arith.constant 7 : index
    %c0_21 = arith.constant 0 : index
    %23 = vector.load %arg10[%c0_19, %c7_20, %c0_21] : memref<18x32x128xbf16, #tpu.memory_space<vmem>>, vector<16x16x128xbf16>
    %c0_22 = arith.constant 0 : index
    %c0_23 = arith.constant 0 : index
    %c0_24 = arith.constant 0 : index
    %c0_25 = arith.constant 0 : index
    %24 = vector.load %arg5[%c0_22, %c0_23, %c0_24, %c0_25] : memref<3x3x128x128xbf16, #tpu.memory_space<vmem>>, vector<1x1x128x128xbf16>
    %25 = vector.shape_cast %24 : vector<1x1x128x128xbf16> to vector<128x128xbf16>
    %26 = vector.shape_cast %23 : vector<16x16x128xbf16> to vector<256x128xbf16>
    %cst_26 = arith.constant dense<0.000000e+00> : vector<256x128xf32>
    %27 = tpu.matmul %26, %25, %cst_26 {dimension_numbers = #tpu.dot_dimension_numbers<[1], [0], [0], [1], [0, 0, 1, 1], [], []>} : vector<256x128xbf16>, vector<128x128xbf16>, vector<256x128xf32> -> vector<256x128xf32>
    %28 = vector.shape_cast %27 : vector<256x128xf32> to vector<16x16x128xf32>
    %c0_27 = arith.constant 0 : index
    %c8_28 = arith.constant 8 : index
    %c0_29 = arith.constant 0 : index
    %29 = vector.load %arg10[%c0_27, %c8_28, %c0_29] : memref<18x32x128xbf16, #tpu.memory_space<vmem>>, vector<16x16x128xbf16>
    %c0_30 = arith.constant 0 : index
    %c1_31 = arith.constant 1 : index
    %c0_32 = arith.constant 0 : index
    %c0_33 = arith.constant 0 : index
    %30 = vector.load %arg5[%c0_30, %c1_31, %c0_32, %c0_33] : memref<3x3x128x128xbf16, #tpu.memory_space<vmem>>, vector<1x1x128x128xbf16>
    %31 = vector.shape_cast %30 : vector<1x1x128x128xbf16> to vector<128x128xbf16>
    %32 = vector.shape_cast %29 : vector<16x16x128xbf16> to vector<256x128xbf16>
    %cst_34 = arith.constant dense<0.000000e+00> : vector<256x128xf32>
    %33 = tpu.matmul %32, %31, %cst_34 {dimension_numbers = #tpu.dot_dimension_numbers<[1], [0], [0], [1], [0, 0, 1, 1], [], []>} : vector<256x128xbf16>, vector<128x128xbf16>, vector<256x128xf32> -> vector<256x128xf32>
    %34 = vector.shape_cast %33 : vector<256x128xf32> to vector<16x16x128xf32>
    %35 = arith.addf %28, %34 : vector<16x16x128xf32>
    %c0_35 = arith.constant 0 : index
    %c9 = arith.constant 9 : index
    %c0_36 = arith.constant 0 : index
    %36 = vector.load %arg10[%c0_35, %c9, %c0_36] : memref<18x32x128xbf16, #tpu.memory_space<vmem>>, vector<16x16x128xbf16>
    %c0_37 = arith.constant 0 : index
    %c2 = arith.constant 2 : index
    %c0_38 = arith.constant 0 : index
    %c0_39 = arith.constant 0 : index
    %37 = vector.load %arg5[%c0_37, %c2, %c0_38, %c0_39] : memref<3x3x128x128xbf16, #tpu.memory_space<vmem>>, vector<1x1x128x128xbf16>
    %38 = vector.shape_cast %37 : vector<1x1x128x128xbf16> to vector<128x128xbf16>
    %39 = vector.shape_cast %36 : vector<16x16x128xbf16> to vector<256x128xbf16>
    %cst_40 = arith.constant dense<0.000000e+00> : vector<256x128xf32>
    %40 = tpu.matmul %39, %38, %cst_40 {dimension_numbers = #tpu.dot_dimension_numbers<[1], [0], [0], [1], [0, 0, 1, 1], [], []>} : vector<256x128xbf16>, vector<128x128xbf16>, vector<256x128xf32> -> vector<256x128xf32>
    %41 = vector.shape_cast %40 : vector<256x128xf32> to vector<16x16x128xf32>
    %42 = arith.addf %35, %41 : vector<16x16x128xf32>
    %c1_41 = arith.constant 1 : index
    %c7_42 = arith.constant 7 : index
    %c0_43 = arith.constant 0 : index
    %43 = vector.load %arg10[%c1_41, %c7_42, %c0_43] : memref<18x32x128xbf16, #tpu.memory_space<vmem>>, vector<16x16x128xbf16>
    %c1_44 = arith.constant 1 : index
    %c0_45 = arith.constant 0 : index
    %c0_46 = arith.constant 0 : index
    %c0_47 = arith.constant 0 : index
    %44 = vector.load %arg5[%c1_44, %c0_45, %c0_46, %c0_47] : memref<3x3x128x128xbf16, #tpu.memory_space<vmem>>, vector<1x1x128x128xbf16>
    %45 = vector.shape_cast %44 : vector<1x1x128x128xbf16> to vector<128x128xbf16>
    %46 = vector.shape_cast %43 : vector<16x16x128xbf16> to vector<256x128xbf16>
    %cst_48 = arith.constant dense<0.000000e+00> : vector<256x128xf32>
    %47 = tpu.matmul %46, %45, %cst_48 {dimension_numbers = #tpu.dot_dimension_numbers<[1], [0], [0], [1], [0, 0, 1, 1], [], []>} : vector<256x128xbf16>, vector<128x128xbf16>, vector<256x128xf32> -> vector<256x128xf32>
    %48 = vector.shape_cast %47 : vector<256x128xf32> to vector<16x16x128xf32>
    %49 = arith.addf %42, %48 : vector<16x16x128xf32>
    %c1_49 = arith.constant 1 : index
    %c8_50 = arith.constant 8 : index
    %c0_51 = arith.constant 0 : index
    %50 = vector.load %arg10[%c1_49, %c8_50, %c0_51] : memref<18x32x128xbf16, #tpu.memory_space<vmem>>, vector<16x16x128xbf16>
    %c1_52 = arith.constant 1 : index
    %c1_53 = arith.constant 1 : index
    %c0_54 = arith.constant 0 : index
    %c0_55 = arith.constant 0 : index
    %51 = vector.load %arg5[%c1_52, %c1_53, %c0_54, %c0_55] : memref<3x3x128x128xbf16, #tpu.memory_space<vmem>>, vector<1x1x128x128xbf16>
    %52 = vector.shape_cast %51 : vector<1x1x128x128xbf16> to vector<128x128xbf16>
    %53 = vector.shape_cast %50 : vector<16x16x128xbf16> to vector<256x128xbf16>
    %cst_56 = arith.constant dense<0.000000e+00> : vector<256x128xf32>
    %54 = tpu.matmul %53, %52, %cst_56 {dimension_numbers = #tpu.dot_dimension_numbers<[1], [0], [0], [1], [0, 0, 1, 1], [], []>} : vector<256x128xbf16>, vector<128x128xbf16>, vector<256x128xf32> -> vector<256x128xf32>
    %55 = vector.shape_cast %54 : vector<256x128xf32> to vector<16x16x128xf32>
    %56 = arith.addf %49, %55 : vector<16x16x128xf32>
    %c1_57 = arith.constant 1 : index
    %c9_58 = arith.constant 9 : index
    %c0_59 = arith.constant 0 : index
    %57 = vector.load %arg10[%c1_57, %c9_58, %c0_59] : memref<18x32x128xbf16, #tpu.memory_space<vmem>>, vector<16x16x128xbf16>
    %c1_60 = arith.constant 1 : index
    %c2_61 = arith.constant 2 : index
    %c0_62 = arith.constant 0 : index
    %c0_63 = arith.constant 0 : index
    %58 = vector.load %arg5[%c1_60, %c2_61, %c0_62, %c0_63] : memref<3x3x128x128xbf16, #tpu.memory_space<vmem>>, vector<1x1x128x128xbf16>
    %59 = vector.shape_cast %58 : vector<1x1x128x128xbf16> to vector<128x128xbf16>
    %60 = vector.shape_cast %57 : vector<16x16x128xbf16> to vector<256x128xbf16>
    %cst_64 = arith.constant dense<0.000000e+00> : vector<256x128xf32>
    %61 = tpu.matmul %60, %59, %cst_64 {dimension_numbers = #tpu.dot_dimension_numbers<[1], [0], [0], [1], [0, 0, 1, 1], [], []>} : vector<256x128xbf16>, vector<128x128xbf16>, vector<256x128xf32> -> vector<256x128xf32>
    %62 = vector.shape_cast %61 : vector<256x128xf32> to vector<16x16x128xf32>
    %63 = arith.addf %56, %62 : vector<16x16x128xf32>
    %c2_65 = arith.constant 2 : index
    %c7_66 = arith.constant 7 : index
    %c0_67 = arith.constant 0 : index
    %64 = vector.load %arg10[%c2_65, %c7_66, %c0_67] : memref<18x32x128xbf16, #tpu.memory_space<vmem>>, vector<16x16x128xbf16>
    %c2_68 = arith.constant 2 : index
    %c0_69 = arith.constant 0 : index
    %c0_70 = arith.constant 0 : index
    %c0_71 = arith.constant 0 : index
    %65 = vector.load %arg5[%c2_68, %c0_69, %c0_70, %c0_71] : memref<3x3x128x128xbf16, #tpu.memory_space<vmem>>, vector<1x1x128x128xbf16>
    %66 = vector.shape_cast %65 : vector<1x1x128x128xbf16> to vector<128x128xbf16>
    %67 = vector.shape_cast %64 : vector<16x16x128xbf16> to vector<256x128xbf16>
    %cst_72 = arith.constant dense<0.000000e+00> : vector<256x128xf32>
    %68 = tpu.matmul %67, %66, %cst_72 {dimension_numbers = #tpu.dot_dimension_numbers<[1], [0], [0], [1], [0, 0, 1, 1], [], []>} : vector<256x128xbf16>, vector<128x128xbf16>, vector<256x128xf32> -> vector<256x128xf32>
    %69 = vector.shape_cast %68 : vector<256x128xf32> to vector<16x16x128xf32>
    %70 = arith.addf %63, %69 : vector<16x16x128xf32>
    %c2_73 = arith.constant 2 : index
    %c8_74 = arith.constant 8 : index
    %c0_75 = arith.constant 0 : index
    %71 = vector.load %arg10[%c2_73, %c8_74, %c0_75] : memref<18x32x128xbf16, #tpu.memory_space<vmem>>, vector<16x16x128xbf16>
    %c2_76 = arith.constant 2 : index
    %c1_77 = arith.constant 1 : index
    %c0_78 = arith.constant 0 : index
    %c0_79 = arith.constant 0 : index
    %72 = vector.load %arg5[%c2_76, %c1_77, %c0_78, %c0_79] : memref<3x3x128x128xbf16, #tpu.memory_space<vmem>>, vector<1x1x128x128xbf16>
    %73 = vector.shape_cast %72 : vector<1x1x128x128xbf16> to vector<128x128xbf16>
    %74 = vector.shape_cast %71 : vector<16x16x128xbf16> to vector<256x128xbf16>
    %cst_80 = arith.constant dense<0.000000e+00> : vector<256x128xf32>
    %75 = tpu.matmul %74, %73, %cst_80 {dimension_numbers = #tpu.dot_dimension_numbers<[1], [0], [0], [1], [0, 0, 1, 1], [], []>} : vector<256x128xbf16>, vector<128x128xbf16>, vector<256x128xf32> -> vector<256x128xf32>
    %76 = vector.shape_cast %75 : vector<256x128xf32> to vector<16x16x128xf32>
    %77 = arith.addf %70, %76 : vector<16x16x128xf32>
    %c2_81 = arith.constant 2 : index
    %c9_82 = arith.constant 9 : index
    %c0_83 = arith.constant 0 : index
    %78 = vector.load %arg10[%c2_81, %c9_82, %c0_83] : memref<18x32x128xbf16, #tpu.memory_space<vmem>>, vector<16x16x128xbf16>
    %c2_84 = arith.constant 2 : index
    %c2_85 = arith.constant 2 : index
    %c0_86 = arith.constant 0 : index
    %c0_87 = arith.constant 0 : index
    %79 = vector.load %arg5[%c2_84, %c2_85, %c0_86, %c0_87] : memref<3x3x128x128xbf16, #tpu.memory_space<vmem>>, vector<1x1x128x128xbf16>
    %80 = vector.shape_cast %79 : vector<1x1x128x128xbf16> to vector<128x128xbf16>
    %81 = vector.shape_cast %78 : vector<16x16x128xbf16> to vector<256x128xbf16>
    %cst_88 = arith.constant dense<0.000000e+00> : vector<256x128xf32>
    %82 = tpu.matmul %81, %80, %cst_88 {dimension_numbers = #tpu.dot_dimension_numbers<[1], [0], [0], [1], [0, 0, 1, 1], [], []>} : vector<256x128xbf16>, vector<128x128xbf16>, vector<256x128xf32> -> vector<256x128xf32>
    %83 = vector.shape_cast %82 : vector<256x128xf32> to vector<16x16x128xf32>
    %84 = arith.addf %77, %83 : vector<16x16x128xf32>
    %c0_89 = arith.constant 0 : index
    %c0_90 = arith.constant 0 : index
    %85 = vector.load %arg6[%c0_89, %c0_90] : memref<1x128xf32, #tpu.memory_space<vmem>>, vector<1x128xf32>
    %86 = vector.shape_cast %85 : vector<1x128xf32> to vector<1x1x128xf32>
    %87 = vector.broadcast %86 : vector<1x1x128xf32> to vector<16x16x128xf32>
    %88 = arith.addf %84, %87 : vector<16x16x128xf32>
    %cst_91 = arith.constant 0.000000e+00 : f32
    %89 = vector.broadcast %cst_91 : f32 to vector<16x16x128xf32>
    %90 = arith.maximumf %88, %89 : vector<16x16x128xf32>
    %91 = arith.truncf %90 : vector<16x16x128xf32> to vector<16x16x128xbf16>
    %c0_92 = arith.constant 0 : index
    %c0_93 = arith.constant 0 : index
    %92 = vector.load %arg7[%c0_92, %c0_93] : memref<128x128xbf16, #tpu.memory_space<vmem>>, vector<128x128xbf16>
    %93 = vector.shape_cast %91 : vector<16x16x128xbf16> to vector<256x128xbf16>
    %cst_94 = arith.constant dense<0.000000e+00> : vector<256x128xf32>
    %94 = tpu.matmul %93, %92, %cst_94 {dimension_numbers = #tpu.dot_dimension_numbers<[1], [0], [0], [1], [0, 0, 1, 1], [], []>} : vector<256x128xbf16>, vector<128x128xbf16>, vector<256x128xf32> -> vector<256x128xf32>
    %95 = vector.shape_cast %94 : vector<256x128xf32> to vector<16x16x128xf32>
    %c0_95 = arith.constant 0 : index
    %c0_96 = arith.constant 0 : index
    %96 = vector.load %arg8[%c0_95, %c0_96] : memref<1x128xf32, #tpu.memory_space<vmem>>, vector<1x128xf32>
    %97 = vector.shape_cast %96 : vector<1x128xf32> to vector<1x1x128xf32>
    %98 = vector.broadcast %97 : vector<1x1x128xf32> to vector<16x16x128xf32>
    %99 = arith.addf %95, %98 : vector<16x16x128xf32>
    %100 = arith.extf %9 : vector<16x16x128xbf16> to vector<16x16x128xf32>
    %101 = arith.addf %99, %100 : vector<16x16x128xf32>
    %cst_97 = arith.constant 0.000000e+00 : f32
    %102 = vector.broadcast %cst_97 : f32 to vector<16x16x128xf32>
    %103 = arith.maximumf %101, %102 : vector<16x16x128xf32>
    %104 = arith.truncf %103 : vector<16x16x128xf32> to vector<16x16x128xbf16>
    %c0_98 = arith.constant 0 : index
    %c0_99 = arith.constant 0 : index
    %c0_100 = arith.constant 0 : index
    %c0_101 = arith.constant 0 : index
    %105 = vector.load %arg9[%c0_98, %c0_99, %c0_100, %c0_101] : memref<1x16x16x128xbf16, #tpu.memory_space<vmem>>, vector<1x16x16x128xbf16>
    %106 = vector.shape_cast %105 : vector<1x16x16x128xbf16> to vector<16x16x128xbf16>
    %107 = vector.shape_cast %104 : vector<16x16x128xbf16> to vector<1x16x16x128xbf16>
    tpu.vector_store %arg9[%c0_98, %c0_99, %c0_100, %c0_101], %107 {strides = array<i32>} : memref<1x16x16x128xbf16, #tpu.memory_space<vmem>>, vector<1x16x16x128xbf16>,
    return
  }
  func.func @transform_0(%arg0: i32, %arg1: i32) -> (i32, i32, i32, i32) {
    %c0_i32 = arith.constant 0 : i32
    %c0_i32_0 = arith.constant 0 : i32
    %c0_i32_1 = arith.constant 0 : i32
    %c0_i32_2 = arith.constant 0 : i32
    return %arg0, %c0_i32, %c0_i32_0, %c0_i32_1 : i32, i32, i32, i32
  }
  func.func @transform_1(%arg0: i32, %arg1: i32) -> (i32, i32) {
    %c0_i32 = arith.constant 0 : i32
    %c0_i32_0 = arith.constant 0 : i32
    %c0_i32_1 = arith.constant 0 : i32
    return %c0_i32, %c0_i32_0 : i32, i32
  }
  func.func @transform_2(%arg0: i32, %arg1: i32) -> (i32, i32) {
    %c0_i32 = arith.constant 0 : i32
    %c0_i32_0 = arith.constant 0 : i32
    %c0_i32_1 = arith.constant 0 : i32
    return %c0_i32, %c0_i32_0 : i32, i32
  }
  func.func @transform_3(%arg0: i32, %arg1: i32) -> (i32, i32, i32, i32) {
    %c0_i32 = arith.constant 0 : i32
    %c0_i32_0 = arith.constant 0 : i32
    %c0_i32_1 = arith.constant 0 : i32
    %c0_i32_2 = arith.constant 0 : i32
    %c0_i32_3 = arith.constant 0 : i32
    return %c0_i32, %c0_i32_0, %c0_i32_1, %c0_i32_2 : i32, i32, i32, i32
  }
  func.func @transform_4(%arg0: i32, %arg1: i32) -> (i32, i32) {
    %c0_i32 = arith.constant 0 : i32
    %c0_i32_0 = arith.constant 0 : i32
    %c0_i32_1 = arith.constant 0 : i32
    return %c0_i32, %c0_i32_0 : i32, i32
  }
  func.func @transform_5(%arg0: i32, %arg1: i32) -> (i32, i32) {
    %c0_i32 = arith.constant 0 : i32
    %c0_i32_0 = arith.constant 0 : i32
    %c0_i32_1 = arith.constant 0 : i32
    return %c0_i32, %c0_i32_0 : i32, i32
  }
  func.func @transform_6(%arg0: i32, %arg1: i32) -> (i32, i32) {
    %c0_i32 = arith.constant 0 : i32
    %c0_i32_0 = arith.constant 0 : i32
    %c0_i32_1 = arith.constant 0 : i32
    return %c0_i32, %c0_i32_0 : i32, i32
  }
  func.func @transform_7(%arg0: i32, %arg1: i32) -> (i32, i32, i32, i32) {
    %c0_i32 = arith.constant 0 : i32
    %c0_i32_0 = arith.constant 0 : i32
    %c0_i32_1 = arith.constant 0 : i32
    return %arg0, %arg1, %c0_i32, %c0_i32_0 : i32, i32, i32, i32
  }
}

</mosaic_0001>

<bundles_post_ra>
// kernel: tpu_custom_call.1
= control target key start
LH: loop header
LB: loop body
LE: loop exit
PB: predicated region body
PF: predicated region fallthrough
CT: control target
= control target key end

     0   :  { %s11198_s0 = inlined_call_operand.hbm [shape: bf16[2,16,16,128], index: 0, kind: input, shape index: {}]   ;;  %s11199_s1 = inlined_call_operand.hbm [shape: bf16[128,128], index: 1, kind: input, shape index: {}]   ;;  %s11200_s2 = inlined_call_operand.vmem [shape: f32[1,128], index: 2, kind: input, shape index: {}]   ;;  %s11201_s3 = inlined_call_operand.hbm [shape: bf16[3,3,128,128], index: 3, kind: input, shape index: {}]   ;;  %s11202_s4 = inlined_call_operand.vmem [shape: f32[1,128], index: 4, kind: input, shape index: {}]   ;;  %s11203_s5 = inlined_call_operand.hbm [shape: bf16[128,128], index: 5, kind: input, shape index: {}]   ;;  %s11204_s6 = inlined_call_operand.vmem [shape: f32[1,128], index: 6, kind: input, shape index: {}]   ;;  %s11205_s7 = inlined_call_operand.hbm [shape: bf16[2,16,16,128], index: 7, kind: output, shape index: {}]  }
   0x1   :  { %11216 = sst [smem:[#allocation65_spill]] %s11199_s1 }
   0x2   :  { %11217 = sst [smem:[#allocation66_spill]] %s11201_s3 }
   0x3   :  { %11218 = sst [smem:[#allocation67_spill]] %s11203_s5 }
   0x4   :  { %12 = vsyncpa [#allocation4], 0 }
   0x5   :  { %14 = vsyncpa [#allocation4 + $0x1], 0 }
   0x6   :  { %15 = vsyncpa [#allocation7], 0 }
   0x7   :  { %16 = vsyncpa [#allocation10], 0 }
   0x8   :  { %17 = vsyncpa [#allocation5], 0 }
   0x9   :  { %19 = vsyncpa [#allocation5 + $0x1], 0  ;;  %s9164_s24 = smov 0   ;;  %s9166_s25 = smov 0  }
   0xa   :  { %s9168_s26 = smov 0   ;;  %s9170_s27 = smov 0  }
   0xb   :  { %s9172_s28 = smov 0   ;;  %s9174_s29 = smov 0  }
   0xc LB: > { %s7267_s30 = sadd.s32 4294967295, %s9112_s29   ;;  %s7268_s8 = sadd.s32 4294967294, %s9112_s29   ;;  %s9112_s29 = sphi %s9174_s29, %s25_s29   ;;  %s9108_s28 = sphi %s9172_s28, %s11404_s28   ;;  %s9104_s27 = sphi %s9170_s27, %s11403_s27   ;;  %s9100_s26 = sphi %s9168_s26, %s11402_s26   ;;  %s9096_s25 = sphi %s9166_s25, %s11401_s25   ;;  %s9092_s24 = sphi %s9164_s24, %s11400_s24  }
   0xd   : > { %p57_p0 = scmp.ne.s32.totalorder %s9096_s25, %s9092_s24  ;;  %p9198_p1 = scmp.eq.s32.totalorder %s7267_s30, 0 }
   0xe   : > { %p9202_p2 = scmp.eq.s32.totalorder %s7267_s30, 1  ;;  %p215_p3 = scmp.eq.s32.totalorder %s7268_s8, 1 }
   0xf   : > { %p9208_p4 = por %p9198_p1, %p57_p0  ;;  %p7269_p5 = scmp.ge.s32.totalorder %s9112_s29, 1 }
  0x10   : > { %p9213_p6 = por %p215_p3, %p57_p0  ;;  %p222_p7 = scmp.lt.s32.totalorder %s9112_s29, 3 }
  0x11   : > { %s9114_s14 = smov [#allocation6]   ;;  %s9115_s17 = smov [#allocation8]  }
  0x12   : > { %s11222_s12 = scalar_select %p9213_p6, 1, 0 }
  0x13   : > { %p9218_p8 = pnand %p7269_p5, %p222_p7  ;;  %s234_s15 = sshll.u32 %s9114_s14, 4  ;;  %s235_s15 = int_to_ptr.vmem [resolvable:$true] %s234_s15 }
  0x14   : > { %s250_s18 = sshll.u32 %s9115_s17, 4  ;;  %s9116_s19 = smov [#allocation9]   ;;  %s251_s18 = int_to_ptr.vmem [resolvable:$true] %s250_s18 }
  0x15   : > { %p8636_p9 = pneg %p9218_p8  ;;  %s266_s20 = sshll.u32 %s9116_s19, 4  ;;  %s267_s20 = int_to_ptr.vmem [resolvable:$true] %s266_s20 }
  0x16   : > { %s8929_s21 = scalar_lea.vmem %s235_s15, 1024  ;;  %p8937_p5 = scmp.lt.s32.totalorder %s235_s15, %s235_s15 }
  0x17   : > { %p9227_p11 = pnand %p8636_p9, %p9198_p1  ;;  %p8930_p13 = scmp.ne.s32.totalorder %s235_s15, %s8929_s21 }
  0x18   : > { %p8938_p7 = scmp.lt.s32.totalorder %s8929_s21, %s8929_s21 }
  0x19   : > { %p8920_p12 = pneg %p9227_p11 }
  0x1a   : > { %p8939_p9 = por %p8938_p7, %p8937_p5 }
  0x1b   : > { %p8932_p0 = pnand %p8930_p13, %p8920_p12 }
  0x1d   : > { %p8933_p3 = pneg %p8932_p0 }
  0x1f   : > { %p8940_p10 = pnand %p8939_p9, %p8933_p3 }
  0x21   : > { %8943 = shalt.err (!%p8940_p10)
}
  0x22   : > { %s11206_s22 = smov 64   ;;  %s11207_s23 = smov 4  }
  0x23   : > { %s11225_s1 = sld [smem:[#allocation65_spill]]  ;;  %s8955_s14 = scalar_lea.vmem %s251_s18, 9216 }
  0x24   : > { %p8956_p13 = scmp.ne.s32.totalorder %s251_s18, %s8955_s14  ;;  %p8963_p3 = scmp.lt.s32.totalorder %s251_s18, %s251_s18 }
  0x25   : > { %p8964_p10 = scmp.lt.s32.totalorder %s8955_s14, %s8955_s14 }
  0x26   : > { %p8958_p0 = pnand %p8956_p13, %p8920_p12 }
  0x27   : > { %p8965_p7 = por %p8964_p10, %p8963_p3 }
  0x28   : > { %p8959_p5 = pneg %p8958_p0 }
  0x29   : > { %8639 = dma.hbm_to_vmem [thread:$0]  (!%p9227_p11), %s11225_s1, 1024, %s235_s15, [#allocation7], %s11206_s22, %s11206_s22, %s11207_s23  }
  0x2a   : > { %p8966_p9 = pnand %p8965_p7, %p8959_p5 }
  0x2c   : > { %8969 = shalt.err (!%p8966_p9)
}
  0x2d   : > { %s11226_s3 = sld [smem:[#allocation66_spill]]  ;;  %s8981_s15 = scalar_lea.vmem %s267_s20, 1024 }
  0x2e   : > { %p8982_p6 = scmp.ne.s32.totalorder %s267_s20, %s8981_s15  ;;  %p8989_p3 = scmp.lt.s32.totalorder %s267_s20, %s267_s20 }
  0x2f   : > { %p8990_p5 = scmp.lt.s32.totalorder %s8981_s15, %s8981_s15 }
  0x30   : > { %p8984_p13 = pnand %p8982_p6, %p8920_p12 }
  0x31   : > { %p8991_p10 = por %p8990_p5, %p8989_p3 }
  0x32   : > { %p8985_p0 = pneg %p8984_p13 }
  0x33   : > { %8642 = dma.hbm_to_vmem [thread:$0]  (!%p9227_p11), %s11226_s3, 9216, %s251_s18, [#allocation7], %s11206_s22, %s11206_s22, %s11207_s23  }
  0x34   : > { %p8992_p7 = pnand %p8991_p10, %p8985_p0 }
  0x36   : > { %8995 = shalt.err (!%p8992_p7)
}
  0x37   : > { %s11227_s5 = sld [smem:[#allocation67_spill]]  ;;  %s44_s18 = sadd.s32 1, %s9100_s26 }
  0x38   : > { %s37_s16 = sadd.s32 1, %s9108_s28  ;;  %p51_p6 = scmp.ne.s32.totalorder %s9100_s26, %s9096_s25 }
  0x39   : > { %p39_p12 = scmp.ge.s32.totalorder %s37_s16, 2  ;;  %p52_p9 = scmp.eq.s32.totalorder %s9112_s29, 0 }
  0x3a   : > { %p9273_p13 = por %p9202_p2, %p51_p6  ;;  %p8657_p0 = scmp.lt.s32.totalorder %s9112_s29, 2 }
  0x3b   : > { %s11406_s16 = smov (%p39_p12, %s37_s16), 0  ;;  %p53_p3 = por %p52_p9, %p51_p6 }
  0x3c   : > { %s11228_s8 = scalar_select %p9273_p13, 1, 0 }
  0x3d   : > { %8645 = dma.hbm_to_vmem [thread:$0]  (!%p9227_p11), %s11227_s5, 1024, %s267_s20, [#allocation10], %s11206_s22, %s11206_s22, %s11207_s23  }
  0x3e   : > { %s283_s14 = sand.u32 1, %s9100_s26   ;;  %s41_s17 = ssub.s32 %s9108_s28, %s11406_s16 }
  0x3f   : > { %p42_p5 = scmp.eq.s32.totalorder %s41_s17, 0  ;;  %s7274_s20 = sshll.u32 %s283_s14, 7 }
  0x40   : > { %s7651_s19 = sshll.u32 %s9108_s28, 11  ;;  %s287_s22 = scalar_lea.vmem [#allocation3], %s7274_s20 }
  0x41   : > { %s9285_s15 = scalar_select %p42_p5, %s9100_s26, %s44_s18  }
  0x42   : > { %s293_s10 = scalar_lea.hbm %s11198_s0, %s7651_s19  ;;  %s294_s23 = sshll.u32 %s287_s22, 4  ;;  %s295_s23 = int_to_ptr.vmem [resolvable:$true] %s294_s23 }
  0x43   : > { %p9292_p2 = pnand %p8657_p0, %p53_p3  ;;  %s284_s3 = scalar_lea.sflag [#allocation4], %s283_s14 }
  0x44   : > { %s9009_s17 = scalar_lea.vmem %s295_s23, 2048  ;;  %s9119_s18 = smov [#allocation3]  }
  0x45   : > { %p8998_p11 = pneg %p9292_p2  ;;  %p9010_p10 = scmp.ne.s32.totalorder %s295_s23, %s9009_s17 }
  0x46   : > { %s9014_s5 = sshll.u32 %s9119_s18, 4  ;;  %s9015_s5 = int_to_ptr.vmem [resolvable:$false] %s9014_s5 }
  0x47   : > { %p9012_p7 = pnand %p9010_p10, %p8998_p11  ;;  %s9016_s19 = scalar_lea.vmem %s9015_s5, 4096 }
  0x48   : > { %p9017_p12 = scmp.lt.s32.totalorder %s295_s23, %s9015_s5  ;;  %p9018_p9 = scmp.lt.s32.totalorder %s9016_s19, %s9009_s17 }
  0x49   : > { %p9013_p6 = pneg %p9012_p7 }
  0x4a   : > { %p9019_p5 = por %p9018_p9, %p9017_p12 }
  0x4c   : > { %p9020_p13 = pnand %p9019_p5, %p9013_p6 }
  0x4e   : > { %9023 = shalt.err (!%p9020_p13)
}
  0x4f   : > { %s11230_s22 = smov 4   ;;  %s11231_s20 = smov 64  }
  0x50   : > { %8649 = dma.hbm_to_vmem [thread:$0]  (!%p9292_p2), %s293_s10, 2048, %s295_s23, %s284_s3, %s11231_s20, %s11231_s20, %s11230_s22  }
  0x51   : > { %306 = sbr.rel (%p9218_p8) target bundleno = 1161 (0x489), region = 48 }
  0x56   : > { %s9306_s14 = sand.u32 1, %s9096_s25  }
  0x57   : > { %s7278_s5 = sshll.u32 %s9306_s14, 7  ;;  %s309_s21 = scalar_lea.sflag [#allocation4], %s9306_s14 }
  0x58   : > { %s9312_s30 = scalar_lea.vmem [#allocation3], %s7278_s5 }
  0x59   : > { %9075 = dma.done.wait (%p9208_p4), %s309_s21, 2048  }
  0x5a   : > { %9077 = vsyncadd (%p9208_p4), %s309_s21, 4294965248 }
  0x5b   : > { %9079 = dma.done.wait (%p9198_p1), [#allocation7], 10240  }
  0x5c   : > { %9081 = vsyncadd (%p9198_p1), [#allocation7], 4294957056 }
  0x5d   : > { %9083 = dma.done.wait (%p9198_p1), [#allocation10], 1024  }
  0x5e   : > { %9085 = vsyncadd (%p9198_p1), [#allocation10], 4294966272  ;;  %v8718_v0 = vld [vmem:[#allocation6 + $0x38] sm:$0xff]   ;;  %v8719_v1 = vld [vmem:[#allocation6 + $0x30] sm:$0xff]   ;;  %vm375_vm0 = vcmask 1043459   ;;  %v11232_v33 = vmov 0 }
  0x5f   : > { %8076 = vmatprep.subr.bf16.mxu0 %v8718_v0  ;;  %8604 = vmatprep.subr.bf16.mxu1 %v8718_v0  ;;  %v8720_v2 = vld [vmem:[#allocation6 + $0x28] sm:$0xff]   ;;  %v8721_v3 = vld [vmem:[#allocation6 + $0x20] sm:$0xff]   ;;  %v8722_v6 = vld [vmem:[#allocation6 + $0x18] sm:$0xff]   ;;  %vm376_vm1 = vsmask.f32 7950  ;;  %v9120_v40 = vmov 0  }
  0x60   : > { %8077 = vmatpush3.bf16.msra.mxu0 %v8718_v0  ;;  %8612 = vmatpush3.bf16.msra.mxu1 %v8718_v0  ;;  %v492_v4 = vld [vmem:[%s9312_s30] sm:$0xff]   ;;  %v8723_v7 = vld [vmem:[#allocation6 + $0x10] sm:$0xff]   ;;  %v8724_v8 = vld [vmem:[#allocation6 + $0x8] sm:$0xff]   ;;  %1060 = vst [vmem:[#allocation2 + $0x4] sm:$0xf] %v9120_v40  ;;  %vm432_vm6 = vcmask 1040384  }
  0x61   : > { %8078 = vmatprep.subr.bf16.mxu0 %v8719_v1  ;;  %8605 = vmatprep.subr.bf16.mxu1 %v8719_v1  ;;  %v508_v5 = vld [vmem:[%s9312_s30 + $0x40] sm:$0xff]   ;;  %v494_v10 = vld [vmem:[%s9312_s30 + $0x8] sm:$0xff]   ;;  %v496_v12 = vld [vmem:[%s9312_s30 + $0x10] sm:$0xff]   ;;  %1061 = vst [vmem:[#allocation2 + $0x8] sm:$0xf] %v9120_v40  ;;  %s11087_s10 = scalar_lea.vmem [#allocation11], %s7278_s5 }
  0x62   : > { %8092 = vmatprep.mubr.bf16.mxu0 %v492_v4  ;;  %8108 = vmatprep.mubr.bf16.mxu1 %v508_v5  ;;  %v8725_v9 = vld [vmem:[#allocation6] sm:$0xff]   ;;  %v510_v11 = vld [vmem:[%s9312_s30 + $0x48] sm:$0xff]   ;;  %v512_v13 = vld [vmem:[%s9312_s30 + $0x50] sm:$0xff]   ;;  %1063 = vst [vmem:[#allocation2 + $0x114] sm:$0xf] %v9120_v40  ;;  %s7716_s17 = sshll.u32 %s9104_s27, 11 }
  0x63   : > { %v8742_v14 = vld [vmem:[#allocation8 + $0x78] sm:$0xff]   ;;  %v8743_v16 = vld [vmem:[#allocation8 + $0x70] sm:$0xff]   ;;  %v500_v19 = vld [vmem:[%s9312_s30 + $0x20] sm:$0xff]   ;;  %1064 = vst [vmem:[#allocation2 + $0x118] sm:$0xf] %v9120_v40  ;;  %s7152_s18 = sshll.u32 %s11087_s10, 4  ;;  %s11146_s20 = scalar_lea.hbm %s11205_s7, %s7716_s17  ;;  %s11148_s18 = int_to_ptr.vmem [resolvable:$true] %s7152_s18 }
  0x64   : > { %8079 = vmatpush3.bf16.msra.mxu0 %v8719_v1  ;;  %8613 = vmatpush3.bf16.msra.mxu1 %v8719_v1  ;;  %v8744_v15 = vld [vmem:[#allocation8 + $0x38] sm:$0xff]   ;;  %v516_v20 = vld [vmem:[%s9312_s30 + $0x60] sm:$0xff]   ;;  %v8745_v21 = vld [vmem:[#allocation8 + $0x68] sm:$0xff]   ;;  %vm1129_vm3 = vsmask.f32 4368  ;;  %s7136_s5 = scalar_lea.sflag [#allocation5], %s9306_s14 }
  0x65   : > { %8080 = vmatprep.subr.bf16.mxu0 %v8720_v2  ;;  %8606 = vmatprep.subr.bf16.mxu1 %v8720_v2  ;;  %v498_v17 = vld [vmem:[%s9312_s30 + $0x18] sm:$0xff]   ;;  %v502_v22 = vld [vmem:[%s9312_s30 + $0x28] sm:$0xff]   ;;  %v504_v24 = vld [vmem:[%s9312_s30 + $0x30] sm:$0xff]   ;;  %vm433_vm4 = vsmask.f32 256  ;;  %s9024_s21 = scalar_lea.vmem %s11148_s18, 2048 }
  0x66   : > { %v514_v18 = vld [vmem:[%s9312_s30 + $0x58] sm:$0xff]   ;;  %v518_v23 = vld [vmem:[%s9312_s30 + $0x68] sm:$0xff]   ;;  %v520_v25 = vld [vmem:[%s9312_s30 + $0x70] sm:$0xff]   ;;  %vm2175_vm8 = vsmask.f32 3328  ;;  %p9025_p1 = scmp.ne.s32.totalorder %s11148_s18, %s9024_s21  ;;  %p11397_p4 = scmp.ne.s32.totalorder %s11228_s8, 0 }
  0x67   : > { %v506_v26 = vld [vmem:[%s9312_s30 + $0x38] sm:$0xff]   ;;  %v8746_v28 = vld [vmem:[#allocation8 + $0x30] sm:$0xff]   ;;  %v8747_v29 = vld [vmem:[#allocation8 + $0x60] sm:$0xff]   ;;  %vm2176_vm9 = vsmask.f32 7440  ;;  %s9121_s27 = smov [#allocation11]  }
  0x68   : > { %8081 = vmatpush3.bf16.msra.mxu0 %v8720_v2  ;;  %8614 = vmatpush3.bf16.msra.mxu1 %v8720_v2  ;;  %v522_v27 = vld [vmem:[%s9312_s30 + $0x78] sm:$0xff]   ;;  %v8748_v30 = vld [vmem:[#allocation8 + $0x28] sm:$0xff]   ;;  %v8750_v32 = vld [vmem:[#allocation8 + $0x20] sm:$0xff]   ;;  %p9026_p8 = pnand %p9025_p1, %p11397_p4 }
  0x69   : > { %8082 = vmatprep.subr.bf16.mxu0 %v8721_v3  ;;  %8607 = vmatprep.subr.bf16.mxu1 %v8721_v3  ;;  %v8749_v31 = vld [vmem:[#allocation8 + $0x58] sm:$0xff]   ;;  %vm9342_vm2 = vmand %vm375_vm0, %vm376_vm1  ;;  %v8751_v34 = vld [vmem:[#allocation8 + $0x50] sm:$0xff]  }
  0x6a   : > { %v11233_v33 = vsel %vm9342_vm2, 4294967295, %v11232_v33  ;;  %v381_v35 = vld [vmem:[#allocation2 + $0x10] sm:$0x8]  ;;  %v384_v36 = vld [vmem:[#allocation2 + $0x20] sm:$0x8]  ;;  %v8752_v39 = vld [vmem:[#allocation8 + $0x18] sm:$0xff]   ;;  %p9027_p13 = pneg %p9026_p8 }
  0x6b   : > { %11234 = vst [vmem:[#allocation16_spill] sm:$0xff] %v11233_v33  ;;  %v382_v37 = vsel %vm9342_vm2, 0, %v381_v35  ;;  %v385_v38 = vsel %vm9342_vm2, 0, %v384_v36  ;;  %v8753_v41 = vld [vmem:[#allocation8 + $0x48] sm:$0xff]   ;;  %v378_v42 = vld [vmem:[#allocation2] sm:$0x8]  ;;  %vm9355_vm5 = vmor %vm433_vm4, %vm1129_vm3 }
  0x6c   : > { %8083 = vmatpush3.bf16.msra.mxu0 %v8721_v3  ;;  %8615 = vmatpush3.bf16.msra.mxu1 %v8721_v3  ;;  %383 = vst [vmem:[#allocation2 + $0x10] sm:$0x8] %v382_v37  ;;  %386 = vst [vmem:[#allocation2 + $0x20] sm:$0x8] %v385_v38  ;;  %v379_v43 = vsel %vm9342_vm2, 0, %v378_v42  ;;  %v8754_v44 = vld [vmem:[#allocation8 + $0x10] sm:$0xff]  }
  0x6d   : > { %8084 = vmatprep.subr.bf16.mxu0 %v8722_v6  ;;  %8608 = vmatprep.subr.bf16.mxu1 %v8722_v6  ;;  %380 = vst [vmem:[#allocation2] sm:$0x8] %v379_v43  ;;  %v8755_v45 = vld [vmem:[#allocation8 + $0x40] sm:$0xff]   ;;  %v1067_v47 = vld [vmem:[#allocation2 + $0x8] sm:$0xf]  ;;  %vm9392_vm7 = vmand %vm432_vm6, %vm433_vm4 }
  0x6e   : > { %v1066_v46 = vld [vmem:[#allocation2 + $0x4] sm:$0xf]  ;;  %v8756_v48 = vld [vmem:[#allocation8 + $0x8] sm:$0xff]   ;;  %v1146_v50 = vshrl.u32 %v1067_v47, 16  ;;  %v1149_v55 = vshll.u32 %v1067_v47, 16  ;;  %vm9460_vm10 = vmor %vm2175_vm8, %vm2176_vm9 }
  0x6f   : > { %v1137_v49 = vshrl.u32 %v1066_v46, 16  ;;  %v7380_v51 = vcombine.low %v1066_v46, %v1067_v47  ;;  %v1140_v53 = vshll.u32 %v1066_v46, 16  ;;  %v390_v58 = vld [vmem:[#allocation2 + $0x40] sm:$0x8]  ;;  %v387_v59 = vld [vmem:[#allocation2 + $0x30] sm:$0x8] }
  0x70   : > { %8085 = vmatpush3.bf16.msra.mxu0 %v8722_v6  ;;  %8616 = vmatpush3.bf16.msra.mxu1 %v8722_v6  ;;  %v1148_v54 = vrot.slane %v1146_v50, 7  ;;  %v391_v60 = vsel %vm9342_vm2, 0, %v390_v58  ;;  %v8760_v61 = vld [vmem:[#allocation8] sm:$0xff]   ;;  %v388_v3 = vsel %vm9342_vm2, 0, %v387_v59  ;;  %v423_v35 = vld [vmem:[#allocation2 + $0xf0] sm:$0x8] }
  0x71   : > { %8086 = vmatprep.subr.bf16.mxu0 %v8723_v7  ;;  %8609 = vmatprep.subr.bf16.mxu1 %v8723_v7  ;;  %v1139_v52 = vrot.slane %v1137_v49, 7  ;;  %392 = vst [vmem:[#allocation2 + $0x40] sm:$0x8] %v391_v60  ;;  %389 = vst [vmem:[#allocation2 + $0x30] sm:$0x8] %v388_v3  ;;  %v424_v36 = vsel %vm9342_vm2, 0, %v423_v35 }
  0x72   : > { %v1151_v1 = vor.u32 %v1149_v55, %v1148_v54  ;;  %425 = vst [vmem:[#allocation2 + $0xf0] sm:$0x8] %v424_v36  ;;  %v435_v37 = vld [vmem:[#allocation2 + $0xc] sm:$0x1]  ;;  %v444_v40 = vld [vmem:[#allocation2 + $0x3c] sm:$0x1] }
  0x73   : > { %v1142_v63 = vor.u32 %v1140_v53, %v1139_v52  ;;  %v1144_v0 = vrot.slane %v1139_v52, 4  ;;  %v436_v38 = vsel %vm9392_vm7, 0, %v435_v37  ;;  %v445_v42 = vsel %vm9392_vm7, 0, %v444_v40  ;;  %v1068_v43 = vld [vmem:[#allocation2 + $0x10] sm:$0x8] }
  0x74   : > { %8087 = vmatpush3.bf16.msra.mxu0 %v8723_v7  ;;  %8617 = vmatpush3.bf16.msra.mxu1 %v8723_v7  ;;  %v1065_v56 = vld [vmem:[#allocation2] sm:$0x8]  ;;  %437 = vst [vmem:[#allocation2 + $0xc] sm:$0x1] %v436_v38  ;;  %446 = vst [vmem:[#allocation2 + $0x3c] sm:$0x1] %v445_v42 }
  0x75   : > { %8088 = vmatprep.subr.bf16.mxu0 %v8724_v8  ;;  %8610 = vmatprep.subr.bf16.mxu1 %v8724_v8  ;;  %v1132_v57 = vshrl.u32 %v1065_v56, 16  ;;  %v1152_v5 = vsel %vm9355_vm5, %v1144_v0, %v1151_v1  ;;  %v396_v7 = vld [vmem:[#allocation2 + $0x60] sm:$0x8]  ;;  %v1154_v46 = vshrl.u32 %v1068_v43, 16  ;;  %v2110_v54 = vld [vmem:[#allocation2 + $0x4] sm:$0xf] }
  0x76   : > { %v2111_v58 = vld [vmem:[#allocation2 + $0x8] sm:$0xf]  ;;  %v2179_v0 = vshrl.u32 %v2110_v54, 16  ;;  %v2182_v1 = vshll.u32 %v2110_v54, 16 }
  0x77   : > { %v7340_v62 = vrot.slane %v1132_v57, 11  ;;  %v2188_v3 = vshll.u32 %v2111_v58, 16 }
  0x78   : > { %8089 = vmatpush3.bf16.msra.mxu0 %v8724_v8  ;;  %8618 = vmatpush3.bf16.msra.mxu1 %v8724_v8  ;;  %v397_v8 = vsel %vm9342_vm2, 0, %v396_v7  ;;  %v1074_v50 = vld [vmem:[#allocation2 + $0x30] sm:$0x8] }
  0x79   : > { %8090 = vmatprep.subr.bf16.mxu0 %v8725_v9  ;;  %8611 = vmatprep.subr.bf16.mxu1 %v8725_v9  ;;  %v1143_v4 = vsel %vm9355_vm5, %v7340_v62, %v1142_v63  ;;  %398 = vst [vmem:[#allocation2 + $0x60] sm:$0x8] %v397_v8  ;;  %v1198_v55 = vshrl.u32 %v1074_v50, 16  ;;  %v1110_v43 = vld [vmem:[#allocation2 + $0xf0] sm:$0x8] }
  0x7a   : > { %v7356_v6 = vcombine.low %v1143_v4, %v1152_v5  ;;  %v2192_v4 = vshrl.u32 %v2111_v58, 16  ;;  %v450_v5 = vld [vmem:[#allocation2 + $0x5c] sm:$0x1]  ;;  %v1462_v58 = vshrl.u32 %v1110_v43, 16 }
  0x7c   : > { %8091 = vmatpush3.bf16.msra.mxu0 %v8725_v9  ;;  %8619 = vmatpush3.bf16.msra.mxu1 %v8725_v9  ;;  %v393_v9 = vld [vmem:[#allocation2 + $0x50] sm:$0x8] }
  0x7d   : > { %8172 = vmatprep.subr.bf16.mxu0 %v8742_v14  ;;  %8124 = vmatprep.subr.bf16.mxu1 %v8744_v15 }
  0x7f   : > { %8093 = vmatmul.mubr.bf16.vlgmr.msra.gmra.mxu0 %v494_v10  ;;  %8109 = vmatmul.mubr.bf16.vlgmr.msra.gmra.mxu1 %v510_v11  ;;  %v394_v10 = vsel %vm9342_vm2, 0, %v393_v9  ;;  %v9369_v11 = vld [vmem:[#allocation8 + $0xb8] sm:$0xff]  }
  0x80   : > { %8096 = vmatprep.mubr.bf16.mxu0 %v496_v12  ;;  %8112 = vmatprep.mubr.bf16.mxu1 %v512_v13  ;;  %395 = vst [vmem:[#allocation2 + $0x50] sm:$0x8] %v394_v10  ;;  %v402_v12 = vld [vmem:[#allocation2 + $0x80] sm:$0x8]  ;;  %v451_v10 = vsel %vm9392_vm7, 0, %v450_v5 }
  0x81   : > { %8173 = vmatpush3.bf16.msra.mxu0 %v8742_v14  ;;  %8125 = vmatpush3.bf16.msra.mxu1 %v8744_v15  ;;  %v403_v13 = vsel %vm9342_vm2, 0, %v402_v12  ;;  %v399_v14 = vld [vmem:[#allocation2 + $0x70] sm:$0x8]  ;;  %v1083_v56 = vld [vmem:[#allocation2 + $0x60] sm:$0x8] }
  0x82   : > { %8174 = vmatprep.subr.bf16.mxu0 %v8743_v16  ;;  %8126 = vmatprep.subr.bf16.mxu1 %v8746_v28  ;;  %404 = vst [vmem:[#allocation2 + $0x80] sm:$0x8] %v403_v13  ;;  %v400_v15 = vsel %vm9342_vm2, 0, %v399_v14  ;;  %v1264_v8 = vshrl.u32 %v1083_v56, 16  ;;  %452 = vst [vmem:[#allocation2 + $0x5c] sm:$0x1] %v451_v10 }
  0x83   : > { %401 = vst [vmem:[#allocation2 + $0x70] sm:$0x8] %v400_v15  ;;  %v456_v5 = vld [vmem:[#allocation2 + $0x7c] sm:$0x1] }
  0x84   : > { %v9424_v35 = vrot.slane %v1264_v8, 11 }
  0x85   : > { %8175 = vmatpush3.bf16.msra.mxu0 %v8743_v16  ;;  %8127 = vmatpush3.bf16.msra.mxu1 %v8746_v28  ;;  %v405_v16 = vld [vmem:[#allocation2 + $0x90] sm:$0x8] }
  0x86   : > { %8176 = vmatprep.subr.bf16.mxu0 %v8745_v21  ;;  %8128 = vmatprep.subr.bf16.mxu1 %v8748_v30 }
  0x87   : > { %8097 = vmatmul.mubr.bf16.gmra.mxu0 %v498_v17  ;;  %8113 = vmatmul.mubr.bf16.gmra.mxu1 %v514_v18  ;;  %v408_v17 = vld [vmem:[#allocation2 + $0xa0] sm:$0x8]  ;;  %v406_v18 = vsel %vm9342_vm2, 0, %v405_v16  ;;  %v1080_v59 = vld [vmem:[#allocation2 + $0x50] sm:$0x8] }
  0x88   : > { %8100 = vmatprep.mubr.bf16.mxu0 %v500_v19  ;;  %8116 = vmatprep.mubr.bf16.mxu1 %v516_v20  ;;  %v409_v19 = vsel %vm9342_vm2, 0, %v408_v17  ;;  %407 = vst [vmem:[#allocation2 + $0x90] sm:$0x8] %v406_v18  ;;  %v411_v20 = vld [vmem:[#allocation2 + $0xb0] sm:$0x8]  ;;  %v1242_v7 = vshrl.u32 %v1080_v59, 16 }
  0x89   : > { %8177 = vmatpush3.bf16.msra.mxu0 %v8745_v21  ;;  %8129 = vmatpush3.bf16.msra.mxu1 %v8748_v30  ;;  %410 = vst [vmem:[#allocation2 + $0xa0] sm:$0x8] %v409_v19  ;;  %v414_v21 = vld [vmem:[#allocation2 + $0xc0] sm:$0x8]  ;;  %v438_v30 = vld [vmem:[#allocation2 + $0x1c] sm:$0x1] }
  0x8a   : > { %8178 = vmatprep.subr.bf16.mxu0 %v8747_v29  ;;  %8130 = vmatprep.subr.bf16.mxu1 %v8750_v32  ;;  %v1086_v60 = vld [vmem:[#allocation2 + $0x70] sm:$0x8]  ;;  %v9426_v37 = vrot.slane %v1242_v7, 11 }
  0x8b   : > { %v1286_v16 = vshrl.u32 %v1086_v60, 16  ;;  %v2876_v60 = vld [vmem:[#allocation2 + $0x40] sm:$0x8] }
  0x8c   : > { %v2999_v7 = vshrl.u32 %v2876_v60, 16 }
  0x8d   : > { %8179 = vmatpush3.bf16.msra.mxu0 %v8747_v29  ;;  %8131 = vmatpush3.bf16.msra.mxu1 %v8750_v32  ;;  %v11237_v29 = vmov 0  ;;  %v441_v32 = vld [vmem:[#allocation2 + $0x2c] sm:$0x1]  ;;  %v9428_v38 = vrot.slane %v1286_v16, 11 }
  0x8e   : > { %8180 = vmatprep.subr.bf16.mxu0 %v8749_v31  ;;  %8132 = vmatprep.subr.bf16.mxu1 %v8752_v39  ;;  %v11238_v29 = vsel %vm9392_vm7, 4294967295, %v11237_v29 }
  0x8f   : > { %8101 = vmatmul.mubr.bf16.gmra.mxu0 %v502_v22  ;;  %8117 = vmatmul.mubr.bf16.gmra.mxu1 %v518_v23  ;;  %v9380_v22 = vld [vmem:[#allocation8 + $0xf8] sm:$0xff]   ;;  %v412_v23 = vsel %vm9342_vm2, 0, %v411_v20  ;;  %11239 = vst [vmem:[#allocation17_spill] sm:$0xff] %v11238_v29  ;;  %v1092_v62 = vld [vmem:[#allocation2 + $0x90] sm:$0x8] }
  0x90   : > { %8104 = vmatprep.mubr.bf16.mxu0 %v504_v24  ;;  %8120 = vmatprep.mubr.bf16.mxu1 %v520_v25  ;;  %413 = vst [vmem:[#allocation2 + $0xb0] sm:$0x8] %v412_v23  ;;  %v415_v24 = vsel %vm9342_vm2, 0, %v414_v21  ;;  %v417_v25 = vld [vmem:[#allocation2 + $0xd0] sm:$0x8]  ;;  %v1330_v18 = vshrl.u32 %v1092_v62, 16 }
  0x91   : > { %8181 = vmatpush3.bf16.msra.mxu0 %v8749_v31  ;;  %8133 = vmatpush3.bf16.msra.mxu1 %v8752_v39  ;;  %416 = vst [vmem:[#allocation2 + $0xc0] sm:$0x8] %v415_v24  ;;  %v439_v31 = vsel %vm9392_vm7, 0, %v438_v30  ;;  %v447_v39 = vld [vmem:[#allocation2 + $0x4c] sm:$0x1]  ;;  %v2181_v21 = vrot.slane %v2179_v0, 4 }
  0x92   : > { %8182 = vmatprep.subr.bf16.mxu0 %v8751_v34  ;;  %8134 = vmatprep.subr.bf16.mxu1 %v8754_v44  ;;  %440 = vst [vmem:[#allocation2 + $0x1c] sm:$0x1] %v439_v31  ;;  %v1095_v63 = vld [vmem:[#allocation2 + $0xa0] sm:$0x8]  ;;  %v2184_v23 = vrot.slane %v2182_v1, 5  ;;  %v9418_v24 = vrot.slane %v2188_v3, 5 }
  0x93   : > { %v1352_v19 = vshrl.u32 %v1095_v63, 16  ;;  %v2870_v20 = vld [vmem:[#allocation2 + $0x20] sm:$0x8]  ;;  %v2112_v31 = vld [vmem:[#allocation2 + $0xc] sm:$0x1]  ;;  %v9432_v40 = vrot.slane %v1330_v18, 11 }
  0x94   : > { %v2955_v36 = vshrl.u32 %v2870_v20, 16 }
  0x95   : > { %8183 = vmatpush3.bf16.msra.mxu0 %v8751_v34  ;;  %8135 = vmatpush3.bf16.msra.mxu1 %v8754_v44  ;;  %v442_v34 = vsel %vm9392_vm7, 0, %v441_v32  ;;  %v1071_v44 = vld [vmem:[#allocation2 + $0x20] sm:$0x8]  ;;  %v9420_v32 = vrot.slane %v1198_v55, 11  ;;  %v9434_v42 = vrot.slane %v1352_v19, 11 }
  0x96   : > { %8184 = vmatprep.subr.bf16.mxu0 %v8753_v41  ;;  %8136 = vmatprep.subr.bf16.mxu1 %v8756_v48  ;;  %443 = vst [vmem:[#allocation2 + $0x2c] sm:$0x1] %v442_v34  ;;  %v1176_v47 = vshrl.u32 %v1071_v44, 16  ;;  %v2185_v44 = vor.u32 %v2184_v23, %v2181_v21  ;;  %v9445_v55 = vrot.slane %v2955_v36, 11  ;;  %v9466_v21 = vrot.slane %v1462_v58, 11 }
  0x97   : > { %8105 = vmatmul.mubr.bf16.gmra.mxu0 %v506_v26  ;;  %8121 = vmatmul.mubr.bf16.gmra.mxu1 %v522_v27  ;;  %v420_v26 = vld [vmem:[#allocation2 + $0xe0] sm:$0x8]  ;;  %v418_v27 = vsel %vm9342_vm2, 0, %v417_v25  ;;  %v1098_v9 = vld [vmem:[#allocation2 + $0xb0] sm:$0x8]  ;;  %v2194_v25 = vrot.slane %v2192_v4, 4 }
  0x98   : > { %8188 = vmatprep.mubr.bf16.mxu0 %v7380_v51  ;;  %8140 = vmatprep.mubr.bf16.mxu1 %v7356_v6  ;;  %v421_v28 = vsel %vm9342_vm2, 0, %v420_v26  ;;  %419 = vst [vmem:[#allocation2 + $0xd0] sm:$0x8] %v418_v27  ;;  %v9408_v51 = vrot.slane %v1154_v46, 11  ;;  %v9410_v52 = vrot.slane %v1176_v47, 11  ;;  %v1374_v26 = vshrl.u32 %v1098_v9, 16 }
  0x99   : > { %8185 = vmatpush3.bf16.msra.mxu0 %v8753_v41  ;;  %8137 = vmatpush3.bf16.msra.mxu1 %v8756_v48  ;;  %422 = vst [vmem:[#allocation2 + $0xe0] sm:$0x8] %v421_v28  ;;  %v448_v41 = vsel %vm9392_vm7, 0, %v447_v39  ;;  %v1077_v48 = vld [vmem:[#allocation2 + $0x40] sm:$0x8]  ;;  %v2198_v46 = vshll.u32 %v2112_v31, 16 }
  0x9a   : > { %8186 = vmatprep.subr.bf16.mxu0 %v8755_v45  ;;  %8138 = vmatprep.subr.bf16.mxu1 %v8760_v61  ;;  %449 = vst [vmem:[#allocation2 + $0x4c] sm:$0x1] %v448_v41  ;;  %v1220_v53 = vshrl.u32 %v1077_v48, 16  ;;  %v453_v6 = vld [vmem:[#allocation2 + $0x6c] sm:$0x1]  ;;  %v9437_v48 = vrot.slane %v1374_v26, 11 }
  0x9b   : > { %v454_v12 = vsel %vm9392_vm7, 0, %v453_v6  ;;  %v1101_v13 = vld [vmem:[#allocation2 + $0xc0] sm:$0x8]  ;;  %v2873_v41 = vld [vmem:[#allocation2 + $0x30] sm:$0x8]  ;;  %v2186_v62 = vrot.slane %v2185_v44, 4 }
  0x9c   : > { %455 = vst [vmem:[#allocation2 + $0x6c] sm:$0x1] %v454_v12  ;;  %v1396_v27 = vshrl.u32 %v1101_v13, 16  ;;  %v9422_v34 = vrot.slane %v1220_v53, 11  ;;  %v2115_v47 = vld [vmem:[#allocation2 + $0x1c] sm:$0x1] }
  0x9d   : > { %8187 = vmatpush3.bf16.msra.mxu0 %v8755_v45  ;;  %8139 = vmatpush3.bf16.msra.mxu1 %v8760_v61  ;;  %v2867_v45 = vld [vmem:[#allocation2 + $0x10] sm:$0x8]  ;;  %v1089_v61 = vld [vmem:[#allocation2 + $0x80] sm:$0x8]  ;;  %v2118_v54 = vld [vmem:[#allocation2 + $0x2c] sm:$0x1]  ;;  %v2191_v23 = vsel %vm9460_vm10, %v2186_v62, %v9418_v24 }
  0x9e   : > { %8220 = vmatprep.subr.bf16.mxu1 %v9369_v11  ;;  %8268 = vmatprep.subr.bf16.mxu0 %v9380_v22  ;;  %v2933_v49 = vshrl.u32 %v2867_v45, 16  ;;  %v1308_v17 = vshrl.u32 %v1089_v61, 16  ;;  %v2195_v45 = vor.u32 %v2194_v25, %v9418_v24  ;;  %v2977_v56 = vshrl.u32 %v2873_v41, 16  ;;  %v2879_v61 = vld [vmem:[#allocation2 + $0x50] sm:$0x8] }
  0x9f   : > { %v1104_v14 = vld [vmem:[#allocation2 + $0xd0] sm:$0x8]  ;;  %v2222_v59 = vshll.u32 %v2115_v47, 16  ;;  %v2200_v0 = vrot.slane %v2198_v46, 5  ;;  %v2246_v1 = vshll.u32 %v2118_v54, 16  ;;  %v3021_v8 = vshrl.u32 %v2879_v61, 16 }
  0xa0   : > { %v9412_v57 = vrot.slane %v2933_v49, 11  ;;  %v1107_v15 = vld [vmem:[#allocation2 + $0xe0] sm:$0x8]  ;;  %v1418_v28 = vshrl.u32 %v1104_v14, 16  ;;  %v9430_v39 = vrot.slane %v1308_v17, 11  ;;  %v9439_v49 = vrot.slane %v1396_v27, 11 }
  0xa1   : > { %v1440_v30 = vshrl.u32 %v1107_v15, 16  ;;  %v2196_v63 = vrot.slane %v2195_v45, 4  ;;  %v2124_v3 = vld [vmem:[#allocation2 + $0x4c] sm:$0x1]  ;;  %v2121_v4 = vld [vmem:[#allocation2 + $0x3c] sm:$0x1] }
  0xa2   : > { %v9441_v50 = vrot.slane %v1418_v28, 11  ;;  %v459_v6 = vld [vmem:[#allocation2 + $0x8c] sm:$0x1]  ;;  %v457_v9 = vsel %vm9392_vm7, 0, %v456_v5  ;;  %v2882_v12 = vld [vmem:[#allocation2 + $0x60] sm:$0x8] }
  0xa3   : > { %v9443_v53 = vrot.slane %v1440_v30, 11  ;;  %v460_v10 = vsel %vm9392_vm7, 0, %v459_v6  ;;  %v2885_v13 = vld [vmem:[#allocation2 + $0x70] sm:$0x8]  ;;  %v2127_v14 = vld [vmem:[#allocation2 + $0x5c] sm:$0x1]  ;;  %v2201_v25 = vsel %vm9460_vm10, %v2196_v63, %v2200_v0 }
  0xa4   : > { %458 = vst [vmem:[#allocation2 + $0x7c] sm:$0x1] %v457_v9  ;;  %461 = vst [vmem:[#allocation2 + $0x8c] sm:$0x1] %v460_v10  ;;  %v9454_v15 = vld [vmem:[%s11200_s2] ss:$0 sm:$0xff] }
  0xa5   : > { %v9456_v16 = vrot.slane %v2977_v56, 11  ;;  %v11240_v17 = vmov 0  ;;  %v9464_v18 = vrot.slane %v2222_v59, 5  ;;  %v2270_v19 = vshll.u32 %v2121_v4, 16  ;;  %v2130_v27 = vld [vmem:[#allocation2 + $0x6c] sm:$0x1] }
  0xa6   : > { %v11241_v17 = vsel %vm9460_vm10, 4294967295, %v11240_v17  ;;  %v2294_v20 = vshll.u32 %v2124_v3, 16  ;;  %v9473_v26 = vrot.slane %v2246_v1, 5  ;;  %v462_v28 = vld [vmem:[#allocation2 + $0x9c] sm:$0x1]  ;;  %v3043_v36 = vshrl.u32 %v2882_v12, 16 }
  0xa7   : > { %11242 = vst [vmem:[#allocation18_spill] sm:$0xff] %v11241_v17  ;;  %v3065_v41 = vshrl.u32 %v2885_v13, 16  ;;  %v2318_v43 = vshll.u32 %v2127_v14, 16  ;;  %v463_v44 = vsel %vm9392_vm7, 0, %v462_v28  ;;  %v9479_v24 = vrot.slane %v2999_v7, 11 }
  0xa8   : > { %v9481_v47 = vrot.slane %v3021_v8, 11  ;;  %v2888_v54 = vld [vmem:[#allocation2 + $0x80] sm:$0x8]  ;;  %464 = vst [vmem:[#allocation2 + $0x9c] sm:$0x1] %v463_v44  ;;  %v9483_v59 = vcombine.low %v2191_v23, %v2201_v25  ;;  %v9485_v60 = vrot.slane %v2270_v19, 5 }
  0xa9   : > { %v9487_v61 = vrot.slane %v2294_v20, 5  ;;  %v2342_v62 = vshll.u32 %v2130_v27, 16  ;;  %v2891_v4 = vld [vmem:[#allocation2 + $0x90] sm:$0x8]  ;;  %v9491_v7 = vrot.slane %v3043_v36, 11  ;;  %v9493_v8 = vrot.slane %v3065_v41, 11 }
  0xaa   : > { %v9495_v9 = vrot.slane %v2318_v43, 5  ;;  %v3087_v10 = vshrl.u32 %v2888_v54, 16 }
  0xab   : > { %v2133_v20 = vld [vmem:[#allocation2 + $0x7c] sm:$0x1] }
 0x13f   : > { %v8094_v30 = vpop.f32.mrf.mxu0  ;;  %v8110_v31 = vpop.f32.mrf.mxu1 }
 0x140   : > { %v837_v45 = vadd.f32 %v8094_v30, %v9454_v15  ;;  %v853_v46 = vadd.f32 %v8110_v31, %v9454_v15  ;;  %v9499_v30 = vrot.slane %v2342_v62, 5  ;;  %v3109_v31 = vshrl.u32 %v2891_v4, 16 }
 0x141   : > { %v702_v56 = vpop.f32.mrf.mxu0  ;;  %v766_v58 = vpop.f32.mrf.mxu1 }
 0x142   : > { %v869_v63 = vmax.f32 %v837_v45, 0.0  ;;  %v835_v0 = vadd.f32 %v9454_v15, %v702_v56  ;;  %v885_v1 = vmax.f32 %v853_v46, 0.0  ;;  %v851_v3 = vadd.f32 %v9454_v15, %v766_v58  ;;  %11243 = vst [vmem:[#allocation19_spill] sm:$0xff] %v9499_v30  ;;  %v2136_v45 = vld [vmem:[#allocation2 + $0x8c] sm:$0x1] }
 0x143   : > { %v8095_v5 = vpop.f32.mrf.mxu0  ;;  %v8111_v6 = vpop.f32.mrf.mxu1 }
 0x144   : > { %v7654_v12 = vpack.c.bf16 %v869_v63, %v869_v63  ;;  %v867_v13 = vmax.f32 %v835_v0, 0.0  ;;  %v838_v14 = vadd.f32 %v8095_v5, %v9454_v15  ;;  %v7670_v19 = vpack.c.bf16 %v885_v1, %v885_v1  ;;  %v2894_v5 = vld [vmem:[#allocation2 + $0xa0] sm:$0x8] }
 0x145   : > { %v705_v23 = vpop.f32.mrf.mxu0  ;;  %v883_v25 = vmax.f32 %v851_v3, 0.0  ;;  %v854_v27 = vadd.f32 %v8111_v6, %v9454_v15  ;;  %v769_v28 = vpop.f32.mrf.mxu1  ;;  %v9503_v63 = vrot.slane %v3087_v10, 11  ;;  %v2366_v0 = vshll.u32 %v2133_v20, 16 }
 0x146   : > { %1030 = vst [vmem:[#allocation2 + $0x24] sm:$0xf] %v7654_v12  ;;  %v7652_v36 = vpack.c.bf16 %v867_v13, %v867_v13  ;;  %v870_v41 = vmax.f32 %v838_v14, 0.0  ;;  %v836_v43 = vadd.f32 %v9454_v15, %v705_v23  ;;  %1046 = vst [vmem:[#allocation2 + $0xa4] sm:$0xf] %v7670_v19  ;;  %v852_v44 = vadd.f32 %v9454_v15, %v769_v28 }
 0x147   : > { %v8098_v46 = vpop.f32.mrf.mxu0  ;;  %v7668_v54 = vpack.c.bf16 %v883_v25, %v883_v25  ;;  %v886_v56 = vmax.f32 %v854_v27, 0.0  ;;  %v8114_v58 = vpop.f32.mrf.mxu1  ;;  %v9507_v19 = vrot.slane %v3109_v31, 11  ;;  %v2390_v23 = vshll.u32 %v2136_v45, 16 }
 0x148   : > { %1028 = vst [vmem:[#allocation2 + $0x14] sm:$0xf] %v7652_v36  ;;  %v7655_v62 = vpack.c.bf16 %v870_v41, %v870_v41  ;;  %v868_v1 = vmax.f32 %v836_v43, 0.0  ;;  %v841_v3 = vadd.f32 %v8098_v46, %v9454_v15  ;;  %v884_v4 = vmax.f32 %v852_v44, 0.0 }
 0x149   : > { %v718_v6 = vpop.f32.mrf.mxu0  ;;  %1044 = vst [vmem:[#allocation2 + $0x94] sm:$0xf] %v7668_v54  ;;  %v7671_v12 = vpack.c.bf16 %v886_v56, %v886_v56  ;;  %v857_v13 = vadd.f32 %v8114_v58, %v9454_v15  ;;  %v782_v14 = vpop.f32.mrf.mxu1  ;;  %11244 = vst [vmem:[#allocation20_spill] sm:$0xff] %v9507_v19  ;;  %v9511_v44 = vrot.slane %v2366_v0, 5  ;;  %v3131_v46 = vshrl.u32 %v2894_v5, 16  ;;  %v8774_v19 = vld [vmem:[#allocation8 + $0xf0] sm:$0xff]  }
 0x14a   : > { %1031 = vst [vmem:[#allocation2 + $0x28] sm:$0xf] %v7655_v62  ;;  %v7653_v10 = vpack.c.bf16 %v868_v1, %v868_v1  ;;  %v873_v25 = vmax.f32 %v841_v3, 0.0  ;;  %v839_v20 = vadd.f32 %v9454_v15, %v718_v6  ;;  %v7669_v27 = vpack.c.bf16 %v884_v4, %v884_v4 }
 0x14b   : > { %v8099_v28 = vpop.f32.mrf.mxu0  ;;  %1047 = vst [vmem:[#allocation2 + $0xa8] sm:$0xf] %v7671_v12  ;;  %v889_v36 = vmax.f32 %v857_v13, 0.0  ;;  %v855_v41 = vadd.f32 %v9454_v15, %v782_v14  ;;  %v8115_v43 = vpop.f32.mrf.mxu1  ;;  %11245 = vst [vmem:[#allocation21_spill] sm:$0xff] %v9511_v44  ;;  %v9517_v6 = vrot.slane %v2390_v23, 5  ;;  %v9519_v12 = vrot.slane %v3131_v46, 11 }
 0x14c   : > { %1029 = vst [vmem:[#allocation2 + $0x18] sm:$0xf] %v7653_v10  ;;  %v7658_v54 = vpack.c.bf16 %v873_v25, %v873_v25  ;;  %v871_v31 = vmax.f32 %v839_v20, 0.0  ;;  %v842_v45 = vadd.f32 %v8099_v28, %v9454_v15  ;;  %1045 = vst [vmem:[#allocation2 + $0x98] sm:$0xf] %v7669_v27  ;;  %v858_v56 = vadd.f32 %v8115_v43, %v9454_v15 }
 0x14d   : > { %v721_v58 = vpop.f32.mrf.mxu0  ;;  %v9515_v62 = vld [vmem:[#allocation2 + $0x24] sm:$0xf]  ;;  %v7674_v1 = vpack.c.bf16 %v889_v36, %v889_v36  ;;  %v887_v3 = vmax.f32 %v855_v41, 0.0  ;;  %v785_v4 = vpop.f32.mrf.mxu1  ;;  %11246 = vst [vmem:[#allocation22_spill] sm:$0xff] %v9517_v6  ;;  %11247 = vst [vmem:[#allocation23_spill] sm:$0xff] %v9519_v12 }
 0x14e   : > { %1034 = vst [vmem:[#allocation2 + $0x44] sm:$0xf] %v7658_v54  ;;  %v7656_v0 = vpack.c.bf16 %v871_v31, %v871_v31  ;;  %v874_v5 = vmax.f32 %v842_v45, 0.0  ;;  %v840_v13 = vadd.f32 %v9454_v15, %v721_v58  ;;  %v1181_v14 = vshrl.u32 %v9515_v62, 16 }
 0x14f   : > { %v8102_v10 = vpop.f32.mrf.mxu0  ;;  %v1069_v25 = vld [vmem:[#allocation2 + $0x14] sm:$0xf]  ;;  %v1184_v20 = vshll.u32 %v9515_v62, 16  ;;  %1050 = vst [vmem:[#allocation2 + $0xc4] sm:$0xf] %v7674_v1  ;;  %v7672_v27 = vpack.c.bf16 %v887_v3, %v887_v3  ;;  %v890_v28 = vmax.f32 %v858_v56, 0.0  ;;  %v9525_v36 = vadd.f32 %v9454_v15, %v785_v4 }
 0x150   : > { %1032 = vst [vmem:[#allocation2 + $0x34] sm:$0xf] %v7656_v0  ;;  %v7659_v23 = vpack.c.bf16 %v874_v5, %v874_v5  ;;  %v872_v41 = vmax.f32 %v840_v13, 0.0  ;;  %v845_v43 = vadd.f32 %v8102_v10, %v9454_v15  ;;  %v1159_v46 = vshrl.u32 %v1069_v25, 16 }
 0x151   : > { %v734_v54 = vpop.f32.mrf.mxu0  ;;  %v1162_v31 = vshll.u32 %v1069_v25, 16  ;;  %v1073_v45 = vld [vmem:[#allocation2 + $0x28] sm:$0xf]  ;;  %v9528_v58 = vrot.slane %v1181_v14, 7  ;;  %1048 = vst [vmem:[#allocation2 + $0xb4] sm:$0xf] %v7672_v27  ;;  %v7675_v33 = vpack.c.bf16 %v890_v28, %v890_v28  ;;  %v9534_v14 = vpop.f32.mrf.mxu1 }
 0x152   : > { %1035 = vst [vmem:[#allocation2 + $0x48] sm:$0xf] %v7659_v23  ;;  %v7657_v56 = vpack.c.bf16 %v872_v41, %v872_v41  ;;  %v877_v3 = vmax.f32 %v845_v43, 0.0  ;;  %v843_v4 = vadd.f32 %v9454_v15, %v734_v54  ;;  %v1161_v0 = vrot.slane %v1159_v46, 7 }
 0x153   : > { %v8103_v5 = vpop.f32.mrf.mxu0  ;;  %v1070_v13 = vld [vmem:[#allocation2 + $0x18] sm:$0xf]  ;;  %v1190_v29 = vshrl.u32 %v1073_v45, 16  ;;  %v1193_v10 = vshll.u32 %v1073_v45, 16  ;;  %v7382_v12 = vcombine.low %v9515_v62, %v1073_v45  ;;  %v1186_v6 = vor.u32 %v1184_v20, %v9528_v58  ;;  %1051 = vst [vmem:[#allocation2 + $0xc8] sm:$0xf] %v7675_v33 }
 0x154   : > { %1033 = vst [vmem:[#allocation2 + $0x38] sm:$0xf] %v7657_v56  ;;  %v7662_v27 = vpack.c.bf16 %v877_v3, %v877_v3  ;;  %v875_v28 = vmax.f32 %v843_v4, 0.0  ;;  %v846_v23 = vadd.f32 %v8103_v5, %v9454_v15  ;;  %v1168_v41 = vshrl.u32 %v1070_v13, 16  ;;  %v9549_v5 = vpop.f32.mrf.mxu1 }
 0x155   : > { %v737_v43 = vpop.f32.mrf.mxu0  ;;  %v1171_v54 = vshll.u32 %v1070_v13, 16  ;;  %v7381_v46 = vcombine.low %v1069_v25, %v1070_v13  ;;  %v1192_v1 = vrot.slane %v1190_v29, 7  ;;  %v1164_v44 = vor.u32 %v1162_v31, %v1161_v0  ;;  %v9538_v45 = vld [vmem:[#allocation2 + $0x44] sm:$0xf] }
 0x156   : > { %1038 = vst [vmem:[#allocation2 + $0x64] sm:$0xf] %v7662_v27  ;;  %v7660_v30 = vpack.c.bf16 %v875_v28, %v875_v28  ;;  %v878_v62 = vmax.f32 %v846_v23, 0.0  ;;  %v844_v20 = vadd.f32 %v9454_v15, %v737_v43  ;;  %v1170_v33 = vrot.slane %v1168_v41, 7 }
 0x157   : > { %8189 = vmatmul.mubr.bf16.vlgmr.msra.gmra.mxu0 %v7381_v46  ;;  %v8106_v56 = vpop.f32.mrf.mxu0  ;;  %v1165_v3 = vsel %vm9355_vm5, %v9408_v51, %v1164_v44  ;;  %v1166_v4 = vrot.slane %v1161_v0, 4  ;;  %v1187_v29 = vsel %vm9355_vm5, %v9410_v52, %v1186_v6  ;;  %v1188_v25 = vrot.slane %v9528_v58, 4  ;;  %v9547_v31 = vld [vmem:[#allocation2 + $0x34] sm:$0xf]  ;;  %v8777_v58 = vld [vmem:[#allocation8 + $0xe8] sm:$0xff]  }
 0x158   : > { %1036 = vst [vmem:[#allocation2 + $0x54] sm:$0xf] %v7660_v30  ;;  %v7663_v13 = vpack.c.bf16 %v878_v62, %v878_v62  ;;  %v876_v27 = vmax.f32 %v844_v20, 0.0  ;;  %v849_v28 = vadd.f32 %v8106_v56, %v9454_v15  ;;  %8192 = vmatprep.mubr.bf16.mxu0 %v7382_v12  ;;  %v1173_v23 = vor.u32 %v1171_v54, %v1170_v33  ;;  %v8764_v54 = vld [vmem:[#allocation8 + $0xb0] sm:$0xff]   ;;  %v9563_v56 = vpop.f32.mrf.mxu1 }
 0x159   : > { %8269 = vmatpush3.bf16.msra.mxu0 %v9380_v22  ;;  %v750_v51 = vpop.f32.mrf.mxu0  ;;  %v1195_v44 = vor.u32 %v1193_v10, %v1192_v1  ;;  %v1203_v0 = vshrl.u32 %v9547_v31, 16  ;;  %v1206_v52 = vshll.u32 %v9547_v31, 16  ;;  %v1225_v6 = vshrl.u32 %v9538_v45, 16  ;;  %v1079_v20 = vld [vmem:[#allocation2 + $0x48] sm:$0xf] }
 0x15a   : > { %8270 = vmatprep.subr.bf16.mxu0 %v8774_v19  ;;  %1039 = vst [vmem:[#allocation2 + $0x68] sm:$0xf] %v7663_v13  ;;  %v7661_v30 = vpack.c.bf16 %v876_v27, %v876_v27  ;;  %v881_v41 = vmax.f32 %v849_v28, 0.0  ;;  %v847_v43 = vadd.f32 %v9454_v15, %v750_v51  ;;  %v1174_v12 = vsel %vm9355_vm5, %v1166_v4, %v1173_v23 }
 0x15b   : > { %v8107_v22 = vpop.f32.mrf.mxu0  ;;  %v7357_v46 = vcombine.low %v1165_v3, %v1174_v12  ;;  %v1196_v1 = vsel %vm9355_vm5, %v1188_v25, %v1195_v44  ;;  %v1076_v10 = vld [vmem:[#allocation2 + $0x38] sm:$0xf]  ;;  %v1205_v62 = vrot.slane %v1203_v0, 7  ;;  %v9561_v33 = vrot.slane %v1225_v6, 7  ;;  %v8779_v0 = vld [vmem:[#allocation8 + $0xe0] sm:$0xff]  }
 0x15c   : > { %1037 = vst [vmem:[#allocation2 + $0x58] sm:$0xf] %v7661_v30  ;;  %v7666_v13 = vpack.c.bf16 %v881_v41, %v881_v41  ;;  %v879_v27 = vmax.f32 %v847_v43, 0.0  ;;  %v850_v28 = vadd.f32 %v8107_v22, %v9454_v15  ;;  %v7358_v51 = vcombine.low %v1187_v29, %v1196_v1  ;;  %v8767_v1 = vld [vmem:[#allocation8 + $0xa8] sm:$0xff]  }
 0x15d   : > { %8271 = vmatpush3.bf16.msra.mxu0 %v8774_v19  ;;  %v753_v4 = vpop.f32.mrf.mxu0  ;;  %8141 = vmatmul.mubr.bf16.vlgmr.msra.gmra.mxu1 %v7357_v46  ;;  %v1212_v3 = vshrl.u32 %v1076_v10, 16  ;;  %v1215_v23 = vshll.u32 %v1076_v10, 16  ;;  %v7383_v25 = vcombine.low %v9547_v31, %v1076_v10  ;;  %v1228_v44 = vshll.u32 %v9538_v45, 16  ;;  %v801_v46 = vpop.f32.mrf.mxu1 }
 0x15e   : > { %8272 = vmatprep.subr.bf16.mxu0 %v8777_v58  ;;  %1042 = vst [vmem:[#allocation2 + $0x84] sm:$0xf] %v7666_v13  ;;  %v7664_v6 = vpack.c.bf16 %v879_v27, %v879_v27  ;;  %v882_v12 = vmax.f32 %v850_v28, 0.0  ;;  %v848_v30 = vadd.f32 %v9454_v15, %v753_v4  ;;  %8221 = vmatpush3.bf16.msra.mxu1 %v9369_v11  ;;  %v1234_v29 = vshrl.u32 %v1079_v20, 16  ;;  %v8782_v4 = vld [vmem:[#allocation8 + $0xd8] sm:$0xff]  }
 0x15f   : > { %8144 = vmatprep.mubr.bf16.mxu1 %v7358_v51  ;;  %v1214_v19 = vrot.slane %v1212_v3, 7  ;;  %8193 = vmatmul.mubr.bf16.gmra.mxu0 %v7383_v25  ;;  %v1237_v41 = vshll.u32 %v1079_v20, 16  ;;  %v7384_v43 = vcombine.low %v9538_v45, %v1079_v20  ;;  %v11248_v31 = vmax.f32 %v9525_v36, 0.0  ;;  %v1081_v28 = vld [vmem:[#allocation2 + $0x54] sm:$0xf] }
 0x160   : > { %8222 = vmatprep.subr.bf16.mxu1 %v8764_v54  ;;  %1040 = vst [vmem:[#allocation2 + $0x74] sm:$0xf] %v7664_v6  ;;  %v7667_v10 = vpack.c.bf16 %v882_v12, %v882_v12  ;;  %v880_v13 = vmax.f32 %v848_v30, 0.0  ;;  %v1236_v27 = vrot.slane %v1234_v29, 7  ;;  %v861_v11 = vadd.f32 %v9534_v14, %v9454_v15  ;;  %v8122_v30 = vpop.f32.mrf.mxu1 }
 0x161   : > { %v7673_v22 = vpack.c.bf16 %v11248_v31, %v11248_v31  ;;  %8273 = vmatpush3.bf16.msra.mxu0 %v8777_v58  ;;  %8196 = vmatprep.mubr.bf16.mxu0 %v7384_v43  ;;  %v1208_v51 = vor.u32 %v1206_v52, %v1205_v62  ;;  %v1210_v45 = vrot.slane %v1205_v62, 4  ;;  %v1217_v20 = vor.u32 %v1215_v23, %v1214_v19 }
 0x162   : > { %v1230_v36 = vor.u32 %v1228_v44, %v9561_v33  ;;  %8274 = vmatprep.subr.bf16.mxu0 %v8779_v0  ;;  %1043 = vst [vmem:[#allocation2 + $0x88] sm:$0xf] %v7667_v10  ;;  %v7665_v3 = vpack.c.bf16 %v880_v13, %v880_v13  ;;  %v893_v25 = vmax.f32 %v861_v11, 0.0  ;;  %8223 = vmatpush3.bf16.msra.mxu1 %v8764_v54  ;;  %v1232_v6 = vrot.slane %v9561_v33, 4  ;;  %v1084_v44 = vld [vmem:[#allocation2 + $0x64] sm:$0xf] }
 0x163   : > { %1049 = vst [vmem:[#allocation2 + $0xb8] sm:$0xf] %v7673_v22  ;;  %v1239_v12 = vor.u32 %v1237_v41, %v1236_v27  ;;  %v1209_v14 = vsel %vm9355_vm5, %v9420_v32, %v1208_v51  ;;  %v1218_v52 = vsel %vm9355_vm5, %v1210_v45, %v1217_v20  ;;  %v1082_v62 = vld [vmem:[#allocation2 + $0x58] sm:$0xf]  ;;  %v1247_v23 = vshrl.u32 %v1081_v28, 16  ;;  %8224 = vmatprep.subr.bf16.mxu1 %v8767_v1  ;;  %v8770_v41 = vld [vmem:[#allocation8 + $0xa0] sm:$0xff]  }
 0x164   : > { %v1231_v58 = vsel %vm9355_vm5, %v9422_v34, %v1230_v36  ;;  %1041 = vst [vmem:[#allocation2 + $0x78] sm:$0xf] %v7665_v3  ;;  %v7678_v54 = vpack.c.bf16 %v893_v25, %v893_v25  ;;  %v7359_v33 = vcombine.low %v1209_v14, %v1218_v52  ;;  %v1250_v19 = vshll.u32 %v1081_v28, 16  ;;  %v1085_v32 = vld [vmem:[#allocation2 + $0x68] sm:$0xf]  ;;  %v8784_v51 = vld [vmem:[#allocation8 + $0xd0] sm:$0xff]  }
 0x165   : > { %v1240_v29 = vsel %vm9355_vm5, %v1232_v6, %v1239_v12  ;;  %8275 = vmatpush3.bf16.msra.mxu0 %v8779_v0  ;;  %v1249_v31 = vrot.slane %v1247_v23, 7  ;;  %v1256_v22 = vshrl.u32 %v1082_v62, 16  ;;  %v1259_v10 = vshll.u32 %v1082_v62, 16  ;;  %v814_v0 = vpop.f32.mrf.mxu1 }
 0x166   : > { %v7360_v43 = vcombine.low %v1231_v58, %v1240_v29  ;;  %8276 = vmatprep.subr.bf16.mxu0 %v8782_v4  ;;  %1054 = vst [vmem:[#allocation2 + $0xe4] sm:$0xf] %v7678_v54  ;;  %8145 = vmatmul.mubr.bf16.gmra.mxu1 %v7359_v33  ;;  %v7385_v34 = vcombine.low %v1081_v28, %v1082_v62  ;;  %v1269_v27 = vshrl.u32 %v1084_v44, 16  ;;  %v1272_v11 = vshll.u32 %v1084_v44, 16  ;;  %v8787_v29 = vld [vmem:[#allocation8 + $0xc8] sm:$0xff]  }
 0x167   : > { %v859_v13 = vadd.f32 %v9454_v15, %v9549_v5  ;;  %v1258_v45 = vrot.slane %v1256_v22, 7  ;;  %v1278_v20 = vshrl.u32 %v1085_v32, 16  ;;  %v1281_v36 = vshll.u32 %v1085_v32, 16  ;;  %8225 = vmatpush3.bf16.msra.mxu1 %v8767_v1  ;;  %v8775_v5 = vld [vmem:[#allocation8 + $0x98] sm:$0xff]   ;;  %v1087_v33 = vld [vmem:[#allocation2 + $0x74] sm:$0xf] }
 0x168   : > { %8148 = vmatprep.mubr.bf16.mxu1 %v7360_v43  ;;  %v7386_v3 = vcombine.low %v1084_v44, %v1085_v32  ;;  %8197 = vmatmul.mubr.bf16.gmra.mxu0 %v7385_v34  ;;  %v1271_v6 = vrot.slane %v1269_v27, 7  ;;  %v862_v12 = vadd.f32 %v9563_v56, %v9454_v15  ;;  %v860_v28 = vadd.f32 %v9454_v15, %v801_v46  ;;  %v8123_v34 = vpop.f32.mrf.mxu1 }
 0x169   : > { %v891_v25 = vmax.f32 %v859_v13, 0.0  ;;  %8226 = vmatprep.subr.bf16.mxu1 %v8770_v41  ;;  %v1280_v14 = vrot.slane %v1278_v20, 7  ;;  %v865_v52 = vadd.f32 %v8122_v30, %v9454_v15  ;;  %v1252_v58 = vor.u32 %v1250_v19, %v1249_v31  ;;  %8277 = vmatpush3.bf16.msra.mxu0 %v8782_v4 }
 0x16a   : > { %8200 = vmatprep.mubr.bf16.mxu0 %v7386_v3  ;;  %v1254_v62 = vrot.slane %v1249_v31, 4  ;;  %v894_v1 = vmax.f32 %v862_v12, 0.0  ;;  %v892_v44 = vmax.f32 %v860_v28, 0.0  ;;  %v1261_v54 = vor.u32 %v1259_v10, %v1258_v45  ;;  %8278 = vmatprep.subr.bf16.mxu0 %v8784_v51  ;;  %v1091_v45 = vld [vmem:[#allocation2 + $0x88] sm:$0xf] }
 0x16b   : > { %v7676_v23 = vpack.c.bf16 %v891_v25, %v891_v25  ;;  %v897_v32 = vmax.f32 %v865_v52, 0.0  ;;  %v1253_v56 = vsel %vm9355_vm5, %v9426_v37, %v1252_v58  ;;  %v1274_v46 = vor.u32 %v1272_v11, %v1271_v6  ;;  %v1088_v22 = vld [vmem:[#allocation2 + $0x78] sm:$0xf]  ;;  %8227 = vmatpush3.bf16.msra.mxu1 %v8770_v41  ;;  %v1090_v11 = vld [vmem:[#allocation2 + $0x84] sm:$0xf] }
 0x16c   : > { %v1276_v43 = vrot.slane %v1271_v6, 4  ;;  %v7679_v30 = vpack.c.bf16 %v894_v1, %v894_v1  ;;  %v7677_v4 = vpack.c.bf16 %v892_v44, %v892_v44  ;;  %v1262_v19 = vsel %vm9355_vm5, %v1254_v62, %v1261_v54  ;;  %8228 = vmatprep.subr.bf16.mxu1 %v8775_v5  ;;  %v8788_v52 = vld [vmem:[#allocation8 + $0xc0] sm:$0xff]  }
 0x16d   : > { %1052 = vst [vmem:[#allocation2 + $0xd4] sm:$0xf] %v7676_v23  ;;  %v1283_v31 = vor.u32 %v1281_v36, %v1280_v14  ;;  %v7682_v10 = vpack.c.bf16 %v897_v32, %v897_v32  ;;  %v7361_v13 = vcombine.low %v1253_v56, %v1262_v19  ;;  %v1275_v27 = vsel %vm9355_vm5, %v9424_v35, %v1274_v46  ;;  %v8780_v36 = vld [vmem:[#allocation8 + $0x90] sm:$0xff]   ;;  %v817_v14 = vpop.f32.mrf.mxu1  ;;  %v8785_v56 = vld [vmem:[#allocation8 + $0x88] sm:$0xff]  }
 0x16e   : > { %v1291_v37 = vshrl.u32 %v1087_v33, 16  ;;  %8279 = vmatpush3.bf16.msra.mxu0 %v8784_v51  ;;  %1055 = vst [vmem:[#allocation2 + $0xe8] sm:$0xf] %v7679_v30  ;;  %1053 = vst [vmem:[#allocation2 + $0xd8] sm:$0xf] %v7677_v4  ;;  %v1294_v20 = vshll.u32 %v1087_v33, 16  ;;  %v7387_v28 = vcombine.low %v1087_v33, %v1088_v22  ;;  %v863_v35 = vadd.f32 %v9454_v15, %v814_v0 }
 0x16f   : > { %v1284_v41 = vsel %vm9355_vm5, %v1276_v43, %v1283_v31  ;;  %v1300_v3 = vshrl.u32 %v1088_v22, 16  ;;  %v1303_v25 = vshll.u32 %v1088_v22, 16  ;;  %8280 = vmatprep.subr.bf16.mxu0 %v8787_v29  ;;  %1058 = vst [vmem:[#allocation2 + $0x104] sm:$0xf] %v7682_v10  ;;  %8149 = vmatmul.mubr.bf16.gmra.mxu1 %v7361_v13  ;;  %v1313_v58 = vshrl.u32 %v1090_v11, 16  ;;  %v9607_v31 = vld [vmem:[#allocation8 + $0x178] sm:$0xff]  }
 0x170   : > { %v7362_v6 = vcombine.low %v1275_v27, %v1284_v41  ;;  %v1293_v12 = vrot.slane %v1291_v37, 7  ;;  %v1316_v62 = vshll.u32 %v1090_v11, 16  ;;  %v1322_v23 = vshrl.u32 %v1091_v45, 16  ;;  %8229 = vmatpush3.bf16.msra.mxu1 %v8775_v5  ;;  %8201 = vmatmul.mubr.bf16.gmra.mxu0 %v7387_v28  ;;  %v1093_v22 = vld [vmem:[#allocation2 + $0x94] sm:$0xf] }
 0x171   : > { %v1302_v51 = vrot.slane %v1300_v3, 7  ;;  %v895_v1 = vmax.f32 %v863_v35, 0.0  ;;  %v1325_v44 = vshll.u32 %v1091_v45, 16  ;;  %v7388_v54 = vcombine.low %v1090_v11, %v1091_v45  ;;  %8230 = vmatprep.subr.bf16.mxu1 %v8780_v36  ;;  %v1096_v41 = vld [vmem:[#allocation2 + $0xa4] sm:$0xf] }
 0x172   : > { %8152 = vmatprep.mubr.bf16.mxu1 %v7362_v6  ;;  %v866_v32 = vadd.f32 %v8123_v34, %v9454_v15  ;;  %v1315_v46 = vrot.slane %v1313_v58, 7  ;;  %v1324_v43 = vrot.slane %v1322_v23, 7  ;;  %v864_v33 = vadd.f32 %v9454_v15, %v817_v14  ;;  %8281 = vmatpush3.bf16.msra.mxu0 %v8787_v29  ;;  %v1094_v15 = vld [vmem:[#allocation2 + $0x98] sm:$0xf]  ;;  %v1097_v6 = vld [vmem:[#allocation2 + $0xa8] sm:$0xf] }
 0x173   : > { %v1296_v0 = vor.u32 %v1294_v20, %v1293_v12  ;;  %v7680_v30 = vpack.c.bf16 %v895_v1, %v895_v1  ;;  %8204 = vmatprep.mubr.bf16.mxu0 %v7388_v54  ;;  %v1298_v5 = vrot.slane %v1293_v12, 4  ;;  %v1305_v19 = vor.u32 %v1303_v25, %v1302_v51  ;;  %8282 = vmatprep.subr.bf16.mxu0 %v8788_v52  ;;  %v1099_v14 = vld [vmem:[#allocation2 + $0xb4] sm:$0xf]  ;;  %v8789_v51 = vld [vmem:[#allocation8 + $0x80] sm:$0xff]   ;;  %v1100_v1 = vld [vmem:[#allocation2 + $0xb8] sm:$0xf] }
 0x174   : > { %v898_v4 = vmax.f32 %v866_v32, 0.0  ;;  %v896_v10 = vmax.f32 %v864_v33, 0.0  ;;  %v1318_v13 = vor.u32 %v1316_v62, %v1315_v46  ;;  %v1320_v27 = vrot.slane %v1315_v46, 4  ;;  %8231 = vmatpush3.bf16.msra.mxu1 %v8780_v36 }
 0x175   : > { %v1297_v34 = vsel %vm9355_vm5, %v9428_v38, %v1296_v0  ;;  %1056 = vst [vmem:[#allocation2 + $0xf4] sm:$0xf] %v7680_v30  ;;  %v1306_v29 = vsel %vm9355_vm5, %v1298_v5, %v1305_v19  ;;  %v1327_v11 = vor.u32 %v1325_v44, %v1324_v43  ;;  %v1335_v45 = vshrl.u32 %v1093_v22, 16  ;;  %8232 = vmatprep.subr.bf16.mxu1 %v8785_v56  ;;  %v9620_v30 = vld [vmem:[#allocation8 + $0x138] sm:$0xff]  }
 0x176   : > { %v7683_v37 = vpack.c.bf16 %v898_v4, %v898_v4  ;;  %v7681_v20 = vpack.c.bf16 %v896_v10, %v896_v10  ;;  %v7363_v3 = vcombine.low %v1297_v34, %v1306_v29  ;;  %v1319_v25 = vsel %vm9355_vm5, %v9430_v39, %v1318_v13  ;;  %8283 = vmatpush3.bf16.msra.mxu0 %v8788_v52  ;;  %v1102_v10 = vld [vmem:[#allocation2 + $0xc4] sm:$0xf] }
 0x177   : > { %v1338_v38 = vshll.u32 %v1093_v22, 16  ;;  %v1328_v36 = vsel %vm9355_vm5, %v1320_v27, %v1327_v11  ;;  %v1337_v12 = vrot.slane %v1335_v45, 7  ;;  %v1344_v28 = vshrl.u32 %v1094_v15, 16  ;;  %8364 = vmatprep.subr.bf16.mxu0 %v9607_v31 }
 0x178   : > { %1059 = vst [vmem:[#allocation2 + $0x108] sm:$0xf] %v7683_v37  ;;  %v1347_v35 = vshll.u32 %v1094_v15, 16  ;;  %1057 = vst [vmem:[#allocation2 + $0xf8] sm:$0xf] %v7681_v20  ;;  %8153 = vmatmul.mubr.bf16.gmra.mxu1 %v7363_v3  ;;  %v7364_v58 = vcombine.low %v1319_v25, %v1328_v36  ;;  %v7389_v62 = vcombine.low %v1093_v22, %v1094_v15  ;;  %v1357_v23 = vshrl.u32 %v1096_v41, 16 }
 0x179   : > { %v1360_v39 = vshll.u32 %v1096_v41, 16  ;;  %v1346_v44 = vrot.slane %v1344_v28, 7  ;;  %v1366_v52 = vshrl.u32 %v1097_v6, 16  ;;  %v1369_v54 = vshll.u32 %v1097_v6, 16  ;;  %8233 = vmatpush3.bf16.msra.mxu1 %v8785_v56  ;;  %v1103_v15 = vld [vmem:[#allocation2 + $0xc8] sm:$0xf] }
 0x17a   : > { %v7390_v32 = vcombine.low %v1096_v41, %v1097_v6  ;;  %8156 = vmatprep.mubr.bf16.mxu1 %v7364_v58  ;;  %8205 = vmatmul.mubr.bf16.gmra.mxu0 %v7389_v62  ;;  %v1359_v46 = vrot.slane %v1357_v23, 7  ;;  %v1340_v43 = vor.u32 %v1338_v38, %v1337_v12  ;;  %v1342_v33 = vrot.slane %v1337_v12, 4  ;;  %v1105_v38 = vld [vmem:[#allocation2 + $0xd4] sm:$0xf]  ;;  %v1106_v62 = vld [vmem:[#allocation2 + $0xd8] sm:$0xf] }
 0x17b   : > { %v1379_v0 = vshrl.u32 %v1099_v14, 16  ;;  %v1368_v4 = vrot.slane %v1366_v52, 7  ;;  %v1349_v5 = vor.u32 %v1347_v35, %v1346_v44  ;;  %v1382_v22 = vshll.u32 %v1099_v14, 16  ;;  %8234 = vmatprep.subr.bf16.mxu1 %v8789_v51 }
 0x17c   : > { %8208 = vmatprep.mubr.bf16.mxu0 %v7390_v32  ;;  %v1388_v19 = vshrl.u32 %v1100_v1, 16  ;;  %v1341_v34 = vsel %vm9355_vm5, %v9432_v40, %v1340_v43  ;;  %v1362_v56 = vor.u32 %v1360_v39, %v1359_v46  ;;  %v1364_v13 = vrot.slane %v1359_v46, 4  ;;  %v1108_v32 = vld [vmem:[#allocation2 + $0xe4] sm:$0xf] }
 0x17d   : > { %v1381_v27 = vrot.slane %v1379_v0, 7  ;;  %v1350_v37 = vsel %vm9355_vm5, %v1342_v33, %v1349_v5  ;;  %v1371_v29 = vor.u32 %v1369_v54, %v1368_v4  ;;  %v1391_v45 = vshll.u32 %v1100_v1, 16  ;;  %8235 = vmatpush3.bf16.msra.mxu1 %v8789_v51  ;;  %v1109_v4 = vld [vmem:[#allocation2 + $0xe8] sm:$0xf] }
 0x17e   : > { %v1390_v11 = vrot.slane %v1388_v19, 7  ;;  %v7365_v41 = vcombine.low %v1341_v34, %v1350_v37  ;;  %v1363_v20 = vsel %vm9355_vm5, %v9434_v42, %v1362_v56  ;;  %v7391_v3 = vcombine.low %v1099_v14, %v1100_v1  ;;  %8316 = vmatprep.subr.bf16.mxu1 %v9620_v30 }
 0x17f   : > { %v1401_v25 = vshrl.u32 %v1102_v10, 16  ;;  %v1372_v40 = vsel %vm9355_vm5, %v1364_v13, %v1371_v29  ;;  %v1404_v6 = vshll.u32 %v1102_v10, 16  ;;  %v1410_v36 = vshrl.u32 %v1103_v15, 16 }
 0x180   : > { %v1413_v12 = vshll.u32 %v1103_v15, 16  ;;  %8157 = vmatmul.mubr.bf16.gmra.mxu1 %v7365_v41  ;;  %v7366_v28 = vcombine.low %v1363_v20, %v1372_v40  ;;  %v7392_v51 = vcombine.low %v1102_v10, %v1103_v15  ;;  %v1384_v58 = vor.u32 %v1382_v22, %v1381_v27  ;;  %v1112_v15 = vld [vmem:[#allocation2 + $0xf8] sm:$0xf] }
 0x181   : > { %v1403_v35 = vrot.slane %v1401_v25, 7  ;;  %v1412_v23 = vrot.slane %v1410_v36, 7  ;;  %v1386_v39 = vrot.slane %v1381_v27, 4  ;;  %v1393_v42 = vor.u32 %v1391_v45, %v1390_v11  ;;  %v2868_v36 = vld [vmem:[#allocation2 + $0x14] sm:$0xf] }
 0x182   : > { %v1423_v14 = vshrl.u32 %v1105_v38, 16  ;;  %8160 = vmatprep.mubr.bf16.mxu1 %v7366_v28  ;;  %8209 = vmatmul.mubr.bf16.gmra.mxu0 %v7391_v3  ;;  %v1385_v1 = vsel %vm9355_vm5, %v9437_v48, %v1384_v58  ;;  %v1426_v54 = vshll.u32 %v1105_v38, 16  ;;  %v1432_v0 = vshrl.u32 %v1106_v62, 16  ;;  %v9641_v48 = vld [vmem:[#allocation2 + $0xf4] sm:$0xf] }
 0x183   : > { %v1406_v44 = vor.u32 %v1404_v6, %v1403_v35  ;;  %v1408_v52 = vrot.slane %v1403_v35, 4  ;;  %8212 = vmatprep.mubr.bf16.mxu0 %v7392_v51  ;;  %v1394_v46 = vsel %vm9355_vm5, %v1386_v39, %v1393_v42  ;;  %v1415_v43 = vor.u32 %v1413_v12, %v1412_v23  ;;  %v2869_v58 = vld [vmem:[#allocation2 + $0x18] sm:$0xf] }
 0x184   : > { %v1425_v33 = vrot.slane %v1423_v14, 7  ;;  %v7367_v5 = vcombine.low %v1385_v1, %v1394_v46  ;;  %v1435_v19 = vshll.u32 %v1106_v62, 16  ;;  %v7393_v10 = vcombine.low %v1105_v38, %v1106_v62 }
 0x185   : > { %v1407_v22 = vsel %vm9355_vm5, %v9439_v49, %v1406_v44  ;;  %v1416_v34 = vsel %vm9355_vm5, %v1408_v52, %v1415_v43  ;;  %v1434_v56 = vrot.slane %v1432_v0, 7  ;;  %v1445_v13 = vshrl.u32 %v1108_v32, 16  ;;  %v2871_v52 = vld [vmem:[#allocation2 + $0x24] sm:$0xf] }
 0x186   : > { %v1448_v27 = vshll.u32 %v1108_v32, 16  ;;  %v7368_v37 = vcombine.low %v1407_v22, %v1416_v34  ;;  %v1454_v29 = vshrl.u32 %v1109_v4, 16  ;;  %v1457_v11 = vshll.u32 %v1109_v4, 16 }
 0x187   : > { %v7394_v45 = vcombine.low %v1108_v32, %v1109_v4  ;;  %v1447_v41 = vrot.slane %v1445_v13, 7  ;;  %v1428_v20 = vor.u32 %v1426_v54, %v1425_v33  ;;  %v1430_v3 = vrot.slane %v1425_v33, 4  ;;  %v2872_v33 = vld [vmem:[#allocation2 + $0x28] sm:$0xf] }
 0x188   : > { %v1437_v25 = vor.u32 %v1435_v19, %v1434_v56  ;;  %8161 = vmatmul.mubr.bf16.gmra.mxu1 %v7367_v5  ;;  %v1456_v49 = vrot.slane %v1454_v29, 7  ;;  %v1467_v38 = vshrl.u32 %v9641_v48, 16  ;;  %v1470_v40 = vshll.u32 %v9641_v48, 16  ;;  %v2874_v56 = vld [vmem:[#allocation2 + $0x34] sm:$0xf] }
 0x189   : > { %v1476_v6 = vshrl.u32 %v1112_v15, 16  ;;  %8164 = vmatprep.mubr.bf16.mxu1 %v7368_v37  ;;  %v1429_v12 = vsel %vm9355_vm5, %v9441_v50, %v1428_v20  ;;  %v1450_v35 = vor.u32 %v1448_v27, %v1447_v41  ;;  %v1452_v51 = vrot.slane %v1447_v41, 4  ;;  %v2875_v41 = vld [vmem:[#allocation2 + $0x38] sm:$0xf] }
 0x18a   : > { %v1438_v28 = vsel %vm9355_vm5, %v1430_v3, %v1437_v25  ;;  %8213 = vmatmul.mubr.bf16.gmra.mxu0 %v7393_v10  ;;  %v1459_v23 = vor.u32 %v1457_v11, %v1456_v49  ;;  %v1469_v39 = vrot.slane %v1467_v38, 7  ;;  %v1479_v1 = vshll.u32 %v1112_v15, 16  ;;  %v2113_v38 = vld [vmem:[#allocation2 + $0x14] sm:$0xf] }
 0x18b   : > { %v7369_v62 = vcombine.low %v1429_v12, %v1438_v28  ;;  %v1478_v42 = vrot.slane %v1476_v6, 7  ;;  %8216 = vmatprep.mubr.bf16.mxu0 %v7394_v45  ;;  %v1451_v14 = vsel %vm9355_vm5, %v9443_v53, %v1450_v35  ;;  %v7395_v44 = vcombine.low %v9641_v48, %v1112_v15 }
 0x18c   : > { %v2938_v50 = vshrl.u32 %v2868_v36, 16  ;;  %v1460_v54 = vsel %vm9355_vm5, %v1452_v51, %v1459_v23  ;;  %v2941_v32 = vshll.u32 %v2868_v36, 16  ;;  %v2947_v46 = vshrl.u32 %v2869_v58, 16 }
 0x18d   : > { %v2950_v43 = vshll.u32 %v2869_v58, 16  ;;  %v7370_v0 = vcombine.low %v1451_v14, %v1460_v54  ;;  %v1472_v5 = vor.u32 %v1470_v40, %v1469_v39  ;;  %v1474_v22 = vrot.slane %v1469_v39, 4  ;;  %v2114_v58 = vld [vmem:[#allocation2 + $0x18] sm:$0xf] }
 0x18e   : > { %v2940_v4 = vrot.slane %v2938_v50, 7  ;;  %v2949_v19 = vrot.slane %v2947_v46, 7  ;;  %v1481_v10 = vor.u32 %v1479_v1, %v1478_v42  ;;  %v2960_v34 = vshrl.u32 %v2871_v52, 16  ;;  %v2116_v42 = vld [vmem:[#allocation2 + $0x24] sm:$0xf] }
 0x18f   : > { %v2963_v53 = vshll.u32 %v2871_v52, 16  ;;  %v1473_v27 = vsel %vm9355_vm5, %v9466_v21, %v1472_v5  ;;  %v2969_v15 = vshrl.u32 %v2872_v33, 16  ;;  %v2972_v45 = vshll.u32 %v2872_v33, 16  ;;  %v2117_v52 = vld [vmem:[#allocation2 + $0x28] sm:$0xf] }
 0x190   : > { %v2943_v13 = vor.u32 %v2941_v32, %v2940_v4  ;;  %v2945_v48 = vrot.slane %v2940_v4, 4  ;;  %8165 = vmatmul.mubr.bf16.gmra.mxu1 %v7369_v62  ;;  %v2952_v37 = vor.u32 %v2950_v43, %v2949_v19  ;;  %v1482_v29 = vsel %vm9355_vm5, %v1474_v22, %v1481_v10 }
 0x191   : > { %v2962_v11 = vrot.slane %v2960_v34, 7  ;;  %8168 = vmatprep.mubr.bf16.mxu1 %v7370_v0  ;;  %v7371_v3 = vcombine.low %v1473_v27, %v1482_v29  ;;  %v2971_v25 = vrot.slane %v2969_v15, 7  ;;  %v2982_v49 = vshrl.u32 %v2874_v56, 16  ;;  %v2877_v34 = vld [vmem:[#allocation2 + $0x44] sm:$0xf] }
 0x192   : > { %v2944_v20 = vsel %vm9355_vm5, %v9412_v57, %v2943_v13  ;;  %8217 = vmatmul.mubr.bf16.gmra.mxu0 %v7395_v44  ;;  %v2953_v21 = vsel %vm9355_vm5, %v2945_v48, %v2952_v37  ;;  %v2985_v36 = vshll.u32 %v2874_v56, 16  ;;  %v2991_v51 = vshrl.u32 %v2875_v41, 16  ;;  %v2878_v15 = vld [vmem:[#allocation2 + $0x48] sm:$0xf] }
 0x193   : > { %v2965_v40 = vor.u32 %v2963_v53, %v2962_v11  ;;  %v2967_v6 = vrot.slane %v2962_v11, 4  ;;  %v7444_v12 = vcombine.low %v2944_v20, %v2953_v21  ;;  %v2974_v28 = vor.u32 %v2972_v45, %v2971_v25  ;;  %v8795_v53 = vld [vmem:[#allocation8 + $0x170] sm:$0xff]  }
 0x194   : > { %v2984_v35 = vrot.slane %v2982_v49, 7  ;;  %v2994_v62 = vshll.u32 %v2875_v41, 16  ;;  %v2203_v23 = vshrl.u32 %v2113_v38, 16  ;;  %v2206_v39 = vshll.u32 %v2113_v38, 16  ;;  %v2880_v45 = vld [vmem:[#allocation2 + $0x54] sm:$0xf] }
 0x195   : > { %v2966_v57 = vsel %vm9355_vm5, %v9445_v55, %v2965_v40  ;;  %8284 = vmatprep.mubr.bf16.mxu0 %v7444_v12  ;;  %v2975_v14 = vsel %vm9355_vm5, %v2967_v6, %v2974_v28  ;;  %v2993_v50 = vrot.slane %v2991_v51, 7  ;;  %v2212_v43 = vshll.u32 %v2114_v58, 16  ;;  %v2881_v49 = vld [vmem:[#allocation2 + $0x58] sm:$0xf]  ;;  %v8797_v6 = vld [vmem:[#allocation8 + $0x168] sm:$0xff]  }
 0x196   : > { %v2987_v1 = vor.u32 %v2985_v36, %v2984_v35  ;;  %v2989_v44 = vrot.slane %v2984_v35, 4  ;;  %v7445_v54 = vcombine.low %v2966_v57, %v2975_v14  ;;  %v2205_v32 = vrot.slane %v2203_v23, 4 }
 0x197   : > { %v2208_v46 = vrot.slane %v2206_v39, 5  ;;  %v2996_v33 = vor.u32 %v2994_v62, %v2993_v50  ;;  %v2216_v0 = vshrl.u32 %v2114_v58, 16  ;;  %v2227_v4 = vshrl.u32 %v2116_v42, 16 }
 0x198   : > { %v2988_v55 = vsel %vm9355_vm5, %v9456_v16, %v2987_v1  ;;  %8169 = vmatmul.mubr.bf16.gmra.mxu1 %v7371_v3  ;;  %v2214_v22 = vrot.slane %v2212_v43, 5  ;;  %v2230_v19 = vshll.u32 %v2116_v42, 16  ;;  %v2236_v10 = vshll.u32 %v2117_v52, 16 }
 0x199   : > { %v2209_v5 = vor.u32 %v2208_v46, %v2205_v32  ;;  %v2997_v56 = vsel %vm9355_vm5, %v2989_v44, %v2996_v33  ;;  %8236 = vmatprep.mubr.bf16.mxu1 %v9483_v59  ;;  %v2218_v13 = vrot.slane %v2216_v0, 4  ;;  %v2229_v48 = vrot.slane %v2227_v4, 4  ;;  %v2120_v32 = vld [vmem:[#allocation2 + $0x38] sm:$0xf]  ;;  %v2122_v33 = vld [vmem:[#allocation2 + $0x44] sm:$0xf] }
 0x19a   : > { %v2240_v27 = vshrl.u32 %v2117_v52, 16  ;;  %8285 = vmatmul.mubr.bf16.vlgmr.msra.gmra.mxu0 %v7445_v54  ;;  %v7446_v16 = vcombine.low %v2988_v55, %v2997_v56  ;;  %v2232_v29 = vrot.slane %v2230_v19, 5  ;;  %v2238_v11 = vrot.slane %v2236_v10, 5  ;;  %v8791_v52 = vld [vmem:[#allocation8 + $0x130] sm:$0xff]   ;;  %v8798_v0 = vld [vmem:[#allocation8 + $0x160] sm:$0xff]  }
 0x19b   : > { %v2210_v37 = vrot.slane %v2209_v5, 4  ;;  %v2219_v41 = vor.u32 %v2218_v13, %v2214_v22  ;;  %v3004_v3 = vshrl.u32 %v2877_v34, 16  ;;  %v3007_v25 = vshll.u32 %v2877_v34, 16  ;;  %8365 = vmatpush3.bf16.msra.mxu0 %v9607_v31  ;;  %v2119_v54 = vld [vmem:[#allocation2 + $0x34] sm:$0xf] }
 0x19c   : > { %v2242_v20 = vrot.slane %v2240_v27, 4  ;;  %8288 = vmatprep.mubr.bf16.mxu0 %v7446_v16  ;;  %v2233_v38 = vor.u32 %v2232_v29, %v2229_v48  ;;  %v3013_v21 = vshrl.u32 %v2878_v15, 16  ;;  %v3016_v40 = vshll.u32 %v2878_v15, 16  ;;  %8366 = vmatprep.subr.bf16.mxu0 %v8795_v53  ;;  %v2123_v56 = vld [vmem:[#allocation2 + $0x48] sm:$0xf] }
 0x19d   : > { %v2215_v59 = vsel %vm9460_vm10, %v2210_v37, %v2214_v22  ;;  %v2220_v36 = vrot.slane %v2219_v41, 4  ;;  %v3006_v28 = vrot.slane %v3004_v3, 7  ;;  %v3026_v35 = vshrl.u32 %v2880_v45, 16  ;;  %v2883_v15 = vld [vmem:[#allocation2 + $0x64] sm:$0xf]  ;;  %v8792_v16 = vld [vmem:[#allocation8 + $0x128] sm:$0xff]  }
 0x19e   : > { %v2243_v12 = vor.u32 %v2242_v20, %v2238_v11  ;;  %v2234_v51 = vrot.slane %v2233_v38, 4  ;;  %v3015_v58 = vrot.slane %v3013_v21, 7  ;;  %v3029_v57 = vshll.u32 %v2880_v45, 16  ;;  %v2884_v45 = vld [vmem:[#allocation2 + $0x68] sm:$0xf]  ;;  %v8800_v41 = vld [vmem:[#allocation8 + $0x158] sm:$0xff]  }
 0x19f   : > { %v3035_v62 = vshrl.u32 %v2881_v49, 16  ;;  %v2225_v31 = vsel %vm9460_vm10, %v2220_v36, %v9464_v18  ;;  %v3009_v39 = vor.u32 %v3007_v25, %v3006_v28  ;;  %v3011_v42 = vrot.slane %v3006_v28, 4  ;;  %8367 = vmatpush3.bf16.msra.mxu0 %v8795_v53 }
 0x1a0   : > { %v2244_v23 = vrot.slane %v2243_v12, 4  ;;  %v7405_v14 = vcombine.low %v2215_v59, %v2225_v31  ;;  %v2239_v1 = vsel %vm9460_vm10, %v2234_v51, %v2238_v11  ;;  %v3018_v44 = vor.u32 %v3016_v40, %v3015_v58  ;;  %8368 = vmatprep.subr.bf16.mxu0 %v8797_v6  ;;  %v8793_v40 = vld [vmem:[#allocation8 + $0x120] sm:$0xff]   ;;  %v8801_v51 = vld [vmem:[#allocation8 + $0x150] sm:$0xff]  }
 0x1a1   : > { %v3028_v50 = vrot.slane %v3026_v35, 7  ;;  %v3010_v18 = vsel %vm9355_vm5, %v9479_v24, %v3009_v39  ;;  %v3037_v43 = vrot.slane %v3035_v62, 7  ;;  %v3038_v55 = vshll.u32 %v2881_v49, 16  ;;  %v2886_v35 = vld [vmem:[#allocation2 + $0x74] sm:$0xf] }
 0x1a2   : > { %v2249_v46 = vsel %vm9460_vm10, %v2244_v23, %v9473_v26  ;;  %8237 = vmatmul.mubr.bf16.vlgmr.msra.gmra.mxu1 %v7405_v14  ;;  %v3019_v5 = vsel %vm9355_vm5, %v3011_v42, %v3018_v44  ;;  %v2251_v26 = vshrl.u32 %v2119_v54, 16  ;;  %v2254_v53 = vshll.u32 %v2119_v54, 16 }
 0x1a3   : > { %v7406_v4 = vcombine.low %v2239_v1, %v2249_v46  ;;  %v3031_v22 = vor.u32 %v3029_v57, %v3028_v50  ;;  %v3033_v19 = vrot.slane %v3028_v50, 4  ;;  %8317 = vmatpush3.bf16.msra.mxu1 %v9620_v30  ;;  %v7447_v10 = vcombine.low %v3010_v18, %v3019_v5  ;;  %8369 = vmatpush3.bf16.msra.mxu0 %v8797_v6 }
 0x1a4   : > { %v3040_v34 = vor.u32 %v3038_v55, %v3037_v43  ;;  %8318 = vmatprep.subr.bf16.mxu1 %v8791_v52  ;;  %v2260_v13 = vshll.u32 %v2120_v32, 16  ;;  %v2264_v48 = vshrl.u32 %v2120_v32, 16  ;;  %v2275_v27 = vshrl.u32 %v2122_v33, 16  ;;  %8370 = vmatprep.subr.bf16.mxu0 %v8798_v0  ;;  %v8803_v55 = vld [vmem:[#allocation8 + $0x148] sm:$0xff]  }
 0x1a5   : > { %8240 = vmatprep.mubr.bf16.mxu1 %v7406_v4  ;;  %v3032_v24 = vsel %vm9355_vm5, %v9481_v47, %v3031_v22  ;;  %8289 = vmatmul.mubr.bf16.gmra.mxu0 %v7447_v10  ;;  %v2253_v37 = vrot.slane %v2251_v26, 4  ;;  %v2256_v29 = vrot.slane %v2254_v53, 5  ;;  %v2278_v11 = vshll.u32 %v2122_v33, 16  ;;  %v2125_v22 = vld [vmem:[#allocation2 + $0x54] sm:$0xf] }
 0x1a6   : > { %v3041_v30 = vsel %vm9355_vm5, %v3033_v19, %v3040_v34  ;;  %v2262_v3 = vrot.slane %v2260_v13, 5  ;;  %v2266_v25 = vrot.slane %v2264_v48, 4  ;;  %v2277_v47 = vrot.slane %v2275_v27, 4  ;;  %v8796_v19 = vld [vmem:[#allocation8 + $0x118] sm:$0xff]  }
 0x1a7   : > { %v7448_v20 = vcombine.low %v3032_v24, %v3041_v30  ;;  %v2257_v49 = vor.u32 %v2256_v29, %v2253_v37  ;;  %8319 = vmatpush3.bf16.msra.mxu1 %v8791_v52  ;;  %v2280_v59 = vrot.slane %v2278_v11, 5  ;;  %v2284_v38 = vshll.u32 %v2123_v56, 16  ;;  %8371 = vmatpush3.bf16.msra.mxu0 %v8798_v0  ;;  %v2887_v52 = vld [vmem:[#allocation2 + $0x78] sm:$0xf]  ;;  %v2129_v37 = vld [vmem:[#allocation2 + $0x68] sm:$0xf] }
 0x1a8   : > { %v2288_v21 = vshrl.u32 %v2123_v56, 16  ;;  %v2267_v6 = vor.u32 %v2266_v25, %v2262_v3  ;;  %v3048_v36 = vshrl.u32 %v2883_v15, 16  ;;  %v3051_v12 = vshll.u32 %v2883_v15, 16  ;;  %8320 = vmatprep.subr.bf16.mxu1 %v8792_v16  ;;  %8372 = vmatprep.subr.bf16.mxu0 %v8800_v41  ;;  %v2126_v53 = vld [vmem:[#allocation2 + $0x58] sm:$0xf]  ;;  %v8804_v29 = vld [vmem:[#allocation8 + $0x140] sm:$0xff]  }
 0x1a9   : > { %8292 = vmatprep.mubr.bf16.mxu0 %v7448_v20  ;;  %v3057_v28 = vshrl.u32 %v2884_v45, 16  ;;  %v2258_v58 = vrot.slane %v2257_v49, 4  ;;  %v2281_v57 = vor.u32 %v2280_v59, %v2277_v47  ;;  %v2286_v62 = vrot.slane %v2284_v38, 5  ;;  %v2128_v56 = vld [vmem:[#allocation2 + $0x64] sm:$0xf] }
 0x1aa   : > { %v2290_v31 = vrot.slane %v2288_v21, 4  ;;  %v2268_v23 = vrot.slane %v2267_v6, 4  ;;  %v3050_v39 = vrot.slane %v3048_v36, 7  ;;  %v3060_v14 = vshll.u32 %v2884_v45, 16  ;;  %v2889_v59 = vld [vmem:[#allocation2 + $0x84] sm:$0xf] }
 0x1ab   : > { %v3059_v42 = vrot.slane %v3057_v28, 7  ;;  %v2263_v1 = vsel %vm9460_vm10, %v2258_v58, %v2262_v3  ;;  %v2282_v44 = vrot.slane %v2281_v57, 4  ;;  %v3070_v54 = vshrl.u32 %v2886_v35, 16  ;;  %8321 = vmatpush3.bf16.msra.mxu1 %v8792_v16  ;;  %8373 = vmatpush3.bf16.msra.mxu0 %v8800_v41  ;;  %v8799_v3 = vld [vmem:[#allocation8 + $0x110] sm:$0xff]   ;;  %v9721_v58 = vld [vmem:[#allocation8 + $0x1f8] sm:$0xff]  }
 0x1ac   : > { %v2291_v50 = vor.u32 %v2290_v31, %v2286_v62  ;;  %v2273_v32 = vsel %vm9460_vm10, %v2268_v23, %v9485_v60  ;;  %v3053_v46 = vor.u32 %v3051_v12, %v3050_v39  ;;  %v3055_v18 = vrot.slane %v3050_v39, 4  ;;  %8322 = vmatprep.subr.bf16.mxu1 %v8793_v40  ;;  %8374 = vmatprep.subr.bf16.mxu0 %v8801_v51  ;;  %v2892_v23 = vld [vmem:[#allocation2 + $0x94] sm:$0xf]  ;;  %v8802_v39 = vld [vmem:[#allocation8 + $0x108] sm:$0xff]  }
 0x1ad   : > { %v3062_v43 = vor.u32 %v3060_v14, %v3059_v42  ;;  %v7407_v33 = vcombine.low %v2263_v1, %v2273_v32  ;;  %v2287_v0 = vsel %vm9460_vm10, %v2282_v44, %v2286_v62  ;;  %v3072_v5 = vrot.slane %v3070_v54, 7 }
 0x1ae   : > { %v2292_v4 = vrot.slane %v2291_v50, 4  ;;  %v3054_v10 = vsel %vm9355_vm5, %v9491_v7, %v3053_v46  ;;  %v3073_v34 = vshll.u32 %v2886_v35, 16  ;;  %v3079_v26 = vshrl.u32 %v2887_v52, 16 }
 0x1af   : > { %v3063_v60 = vsel %vm9355_vm5, %v3055_v18, %v3062_v43  ;;  %8241 = vmatmul.mubr.bf16.gmra.mxu1 %v7407_v33  ;;  %v3077_v48 = vrot.slane %v3072_v5, 4  ;;  %v3082_v27 = vshll.u32 %v2887_v52, 16  ;;  %8375 = vmatpush3.bf16.msra.mxu0 %v8801_v51  ;;  %v2299_v7 = vshrl.u32 %v2125_v22, 16  ;;  %v2890_v51 = vld [vmem:[#allocation2 + $0x88] sm:$0xf] }
 0x1b0   : > { %v2297_v24 = vsel %vm9460_vm10, %v2292_v4, %v9487_v61  ;;  %v7449_v13 = vcombine.low %v3054_v10, %v3063_v60  ;;  %v3075_v16 = vor.u32 %v3073_v34, %v3072_v5  ;;  %v3081_v30 = vrot.slane %v3079_v26, 7  ;;  %8323 = vmatpush3.bf16.msra.mxu1 %v8793_v40  ;;  %8376 = vmatprep.subr.bf16.mxu0 %v8803_v55 }
 0x1b1   : > { %v7408_v15 = vcombine.low %v2287_v0, %v2297_v24  ;;  %v2302_v11 = vshll.u32 %v2125_v22, 16  ;;  %v2308_v45 = vshll.u32 %v2126_v53, 16  ;;  %v2312_v41 = vshrl.u32 %v2126_v53, 16  ;;  %8324 = vmatprep.subr.bf16.mxu1 %v8796_v19  ;;  %v8805_v53 = vld [vmem:[#allocation8 + $0x100] sm:$0xff]  }
 0x1b2   : > { %8293 = vmatmul.mubr.bf16.gmra.mxu0 %v7449_v13  ;;  %v2323_v20 = vshrl.u32 %v2128_v56, 16  ;;  %v3076_v61 = vsel %vm9355_vm5, %v9493_v8, %v3075_v16  ;;  %v3084_v25 = vor.u32 %v3082_v27, %v3081_v30  ;;  %v2301_v47 = vrot.slane %v2299_v7, 4  ;;  %v2132_v27 = vld [vmem:[#allocation2 + $0x78] sm:$0xf] }
 0x1b3   : > { %8244 = vmatprep.mubr.bf16.mxu1 %v7408_v15  ;;  %v2326_v49 = vshll.u32 %v2128_v56, 16  ;;  %v2304_v38 = vrot.slane %v2302_v11, 5  ;;  %v2310_v21 = vrot.slane %v2308_v45, 5  ;;  %v2314_v40 = vrot.slane %v2312_v41, 4  ;;  %8377 = vmatpush3.bf16.msra.mxu0 %v8803_v55  ;;  %v2893_v55 = vld [vmem:[#allocation2 + $0x98] sm:$0xf] }
 0x1b4   : > { %v2325_v6 = vrot.slane %v2323_v20, 4  ;;  %v3085_v36 = vsel %vm9355_vm5, %v3077_v48, %v3084_v25  ;;  %v2332_v28 = vshll.u32 %v2129_v37, 16  ;;  %v2336_v35 = vshrl.u32 %v2129_v37, 16  ;;  %8325 = vmatpush3.bf16.msra.mxu1 %v8796_v19  ;;  %8378 = vmatprep.subr.bf16.mxu0 %v8804_v29  ;;  %v2131_v19 = vld [vmem:[#allocation2 + $0x74] sm:$0xf] }
 0x1b5   : > { %v2328_v12 = vrot.slane %v2326_v49, 5  ;;  %v7450_v8 = vcombine.low %v3076_v61, %v3085_v36  ;;  %v2305_v57 = vor.u32 %v2304_v38, %v2301_v47  ;;  %v2315_v62 = vor.u32 %v2314_v40, %v2310_v21  ;;  %8326 = vmatprep.subr.bf16.mxu1 %v8799_v3  ;;  %v2134_v41 = vld [vmem:[#allocation2 + $0x84] sm:$0xf]  ;;  %v2135_v25 = vld [vmem:[#allocation2 + $0x88] sm:$0xf]  ;;  %v9739_v47 = vld [vmem:[#allocation8 + $0x1b8] sm:$0xff]  }
 0x1b6   : > { %v3092_v31 = vshrl.u32 %v2889_v59, 16  ;;  %v2334_v14 = vrot.slane %v2332_v28, 5  ;;  %v2338_v1 = vrot.slane %v2336_v35, 4  ;;  %v3095_v44 = vshll.u32 %v2889_v59, 16  ;;  %v11250_v59 = vld [vmem:[#allocation20_spill] sm:$0xff] }
 0x1b7   : > { %v2329_v42 = vor.u32 %v2328_v12, %v2325_v6  ;;  %8296 = vmatprep.mubr.bf16.mxu0 %v7450_v8  ;;  %v2306_v50 = vrot.slane %v2305_v57, 4  ;;  %v2316_v52 = vrot.slane %v2315_v62, 4  ;;  %v3101_v32 = vshrl.u32 %v2890_v51, 16  ;;  %8379 = vmatpush3.bf16.msra.mxu0 %v8804_v29  ;;  %v2895_v35 = vld [vmem:[#allocation2 + $0xa4] sm:$0xf] }
 0x1b8   : > { %v3094_v54 = vrot.slane %v3092_v31, 7  ;;  %v2339_v18 = vor.u32 %v2338_v1, %v2334_v14  ;;  %v3104_v43 = vshll.u32 %v2890_v51, 16  ;;  %v3114_v33 = vshrl.u32 %v2892_v23, 16  ;;  %8327 = vmatpush3.bf16.msra.mxu1 %v8799_v3  ;;  %8460 = vmatprep.subr.bf16.mxu0 %v9721_v58  ;;  %v2896_v31 = vld [vmem:[#allocation2 + $0xa8] sm:$0xf] }
 0x1b9   : > { %v2330_v46 = vrot.slane %v2329_v42, 4  ;;  %v2311_v0 = vsel %vm9460_vm10, %v2306_v50, %v2310_v21  ;;  %v2321_v4 = vsel %vm9460_vm10, %v2316_v52, %v9495_v9  ;;  %8328 = vmatprep.subr.bf16.mxu1 %v8802_v39  ;;  %v3103_v26 = vrot.slane %v3101_v32, 7  ;;  %v11249_v9 = vld [vmem:[#allocation19_spill] sm:$0xff] }
 0x1ba   : > { %v3097_v5 = vor.u32 %v3095_v44, %v3094_v54  ;;  %v3099_v22 = vrot.slane %v3094_v54, 4  ;;  %v7409_v10 = vcombine.low %v2311_v0, %v2321_v4  ;;  %v2340_v34 = vrot.slane %v2339_v18, 4  ;;  %v2897_v54 = vld [vmem:[#allocation2 + $0xb0] sm:$0x8] }
 0x1bb   : > { %v2335_v60 = vsel %vm9460_vm10, %v2330_v46, %v2334_v14  ;;  %v3116_v24 = vrot.slane %v3114_v33, 7  ;;  %v3117_v13 = vshll.u32 %v2892_v23, 16  ;;  %v3123_v48 = vshrl.u32 %v2893_v55, 16 }
 0x1bc   : > { %v3098_v56 = vsel %vm9355_vm5, %v9503_v63, %v3097_v5  ;;  %8245 = vmatmul.mubr.bf16.gmra.mxu1 %v7409_v10  ;;  %v2345_v15 = vsel %vm9460_vm10, %v2340_v34, %v11249_v9  ;;  %v3106_v16 = vor.u32 %v3104_v43, %v3103_v26  ;;  %v3126_v30 = vshll.u32 %v2893_v55, 16  ;;  %v2898_v10 = vld [vmem:[#allocation2 + $0xb4] sm:$0xf]  ;;  %v11251_v34 = vld [vmem:[#allocation21_spill] sm:$0xff] }
 0x1bd   : > { %v2347_v7 = vshrl.u32 %v2131_v19, 16  ;;  %v7410_v37 = vcombine.low %v2335_v60, %v2345_v15  ;;  %v3119_v29 = vor.u32 %v3117_v13, %v3116_v24  ;;  %v3121_v11 = vrot.slane %v3116_v24, 4  ;;  %8329 = vmatpush3.bf16.msra.mxu1 %v8802_v39  ;;  %v2899_v13 = vld [vmem:[#allocation2 + $0xb8] sm:$0xf] }
 0x1be   : > { %v3125_v45 = vrot.slane %v3123_v48, 7  ;;  %v3107_v63 = vsel %vm9355_vm5, %v3099_v22, %v3106_v16  ;;  %v2350_v3 = vshll.u32 %v2131_v19, 16  ;;  %v2356_v61 = vshll.u32 %v2132_v27, 16  ;;  %8330 = vmatprep.subr.bf16.mxu1 %v8805_v53  ;;  %v2137_v16 = vld [vmem:[#allocation2 + $0x94] sm:$0xf] }
 0x1bf   : > { %v2349_v20 = vrot.slane %v2347_v7, 4  ;;  %8248 = vmatprep.mubr.bf16.mxu1 %v7410_v37  ;;  %v7451_v49 = vcombine.low %v3098_v56, %v3107_v63  ;;  %v3120_v38 = vsel %vm9355_vm5, %v11250_v59, %v3119_v29  ;;  %v2360_v40 = vshrl.u32 %v2132_v27, 16  ;;  %v11253_v37 = vld [vmem:[#allocation23_spill] sm:$0xff] }
 0x1c0   : > { %v3128_v21 = vor.u32 %v3126_v30, %v3125_v45  ;;  %v2352_v6 = vrot.slane %v2350_v3, 5  ;;  %v2358_v36 = vrot.slane %v2356_v61, 5  ;;  %v2371_v12 = vshrl.u32 %v2134_v41, 16  ;;  %v11252_v30 = vld [vmem:[#allocation22_spill] sm:$0xff]  ;;  %v2139_v63 = vld [vmem:[#allocation2 + $0x9c] sm:$0x1] }
 0x1c1   : > { %v2374_v28 = vshll.u32 %v2134_v41, 16  ;;  %8297 = vmatmul.mubr.bf16.gmra.mxu0 %v7451_v49  ;;  %v2362_v8 = vrot.slane %v2360_v40, 4  ;;  %v2380_v57 = vshll.u32 %v2135_v25, 16  ;;  %v2384_v62 = vshrl.u32 %v2135_v25, 16  ;;  %8331 = vmatpush3.bf16.msra.mxu1 %v8805_v53  ;;  %v2138_v41 = vld [vmem:[#allocation2 + $0x98] sm:$0xf] }
 0x1c2   : > { %v3129_v51 = vsel %vm9355_vm5, %v3121_v11, %v3128_v21  ;;  %v2353_v39 = vor.u32 %v2352_v6, %v2349_v20  ;;  %v2373_v42 = vrot.slane %v2371_v12, 4  ;;  %8412 = vmatprep.subr.bf16.mxu1 %v9739_v47  ;;  %v3136_v52 = vshrl.u32 %v2895_v35, 16  ;;  %v465_v40 = vld [vmem:[#allocation2 + $0xac] sm:$0x1] }
 0x1c3   : > { %v7452_v23 = vcombine.low %v3120_v38, %v3129_v51  ;;  %v2376_v14 = vrot.slane %v2374_v28, 5  ;;  %v2363_v1 = vor.u32 %v2362_v8, %v2358_v36  ;;  %v2382_v44 = vrot.slane %v2380_v57, 5 }
 0x1c4   : > { %v2386_v50 = vrot.slane %v2384_v62, 4  ;;  %v2354_v32 = vrot.slane %v2353_v39, 4  ;;  %v3139_v18 = vshll.u32 %v2895_v35, 16  ;;  %v3145_v43 = vshrl.u32 %v2896_v31, 16  ;;  %v2140_v35 = vld [vmem:[#allocation2 + $0xa4] sm:$0xf] }
 0x1c5   : > { %8300 = vmatprep.mubr.bf16.mxu0 %v7452_v23  ;;  %v2377_v46 = vor.u32 %v2376_v14, %v2373_v42  ;;  %v2364_v55 = vrot.slane %v2363_v1, 4  ;;  %v3138_v0 = vrot.slane %v3136_v52, 7  ;;  %v3148_v4 = vshll.u32 %v2896_v31, 16  ;;  %v2141_v31 = vld [vmem:[#allocation2 + $0xa8] sm:$0xf] }
 0x1c6   : > { %v2387_v33 = vor.u32 %v2386_v50, %v2382_v44  ;;  %v2359_v5 = vsel %vm9460_vm10, %v2354_v32, %v2358_v36  ;;  %v3147_v19 = vrot.slane %v3145_v43, 7  ;;  %v3153_v60 = vshrl.u32 %v2897_v54, 16  ;;  %v2900_v32 = vld [vmem:[#allocation2 + $0xc0] sm:$0x8] }
 0x1c7   : > { %v2378_v22 = vrot.slane %v2377_v46, 4  ;;  %v2369_v26 = vsel %vm9460_vm10, %v2364_v55, %v11251_v34  ;;  %v3141_v56 = vor.u32 %v3139_v18, %v3138_v0  ;;  %v3143_v24 = vrot.slane %v3138_v0, 4 }
 0x1c8   : > { %v2388_v53 = vrot.slane %v2387_v33, 4  ;;  %v7411_v48 = vcombine.low %v2359_v5, %v2369_v26  ;;  %v3150_v9 = vor.u32 %v3148_v4, %v3147_v19  ;;  %v7438_v15 = vrot.slane %v3153_v60, 11  ;;  %v2901_v33 = vld [vmem:[#allocation2 + $0xc4] sm:$0xf]  ;;  %v2902_v19 = vld [vmem:[#allocation2 + $0xc8] sm:$0xf] }
 0x1c9   : > { %v2383_v27 = vsel %vm9460_vm10, %v2378_v22, %v2382_v44  ;;  %v3142_v29 = vsel %vm9355_vm5, %v11253_v37, %v3141_v56  ;;  %v3158_v11 = vshrl.u32 %v2898_v10, 16  ;;  %v3161_v45 = vshll.u32 %v2898_v10, 16 }
 0x1ca   : > { %v2393_v7 = vsel %vm9460_vm10, %v2388_v53, %v11252_v30  ;;  %8249 = vmatmul.mubr.bf16.gmra.mxu1 %v7411_v48  ;;  %v3151_v3 = vsel %vm9355_vm5, %v3143_v24, %v3150_v9  ;;  %v3167_v61 = vshrl.u32 %v2899_v13, 16  ;;  %v3170_v25 = vshll.u32 %v2899_v13, 16  ;;  %v2903_v53 = vld [vmem:[#allocation2 + $0xd0] sm:$0x8] }
 0x1cb   : > { %v7412_v20 = vcombine.low %v2383_v27, %v2393_v7  ;;  %v7453_v49 = vcombine.low %v3142_v29, %v3151_v3  ;;  %v3160_v59 = vrot.slane %v3158_v11, 7  ;;  %v2395_v38 = vshrl.u32 %v2137_v16, 16  ;;  %v2904_v27 = vld [vmem:[#allocation2 + $0xd4] sm:$0xf] }
 0x1cc   : > { %v2398_v21 = vshll.u32 %v2137_v16, 16  ;;  %v3169_v6 = vrot.slane %v3167_v61, 7  ;;  %v2404_v36 = vshll.u32 %v2138_v41, 16  ;;  %v2408_v12 = vshrl.u32 %v2138_v41, 16  ;;  %v468_v41 = vld [vmem:[#allocation2 + $0xbc] sm:$0x1] }
 0x1cd   : > { %8252 = vmatprep.mubr.bf16.mxu1 %v7412_v20  ;;  %v2414_v28 = vshll.u32 %v2139_v63, 16  ;;  %8301 = vmatmul.mubr.bf16.gmra.mxu0 %v7453_v49  ;;  %v3163_v51 = vor.u32 %v3161_v45, %v3160_v59  ;;  %v3165_v8 = vrot.slane %v3160_v59, 4  ;;  %v2397_v57 = vrot.slane %v2395_v38, 4  ;;  %v2905_v45 = vld [vmem:[#allocation2 + $0xd8] sm:$0xf] }
 0x1ce   : > { %v2400_v62 = vrot.slane %v2398_v21, 5  ;;  %v3172_v23 = vor.u32 %v3170_v25, %v3169_v6  ;;  %v2406_v39 = vrot.slane %v2404_v36, 5  ;;  %v2410_v42 = vrot.slane %v2408_v12, 4  ;;  %v2143_v25 = vld [vmem:[#allocation2 + $0xb4] sm:$0xf] }
 0x1cf   : > { %v2416_v14 = vrot.slane %v2414_v28, 5  ;;  %v3164_v1 = vsel %vm9355_vm5, %v7438_v15, %v3163_v51  ;;  %v466_v52 = vsel %vm9392_vm7, 0, %v465_v40  ;;  %v2419_v54 = vshrl.u32 %v2140_v35, 16 }
 0x1d0   : > { %v2401_v44 = vor.u32 %v2400_v62, %v2397_v57  ;;  %v3173_v46 = vsel %vm9355_vm5, %v3165_v8, %v3172_v23  ;;  %v2411_v18 = vor.u32 %v2410_v42, %v2406_v39  ;;  %467 = vst [vmem:[#allocation2 + $0xac] sm:$0x1] %v466_v52  ;;  %v2422_v43 = vshll.u32 %v2140_v35, 16  ;;  %v2144_v62 = vld [vmem:[#allocation2 + $0xb8] sm:$0xf] }
 0x1d1   : > { %v2428_v55 = vshll.u32 %v2141_v31, 16  ;;  %v7454_v0 = vcombine.low %v3164_v1, %v3173_v46  ;;  %v2421_v5 = vrot.slane %v2419_v54, 4  ;;  %v2432_v22 = vshrl.u32 %v2141_v31, 16  ;;  %v471_v54 = vld [vmem:[#allocation2 + $0xcc] sm:$0x1] }
 0x1d2   : > { %v2402_v4 = vrot.slane %v2401_v44, 4  ;;  %v2412_v10 = vrot.slane %v2411_v18, 4  ;;  %v2424_v60 = vrot.slane %v2422_v43, 5  ;;  %v3175_v26 = vshrl.u32 %v2900_v32, 16  ;;  %v2146_v32 = vld [vmem:[#allocation2 + $0xc4] sm:$0xf] }
 0x1d3   : > { %v2430_v34 = vrot.slane %v2428_v55, 5  ;;  %8304 = vmatprep.mubr.bf16.mxu0 %v7454_v0  ;;  %v2434_v24 = vrot.slane %v2432_v22, 4  ;;  %v3180_v13 = vshrl.u32 %v2901_v33, 16  ;;  %v3183_v48 = vshll.u32 %v2901_v33, 16  ;;  %v2147_v33 = vld [vmem:[#allocation2 + $0xc8] sm:$0xf] }
 0x1d4   : > { %v2407_v56 = vsel %vm9460_vm10, %v2402_v4, %v2406_v39  ;;  %v2417_v9 = vsel %vm9460_vm10, %v2412_v10, %v2416_v14  ;;  %v2425_v15 = vor.u32 %v2424_v60, %v2421_v5  ;;  %v7439_v16 = vrot.slane %v3175_v26, 11  ;;  %v2906_v26 = vld [vmem:[#allocation2 + $0xe0] sm:$0x8] }
 0x1d5   : > { %v3189_v30 = vshrl.u32 %v2902_v19, 16  ;;  %v7413_v7 = vcombine.low %v2407_v56, %v2417_v9  ;;  %v2435_v37 = vor.u32 %v2434_v24, %v2430_v34  ;;  %v3182_v29 = vrot.slane %v3180_v13, 7 }
 0x1d6   : > { %v3192_v11 = vshll.u32 %v2902_v19, 16  ;;  %v2426_v63 = vrot.slane %v2425_v15, 4  ;;  %v3197_v3 = vshrl.u32 %v2903_v53, 16  ;;  %v3202_v61 = vshrl.u32 %v2904_v27, 16 }
 0x1d7   : > { %v3191_v20 = vrot.slane %v3189_v30, 7  ;;  %8253 = vmatmul.mubr.bf16.gmra.mxu1 %v7413_v7  ;;  %v2142_v49 = vld [vmem:[#allocation2 + $0xac] sm:$0x1]  ;;  %v2436_v59 = vrot.slane %v2435_v37, 4  ;;  %v3185_v38 = vor.u32 %v3183_v48, %v3182_v29  ;;  %v3187_v21 = vrot.slane %v3182_v29, 4 }
 0x1d8   : > { %v3205_v40 = vshll.u32 %v2904_v27, 16  ;;  %v2431_v6 = vsel %vm9460_vm10, %v2426_v63, %v2430_v34  ;;  %v2438_v36 = vshll.u32 %v2142_v49, 16  ;;  %v7440_v28 = vrot.slane %v3197_v3, 11  ;;  %v2907_v48 = vld [vmem:[#allocation2 + $0xe4] sm:$0xf] }
 0x1d9   : > { %v3194_v12 = vor.u32 %v3192_v11, %v3191_v20  ;;  %v3186_v35 = vsel %vm9355_vm5, %v7439_v16, %v3185_v38  ;;  %v3204_v51 = vrot.slane %v3202_v61, 7  ;;  %v3211_v8 = vshrl.u32 %v2905_v45, 16  ;;  %v2908_v30 = vld [vmem:[#allocation2 + $0xe8] sm:$0xf] }
 0x1da   : > { %v3214_v57 = vshll.u32 %v2905_v45, 16  ;;  %v2440_v31 = vrot.slane %v2438_v36, 5  ;;  %v469_v39 = vsel %vm9392_vm7, 0, %v468_v41  ;;  %v2443_v42 = vshrl.u32 %v2143_v25, 16  ;;  %v2909_v45 = vld [vmem:[#allocation2 + $0xf0] sm:$0x8] }
 0x1db   : > { %v3195_v23 = vsel %vm9355_vm5, %v3187_v21, %v3194_v12  ;;  %v3207_v1 = vor.u32 %v3205_v40, %v3204_v51  ;;  %v3209_v44 = vrot.slane %v3204_v51, 4  ;;  %v3213_v52 = vrot.slane %v3211_v8, 7  ;;  %470 = vst [vmem:[#allocation2 + $0xbc] sm:$0x1] %v469_v39  ;;  %v2910_v12 = vld [vmem:[#allocation2 + $0xf4] sm:$0xf] }
 0x1dc   : > { %v7455_v14 = vcombine.low %v3186_v35, %v3195_v23  ;;  %v2441_v46 = vsel %vm9460_vm10, %v2436_v59, %v2440_v31  ;;  %v2445_v18 = vrot.slane %v2443_v42, 4  ;;  %v2446_v43 = vshll.u32 %v2143_v25, 16  ;;  %v2911_v8 = vld [vmem:[#allocation2 + $0xf8] sm:$0xf] }
 0x1dd   : > { %v2452_v55 = vshll.u32 %v2144_v62, 16  ;;  %v7414_v0 = vcombine.low %v2431_v6, %v2441_v46  ;;  %v3208_v4 = vsel %vm9355_vm5, %v7440_v28, %v3207_v1  ;;  %v3216_v5 = vor.u32 %v3214_v57, %v3213_v52 }
 0x1de   : > { %8305 = vmatmul.mubr.bf16.gmra.mxu0 %v7455_v14  ;;  %v2456_v22 = vshrl.u32 %v2144_v62, 16  ;;  %v2448_v19 = vrot.slane %v2446_v43, 5  ;;  %v472_v60 = vsel %vm9392_vm7, 0, %v471_v54  ;;  %v2467_v34 = vshrl.u32 %v2146_v32, 16  ;;  %v474_v54 = vld [vmem:[#allocation2 + $0xdc] sm:$0x1] }
 0x1df   : > { %v2454_v10 = vrot.slane %v2452_v55, 5  ;;  %8256 = vmatprep.mubr.bf16.mxu1 %v7414_v0  ;;  %v3217_v53 = vsel %vm9355_vm5, %v3209_v44, %v3216_v5  ;;  %473 = vst [vmem:[#allocation2 + $0xcc] sm:$0x1] %v472_v60  ;;  %v2470_v24 = vshll.u32 %v2146_v32, 16  ;;  %v2476_v13 = vshll.u32 %v2147_v33, 16 }
 0x1e0   : > { %v2458_v56 = vrot.slane %v2456_v22, 4  ;;  %v7456_v27 = vcombine.low %v3208_v4, %v3217_v53  ;;  %v2449_v9 = vor.u32 %v2448_v19, %v2445_v18  ;;  %v2469_v15 = vrot.slane %v2467_v34, 4  ;;  %v2149_v32 = vld [vmem:[#allocation2 + $0xd4] sm:$0xf]  ;;  %v2150_v60 = vld [vmem:[#allocation2 + $0xd8] sm:$0xf] }
 0x1e1   : > { %v2480_v16 = vshrl.u32 %v2147_v33, 16  ;;  %v2472_v37 = vrot.slane %v2470_v24, 5  ;;  %v2478_v29 = vrot.slane %v2476_v13, 5  ;;  %v3219_v11 = vshrl.u32 %v2906_v26, 16  ;;  %v477_v13 = vld [vmem:[#allocation2 + $0xec] sm:$0x1] }
 0x1e2   : > { %v2459_v7 = vor.u32 %v2458_v56, %v2454_v10  ;;  %8308 = vmatprep.mubr.bf16.mxu0 %v7456_v27  ;;  %v2145_v41 = vld [vmem:[#allocation2 + $0xbc] sm:$0x1]  ;;  %v2450_v63 = vrot.slane %v2449_v9, 4  ;;  %v3224_v3 = vshrl.u32 %v2907_v48, 16  ;;  %v3227_v61 = vshll.u32 %v2907_v48, 16 }
 0x1e3   : > { %v2482_v20 = vrot.slane %v2480_v16, 4  ;;  %v2462_v49 = vshll.u32 %v2145_v41, 16  ;;  %v2473_v59 = vor.u32 %v2472_v37, %v2469_v15  ;;  %v7441_v38 = vrot.slane %v3219_v11, 11  ;;  %v2152_v48 = vld [vmem:[#allocation2 + $0xe4] sm:$0xf] }
 0x1e4   : > { %v2460_v25 = vrot.slane %v2459_v7, 4  ;;  %v2455_v21 = vsel %vm9460_vm10, %v2450_v63, %v2454_v10  ;;  %v3226_v6 = vrot.slane %v3224_v3, 7  ;;  %v3233_v36 = vshrl.u32 %v2908_v30, 16  ;;  %v2153_v11 = vld [vmem:[#allocation2 + $0xe8] sm:$0xf] }
 0x1e5   : > { %v2483_v40 = vor.u32 %v2482_v20, %v2478_v29  ;;  %v2464_v28 = vrot.slane %v2462_v49, 5  ;;  %v2474_v35 = vrot.slane %v2473_v59, 4  ;;  %v3236_v51 = vshll.u32 %v2908_v30, 16  ;;  %v426_v3 = vld [vmem:[#allocation2 + $0x100] sm:$0x8] }
 0x1e6   : > { %v3241_v57 = vshrl.u32 %v2909_v45, 16  ;;  %v2148_v62 = vld [vmem:[#allocation2 + $0xcc] sm:$0x1]  ;;  %v3229_v23 = vor.u32 %v3227_v61, %v3226_v6  ;;  %v3231_v39 = vrot.slane %v3226_v6, 4  ;;  %v3235_v42 = vrot.slane %v3233_v36, 7 }
 0x1e7   : > { %v2484_v31 = vrot.slane %v2483_v40, 4  ;;  %v2465_v14 = vsel %vm9460_vm10, %v2460_v25, %v2464_v28  ;;  %v2479_v1 = vsel %vm9460_vm10, %v2474_v35, %v2478_v29  ;;  %v2486_v44 = vshll.u32 %v2148_v62, 16  ;;  %v3943_v62 = vld [vmem:[#allocation2 + $0x14] sm:$0xf] }
 0x1e8   : > { %v7442_v52 = vrot.slane %v3241_v57, 11  ;;  %v7415_v46 = vcombine.low %v2455_v21, %v2465_v14  ;;  %v3230_v18 = vsel %vm9355_vm5, %v7441_v38, %v3229_v23  ;;  %v3238_v43 = vor.u32 %v3236_v51, %v3235_v42  ;;  %v2913_v38 = vld [vmem:[#allocation2 + $0x104] sm:$0xf] }
 0x1e9   : > { %v3246_v55 = vshrl.u32 %v2910_v12, 16  ;;  %v2488_v33 = vrot.slane %v2486_v44, 5  ;;  %v3249_v0 = vshll.u32 %v2910_v12, 16  ;;  %v3255_v4 = vshrl.u32 %v2911_v8, 16  ;;  %v2914_v12 = vld [vmem:[#allocation2 + $0x108] sm:$0xf] }
 0x1ea   : > { %v3258_v5 = vshll.u32 %v2911_v8, 16  ;;  %8257 = vmatmul.mubr.bf16.gmra.mxu1 %v7415_v46  ;;  %v3239_v22 = vsel %vm9355_vm5, %v3231_v39, %v3238_v43  ;;  %v475_v10 = vsel %vm9392_vm7, 0, %v474_v54  ;;  %v2491_v34 = vshrl.u32 %v2149_v32, 16 }
 0x1eb   : > { %v3248_v19 = vrot.slane %v3246_v55, 7  ;;  %v2489_v26 = vsel %vm9460_vm10, %v2484_v31, %v2488_v33  ;;  %v7457_v53 = vcombine.low %v3230_v18, %v3239_v22  ;;  %v3257_v56 = vrot.slane %v3255_v4, 7  ;;  %476 = vst [vmem:[#allocation2 + $0xdc] sm:$0x1] %v475_v10  ;;  %v3944_v55 = vld [vmem:[#allocation2 + $0x18] sm:$0xf] }
 0x1ec   : > { %v2494_v24 = vshll.u32 %v2149_v32, 16  ;;  %v7416_v27 = vcombine.low %v2479_v1, %v2489_v26  ;;  %v2493_v16 = vrot.slane %v2491_v34, 4  ;;  %v2500_v37 = vshll.u32 %v2150_v60, 16  ;;  %v3945_v4 = vld [vmem:[#allocation2 + $0x1c] sm:$0x1] }
 0x1ed   : > { %v3251_v9 = vor.u32 %v3249_v0, %v3248_v19  ;;  %v3253_v15 = vrot.slane %v3248_v19, 4  ;;  %8309 = vmatmul.mubr.bf16.gmra.mxu0 %v7457_v53  ;;  %v3260_v30 = vor.u32 %v3258_v5, %v3257_v56  ;;  %v2504_v29 = vshrl.u32 %v2150_v60, 16  ;;  %v480_v53 = vld [vmem:[#allocation2 + $0xfc] sm:$0x1] }
 0x1ee   : > { %v2496_v7 = vrot.slane %v2494_v24, 5  ;;  %8260 = vmatprep.mubr.bf16.mxu1 %v7416_v27  ;;  %v478_v41 = vsel %vm9392_vm7, 0, %v477_v13  ;;  %v2515_v63 = vshrl.u32 %v2152_v48, 16  ;;  %v2518_v20 = vshll.u32 %v2152_v48, 16 }
 0x1ef   : > { %v3252_v45 = vsel %vm9355_vm5, %v7442_v52, %v3251_v9  ;;  %v3261_v61 = vsel %vm9355_vm5, %v3253_v15, %v3260_v30  ;;  %v2502_v49 = vrot.slane %v2500_v37, 5  ;;  %v2506_v59 = vrot.slane %v2504_v29, 4  ;;  %479 = vst [vmem:[#allocation2 + $0xec] sm:$0x1] %v478_v41  ;;  %v2155_v30 = vld [vmem:[#allocation2 + $0xf4] sm:$0xf] }
 0x1f0   : > { %v2497_v25 = vor.u32 %v2496_v7, %v2493_v16  ;;  %v7458_v21 = vcombine.low %v3252_v45, %v3261_v61  ;;  %v2517_v40 = vrot.slane %v2515_v63, 4  ;;  %v2520_v6 = vrot.slane %v2518_v20, 5  ;;  %v2156_v61 = vld [vmem:[#allocation2 + $0xf8] sm:$0xf] }
 0x1f1   : > { %v2524_v36 = vshll.u32 %v2153_v11, 16  ;;  %v2507_v35 = vor.u32 %v2506_v59, %v2502_v49  ;;  %v2528_v51 = vshrl.u32 %v2153_v11, 16  ;;  %v427_v57 = vsel %vm9342_vm2, 0, %v426_v3 }
 0x1f2   : > { %v2498_v28 = vrot.slane %v2497_v25, 4  ;;  %8312 = vmatprep.mubr.bf16.mxu0 %v7458_v21  ;;  %v2151_v31 = vld [vmem:[#allocation2 + $0xdc] sm:$0x1]  ;;  %v2521_v23 = vor.u32 %v2520_v6, %v2517_v40  ;;  %428 = vst [vmem:[#allocation2 + $0x100] sm:$0x8] %v427_v57  ;;  %v3268_v42 = vshrl.u32 %v2913_v38, 16 }
 0x1f3   : > { %v2526_v39 = vrot.slane %v2524_v36, 5  ;;  %v3271_v14 = vshll.u32 %v2913_v38, 16  ;;  %v2508_v44 = vrot.slane %v2507_v35, 4  ;;  %v2510_v52 = vshll.u32 %v2151_v31, 16 }
 0x1f4   : > { %v2503_v1 = vsel %vm9460_vm10, %v2498_v28, %v2502_v49  ;;  %v2530_v54 = vrot.slane %v2528_v51, 4  ;;  %v2522_v32 = vrot.slane %v2521_v23, 4  ;;  %v3270_v46 = vrot.slane %v3268_v42, 7  ;;  %v9826_v42 = vld [vmem:[#allocation2 + $0x14] sm:$0xf] }
 0x1f5   : > { %v3277_v18 = vshrl.u32 %v2914_v12, 16  ;;  %v3280_v43 = vshll.u32 %v2914_v12, 16  ;;  %v2512_v33 = vrot.slane %v2510_v52, 5  ;;  %v4009_v5 = vshrl.u32 %v3943_v62, 16  ;;  %v3946_v12 = vld [vmem:[#allocation2 + $0x24] sm:$0xf] }
 0x1f6   : > { %v2531_v0 = vor.u32 %v2530_v54, %v2526_v39  ;;  %v4012_v22 = vshll.u32 %v3943_v62, 16  ;;  %v2154_v19 = vld [vmem:[#allocation2 + $0xec] sm:$0x1]  ;;  %v2527_v10 = vsel %vm9460_vm10, %v2522_v32, %v2526_v39  ;;  %v3273_v60 = vor.u32 %v3271_v14, %v3270_v46  ;;  %v3947_v62 = vld [vmem:[#allocation2 + $0x28] sm:$0xf] }
 0x1f7   : > { %v3275_v34 = vrot.slane %v3270_v46, 4  ;;  %v3279_v26 = vrot.slane %v3277_v18, 7  ;;  %v2513_v56 = vsel %vm9460_vm10, %v2508_v44, %v2512_v33  ;;  %v2534_v13 = vshll.u32 %v2154_v19, 16  ;;  %v8871_v14 = vld [vmem:[#allocation2 + $0x18] sm:$0xf] }
 0x1f8   : > { %v2532_v24 = vrot.slane %v2531_v0, 4  ;;  %v4011_v48 = vrot.slane %v4009_v5, 4  ;;  %v7417_v27 = vcombine.low %v2503_v1, %v2513_v56  ;;  %v4014_v15 = vrot.slane %v4012_v22, 5  ;;  %v3948_v44 = vld [vmem:[#allocation2 + $0x2c] sm:$0x1] }
 0x1f9   : > { %v3282_v9 = vor.u32 %v3280_v43, %v3279_v26  ;;  %v4018_v16 = vshll.u32 %v3944_v55, 16  ;;  %v2536_v7 = vrot.slane %v2534_v13, 5  ;;  %v2912_v37 = vld [vmem:[#allocation2 + $0x100] sm:$0x8]  ;;  %v4022_v29 = vshrl.u32 %v3944_v55, 16 }
 0x1fa   : > { %v4028_v11 = vshll.u32 %v3945_v4, 16  ;;  %v481_v45 = vsel %vm9392_vm7, 0, %v480_v53  ;;  %8261 = vmatmul.mubr.bf16.gmra.mxu1 %v7417_v27  ;;  %v3263_v41 = vshrl.u32 %v2912_v37, 16  ;;  %v4015_v20 = vor.u32 %v4014_v15, %v4011_v48  ;;  %v3950_v56 = vld [vmem:[#allocation2 + $0x38] sm:$0xf] }
 0x1fb   : > { %v3283_v63 = vsel %vm9355_vm5, %v3275_v34, %v3282_v9  ;;  %v4020_v3 = vrot.slane %v4018_v16, 5  ;;  %482 = vst [vmem:[#allocation2 + $0xfc] sm:$0x1] %v481_v45  ;;  %v2537_v25 = vsel %vm9460_vm10, %v2532_v24, %v2536_v7  ;;  %v4024_v49 = vrot.slane %v4022_v29, 4  ;;  %v3951_v9 = vld [vmem:[#allocation2 + $0x3c] sm:$0x1] }
 0x1fc   : > { %v4030_v59 = vrot.slane %v4028_v11, 5  ;;  %v2539_v38 = vshrl.u32 %v2155_v30, 16  ;;  %v7418_v21 = vcombine.low %v2527_v10, %v2537_v25  ;;  %v7443_v40 = vrot.slane %v3263_v41, 11  ;;  %v3949_v10 = vld [vmem:[#allocation2 + $0x34] sm:$0xf] }
 0x1fd   : > { %v4016_v6 = vrot.slane %v4015_v20, 4  ;;  %v2542_v36 = vshll.u32 %v2155_v30, 16  ;;  %v4025_v28 = vor.u32 %v4024_v49, %v4020_v3  ;;  %v2548_v51 = vshll.u32 %v2156_v61, 16 }
 0x1fe   : > { %v2541_v35 = vrot.slane %v2539_v38, 4  ;;  %v2552_v57 = vshrl.u32 %v2156_v61, 16  ;;  %8264 = vmatprep.mubr.bf16.mxu1 %v7418_v21  ;;  %v3274_v31 = vsel %vm9355_vm5, %v7443_v40, %v3273_v60  ;;  %v7468_v1 = vcombine.low %v9826_v42, %v8871_v14  ;;  %v3952_v61 = vld [vmem:[#allocation2 + $0x44] sm:$0xf]  ;;  %v3953_v21 = vld [vmem:[#allocation2 + $0x48] sm:$0xf] }
 0x1ff   : > { %v4021_v23 = vsel %vm9460_vm10, %v4016_v6, %v4020_v3  ;;  %v2544_v39 = vrot.slane %v2542_v36, 5  ;;  %v7459_v52 = vcombine.low %v3274_v31, %v3283_v63  ;;  %v4026_v54 = vrot.slane %v4025_v28, 4  ;;  %v8873_v28 = vld [vmem:[#allocation2 + $0x28] sm:$0xf]  ;;  %v3955_v14 = vld [vmem:[#allocation2 + $0x54] sm:$0xf] }
 0x200   : > { %v2550_v32 = vrot.slane %v2548_v51, 5  ;;  %v2554_v46 = vrot.slane %v2552_v57, 4  ;;  %v4033_v43 = vshrl.u32 %v3946_v12, 16  ;;  %v4036_v55 = vshll.u32 %v3946_v12, 16  ;;  %v8872_v12 = vld [vmem:[#allocation2 + $0x24] sm:$0xf] }
 0x201   : > { %v2545_v18 = vor.u32 %v2544_v39, %v2541_v35  ;;  %v4042_v33 = vshll.u32 %v3947_v62, 16  ;;  %8313 = vmatmul.mubr.bf16.gmra.mxu0 %v7459_v52  ;;  %v4031_v0 = vsel %vm9460_vm10, %v4026_v54, %v4030_v59  ;;  %v4046_v22 = vshrl.u32 %v3947_v62, 16  ;;  %v3954_v51 = vld [vmem:[#allocation2 + $0x4c] sm:$0x1]  ;;  %v8875_v39 = vld [vmem:[#allocation2 + $0x38] sm:$0xf] }
 0x202   : > { %v2157_v4 = vld [vmem:[#allocation2 + $0xfc] sm:$0x1]  ;;  %v2555_v5 = vor.u32 %v2554_v46, %v2550_v32  ;;  %v4052_v19 = vshll.u32 %v3948_v44, 16  ;;  %v7492_v60 = vcombine.low %v4021_v23, %v4031_v0  ;;  %v4035_v53 = vrot.slane %v4033_v43, 4  ;;  %v8874_v23 = vld [vmem:[#allocation2 + $0x34] sm:$0xf] }
 0x203   : > { %v2546_v34 = vrot.slane %v2545_v18, 4  ;;  %v2558_v26 = vshll.u32 %v2157_v4, 16  ;;  %v4038_v13 = vrot.slane %v4036_v55, 5  ;;  %v4044_v48 = vrot.slane %v4042_v33, 5  ;;  %v8811_v46 = vld [vmem:[#allocation8 + $0x1f0] sm:$0xff]  }
 0x204   : > { %v2556_v24 = vrot.slane %v2555_v5, 4  ;;  %v4048_v27 = vrot.slane %v4046_v22, 4  ;;  %8380 = vmatprep.mubr.bf16.mxu0 %v7492_v60  ;;  %v4054_v30 = vrot.slane %v4052_v19, 5  ;;  %v4057_v7 = vshrl.u32 %v3949_v10, 16  ;;  %v3956_v22 = vld [vmem:[#allocation2 + $0x58] sm:$0xf] }
 0x205   : > { %v2551_v15 = vsel %vm9460_vm10, %v2546_v34, %v2550_v32  ;;  %v2560_v16 = vrot.slane %v2558_v26, 5  ;;  %v4039_v37 = vor.u32 %v4038_v13, %v4035_v53  ;;  %v4060_v11 = vshll.u32 %v3949_v10, 16  ;;  %v3957_v26 = vld [vmem:[#allocation2 + $0x5c] sm:$0x1] }
 0x206   : > { %v4049_v29 = vor.u32 %v4048_v27, %v4044_v48  ;;  %v4066_v45 = vshll.u32 %v3950_v56, 16  ;;  %v4059_v63 = vrot.slane %v4057_v7, 4  ;;  %v4070_v20 = vshrl.u32 %v3950_v56, 16 }
 0x207   : > { %v2561_v41 = vsel %vm9460_vm10, %v2556_v24, %v2560_v16  ;;  %v4076_v3 = vshll.u32 %v3951_v9, 16  ;;  %v4040_v49 = vrot.slane %v4039_v37, 4  ;;  %v4062_v38 = vrot.slane %v4060_v11, 5  ;;  %v8807_v16 = vld [vmem:[#allocation8 + $0x1b0] sm:$0xff]   ;;  %v8876_v11 = vld [vmem:[#allocation2 + $0x44] sm:$0xf] }
 0x208   : > { %v7419_v25 = vcombine.low %v2551_v15, %v2561_v41  ;;  %v4050_v59 = vrot.slane %v4049_v29, 4  ;;  %v4068_v40 = vrot.slane %v4066_v45, 5  ;;  %v4072_v6 = vrot.slane %v4070_v20, 4  ;;  %v8877_v45 = vld [vmem:[#allocation2 + $0x48] sm:$0xf] }
 0x209   : > { %v4078_v36 = vrot.slane %v4076_v3, 5  ;;  %v7469_v35 = vcombine.low %v8872_v12, %v8873_v28  ;;  %v4045_v57 = vsel %vm9460_vm10, %v4040_v49, %v4044_v48  ;;  %v4063_v31 = vor.u32 %v4062_v38, %v4059_v63  ;;  %v8813_v63 = vld [vmem:[#allocation8 + $0x1e8] sm:$0xff]   ;;  %v8879_v49 = vld [vmem:[#allocation2 + $0x58] sm:$0xf] }
 0x20a   : > { %8265 = vmatmul.mubr.bf16.gmra.mxu1 %v7419_v25  ;;  %v4055_v62 = vsel %vm9460_vm10, %v4050_v59, %v4054_v30  ;;  %v7470_v42 = vcombine.low %v8874_v23, %v8875_v39  ;;  %v4073_v52 = vor.u32 %v4072_v6, %v4068_v40  ;;  %v4081_v54 = vshrl.u32 %v3952_v61, 16  ;;  %v3958_v30 = vld [vmem:[#allocation2 + $0x64] sm:$0xf]  ;;  %v8878_v25 = vld [vmem:[#allocation2 + $0x54] sm:$0xf] }
 0x20b   : > { %8332 = vmatprep.mubr.bf16.mxu1 %v7468_v1  ;;  %v7493_v44 = vcombine.low %v4045_v57, %v4055_v62  ;;  %v4084_v32 = vshll.u32 %v3952_v61, 16  ;;  %v4064_v18 = vrot.slane %v4063_v31, 4  ;;  %v4090_v43 = vshll.u32 %v3953_v21, 16  ;;  %v3960_v6 = vld [vmem:[#allocation2 + $0x6c] sm:$0x1] }
 0x20c   : > { %v4094_v55 = vshrl.u32 %v3953_v21, 16  ;;  %v4100_v33 = vshll.u32 %v3954_v51, 16  ;;  %v4074_v0 = vrot.slane %v4073_v52, 4  ;;  %v4083_v4 = vrot.slane %v4081_v54, 4  ;;  %v3961_v57 = vld [vmem:[#allocation2 + $0x74] sm:$0xf] }
 0x20d   : > { %8381 = vmatmul.mubr.bf16.vlgmr.msra.gmra.mxu0 %v7493_v44  ;;  %v4086_v5 = vrot.slane %v4084_v32, 5  ;;  %v4105_v19 = vshrl.u32 %v3955_v14, 16  ;;  %v4069_v10 = vsel %vm9460_vm10, %v4064_v18, %v4068_v40  ;;  %v4092_v60 = vrot.slane %v4090_v43, 5  ;;  %v8808_v62 = vld [vmem:[#allocation8 + $0x1a8] sm:$0xff]  }
 0x20e   : > { %v4096_v1 = vrot.slane %v4094_v55, 4  ;;  %v4102_v34 = vrot.slane %v4100_v33, 5  ;;  %8461 = vmatpush3.bf16.msra.mxu0 %v9721_v58  ;;  %v4079_v53 = vsel %vm9460_vm10, %v4074_v0, %v4078_v36  ;;  %v4108_v13 = vshll.u32 %v3955_v14, 16  ;;  %v3959_v58 = vld [vmem:[#allocation2 + $0x68] sm:$0xf]  ;;  %v8814_v14 = vld [vmem:[#allocation8 + $0x1e0] sm:$0xff]  }
 0x20f   : > { %v4087_v56 = vor.u32 %v4086_v5, %v4083_v4  ;;  %v4107_v24 = vrot.slane %v4105_v19, 4  ;;  %8462 = vmatprep.subr.bf16.mxu0 %v8811_v46  ;;  %v7494_v48 = vcombine.low %v4069_v10, %v4079_v53  ;;  %v4114_v9 = vshll.u32 %v3956_v22, 16  ;;  %v3963_v55 = vld [vmem:[#allocation2 + $0x7c] sm:$0x1]  ;;  %v8809_v53 = vld [vmem:[#allocation8 + $0x1a0] sm:$0xff]  }
 0x210   : > { %v4097_v27 = vor.u32 %v4096_v1, %v4092_v60  ;;  %v4118_v15 = vshrl.u32 %v3956_v22, 16  ;;  %v4110_v37 = vrot.slane %v4108_v13, 5  ;;  %v4124_v29 = vshll.u32 %v3957_v26, 16  ;;  %v3964_v26 = vld [vmem:[#allocation2 + $0x84] sm:$0xf] }
 0x211   : > { %v4088_v7 = vrot.slane %v4087_v56, 4  ;;  %v7471_v41 = vcombine.low %v8876_v11, %v8877_v45  ;;  %8384 = vmatprep.mubr.bf16.mxu0 %v7494_v48  ;;  %v4116_v3 = vrot.slane %v4114_v9, 5  ;;  %v7472_v59 = vcombine.low %v8878_v25, %v8879_v49  ;;  %v8816_v56 = vld [vmem:[#allocation8 + $0x1d8] sm:$0xff]   ;;  %v3965_v9 = vld [vmem:[#allocation2 + $0x88] sm:$0xf] }
 0x212   : > { %8333 = vmatmul.mubr.bf16.vlgmr.msra.gmra.mxu1 %v7469_v35  ;;  %v4098_v20 = vrot.slane %v4097_v27, 4  ;;  %v4120_v61 = vrot.slane %v4118_v15, 4  ;;  %v4111_v21 = vor.u32 %v4110_v37, %v4107_v24  ;;  %v4126_v40 = vrot.slane %v4124_v29, 5  ;;  %8463 = vmatpush3.bf16.msra.mxu0 %v8811_v46  ;;  %v8881_v37 = vld [vmem:[#allocation2 + $0x68] sm:$0xf] }
 0x213   : > { %8413 = vmatpush3.bf16.msra.mxu1 %v9739_v47  ;;  %8336 = vmatprep.mubr.bf16.mxu1 %v7470_v42  ;;  %v4093_v38 = vsel %vm9460_vm10, %v4088_v7, %v4092_v60  ;;  %v4129_v36 = vshrl.u32 %v3958_v30, 16  ;;  %v4132_v35 = vshll.u32 %v3958_v30, 16  ;;  %v4138_v51 = vshll.u32 %v3959_v58, 16  ;;  %v3962_v42 = vld [vmem:[#allocation2 + $0x78] sm:$0xf] }
 0x214   : > { %v4103_v12 = vsel %vm9460_vm10, %v4098_v20, %v4102_v34  ;;  %v4121_v28 = vor.u32 %v4120_v61, %v4116_v3  ;;  %8414 = vmatprep.subr.bf16.mxu1 %v8807_v16  ;;  %v4112_v47 = vrot.slane %v4111_v21, 4  ;;  %v4142_v39 = vshrl.u32 %v3959_v58, 16  ;;  %8464 = vmatprep.subr.bf16.mxu0 %v8813_v63  ;;  %v8880_v7 = vld [vmem:[#allocation2 + $0x64] sm:$0xf]  ;;  %v8882_v11 = vld [vmem:[#allocation2 + $0x74] sm:$0xf] }
 0x215   : > { %v7495_v31 = vcombine.low %v4093_v38, %v4103_v12  ;;  %v4131_v23 = vrot.slane %v4129_v36, 4  ;;  %v4134_v52 = vrot.slane %v4132_v35, 5  ;;  %v4140_v54 = vrot.slane %v4138_v51, 5  ;;  %v8883_v45 = vld [vmem:[#allocation2 + $0x78] sm:$0xf] }
 0x216   : > { %v4122_v44 = vrot.slane %v4121_v28, 4  ;;  %v4148_v32 = vshll.u32 %v3960_v6, 16  ;;  %v4117_v18 = vsel %vm9460_vm10, %v4112_v47, %v4116_v3  ;;  %v4144_v43 = vrot.slane %v4142_v39, 4  ;;  %8465 = vmatpush3.bf16.msra.mxu0 %v8813_v63  ;;  %v3966_v3 = vld [vmem:[#allocation2 + $0x8c] sm:$0x1]  ;;  %v8812_v6 = vld [vmem:[#allocation8 + $0x198] sm:$0xff]  }
 0x217   : > { %8385 = vmatmul.mubr.bf16.gmra.mxu0 %v7495_v31  ;;  %8415 = vmatpush3.bf16.msra.mxu1 %v8807_v16  ;;  %v4153_v33 = vshrl.u32 %v3961_v57, 16  ;;  %v4156_v46 = vshll.u32 %v3961_v57, 16  ;;  %v4135_v4 = vor.u32 %v4134_v52, %v4131_v23  ;;  %v4162_v22 = vshll.u32 %v3962_v42, 16  ;;  %v9853_v19 = vpop.f32.mrf.mxu0  ;;  %v3968_v51 = vld [vmem:[#allocation2 + $0x98] sm:$0xf]  ;;  %v8817_v57 = vld [vmem:[#allocation8 + $0x1d0] sm:$0xff]  }
 0x218   : > { %v4127_v0 = vsel %vm9460_vm10, %v4122_v44, %v4126_v40  ;;  %v4150_v5 = vrot.slane %v4148_v32, 5  ;;  %8416 = vmatprep.subr.bf16.mxu1 %v8808_v62  ;;  %v4145_v60 = vor.u32 %v4144_v43, %v4140_v54  ;;  %8466 = vmatprep.subr.bf16.mxu0 %v8814_v14  ;;  %v4166_v48 = vshrl.u32 %v3962_v42, 16  ;;  %v3967_v40 = vld [vmem:[#allocation2 + $0x94] sm:$0xf] }
 0x219   : > { %v7496_v10 = vcombine.low %v4117_v18, %v4127_v0  ;;  %v4155_v1 = vrot.slane %v4153_v33, 4  ;;  %v4158_v34 = vrot.slane %v4156_v46, 5  ;;  %v4136_v24 = vrot.slane %v4135_v4, 4  ;;  %v9857_v15 = vpop.f32.mrf.mxu0  ;;  %v3969_v33 = vld [vmem:[#allocation2 + $0x9c] sm:$0x1]  ;;  %v8815_v4 = vld [vmem:[#allocation8 + $0x190] sm:$0xff]  }
 0x21a   : > { %8337 = vmatmul.mubr.bf16.gmra.mxu1 %v7471_v41  ;;  %v9855_v13 = vrot.slane %v4162_v22, 5  ;;  %v4172_v27 = vshll.u32 %v3963_v55, 16  ;;  %v4146_v16 = vrot.slane %v4145_v60, 4  ;;  %v7473_v29 = vcombine.low %v8880_v7, %v8881_v37  ;;  %8467 = vmatpush3.bf16.msra.mxu0 %v8814_v14  ;;  %v8885_v7 = vld [vmem:[#allocation2 + $0x88] sm:$0xf] }
 0x21b   : > { %8388 = vmatprep.mubr.bf16.mxu0 %v7496_v10  ;;  %8340 = vmatprep.mubr.bf16.mxu1 %v7472_v59  ;;  %v4159_v30 = vor.u32 %v4158_v34, %v4155_v1  ;;  %v7474_v58 = vcombine.low %v8882_v11, %v8883_v45  ;;  %v4141_v41 = vsel %vm9460_vm10, %v4136_v24, %v4140_v54  ;;  %v4168_v63 = vrot.slane %v4166_v48, 4  ;;  %v9861_v25 = vpop.f32.mrf.mxu0  ;;  %v3970_v1 = vld [vmem:[#allocation2 + $0xa4] sm:$0xf] }
 0x21c   : > { %v4174_v20 = vrot.slane %v4172_v27, 5  ;;  %8417 = vmatpush3.bf16.msra.mxu1 %v8808_v62  ;;  %v4177_v61 = vshrl.u32 %v3964_v26, 16  ;;  %v4151_v49 = vsel %vm9460_vm10, %v4146_v16, %v4150_v5  ;;  %v4180_v38 = vshll.u32 %v3964_v26, 16  ;;  %8468 = vmatprep.subr.bf16.mxu0 %v8816_v56  ;;  %v8819_v27 = vld [vmem:[#allocation8 + $0x1c8] sm:$0xff]  }
 0x21d   : > { %v4160_v59 = vrot.slane %v4159_v30, 4  ;;  %v4186_v21 = vshll.u32 %v3965_v9, 16  ;;  %8418 = vmatprep.subr.bf16.mxu1 %v8809_v53  ;;  %v7497_v36 = vcombine.low %v4141_v41, %v4151_v49  ;;  %v4169_v12 = vor.u32 %v4168_v63, %v9855_v13  ;;  %v9866_v62 = vpop.f32.mrf.mxu0  ;;  %v9868_v31 = vpop.f32.mrf.mxu1  ;;  %v8884_v30 = vld [vmem:[#allocation2 + $0x84] sm:$0xf]  ;;  %v8886_v63 = vld [vmem:[#allocation2 + $0x94] sm:$0xf] }
 0x21e   : > { %v4179_v28 = vrot.slane %v4177_v61, 4  ;;  %v4190_v35 = vshrl.u32 %v3965_v9, 16  ;;  %11256 = vst [vmem:[#allocation19_spill] sm:$0xff] %v9866_v62  ;;  %v4182_v23 = vrot.slane %v4180_v38, 5  ;;  %v4196_v42 = vshll.u32 %v3966_v3, 16  ;;  %8469 = vmatpush3.bf16.msra.mxu0 %v8816_v56 }
 0x21f   : > { %v4165_v47 = vsel %vm9460_vm10, %v4160_v59, %v9855_v13  ;;  %v4188_v39 = vrot.slane %v4186_v21, 5  ;;  %8389 = vmatmul.mubr.bf16.gmra.mxu0 %v7497_v36  ;;  %v4170_v14 = vrot.slane %v4169_v12, 4  ;;  %v4201_v52 = vshrl.u32 %v3967_v40, 16  ;;  %v9873_v32 = vpop.f32.mrf.mxu0  ;;  %v9875_v18 = vpop.f32.mrf.mxu1  ;;  %8470 = vmatprep.subr.bf16.mxu0 %v8817_v57  ;;  %v3972_v61 = vld [vmem:[#allocation2 + $0xac] sm:$0x1] }
 0x220   : > { %v4192_v44 = vrot.slane %v4190_v35, 4  ;;  %v4204_v54 = vshll.u32 %v3967_v40, 16  ;;  %8419 = vmatpush3.bf16.msra.mxu1 %v8809_v53  ;;  %v4183_v43 = vor.u32 %v4182_v23, %v4179_v28  ;;  %v4198_v55 = vrot.slane %v4196_v42, 5  ;;  %v8818_v59 = vld [vmem:[#allocation8 + $0x188] sm:$0xff]   ;;  %v3973_v36 = vld [vmem:[#allocation2 + $0xb4] sm:$0xf] }
 0x221   : > { %v4210_v46 = vshll.u32 %v3968_v51, 16  ;;  %v4214_v0 = vshrl.u32 %v3968_v51, 16  ;;  %8420 = vmatprep.subr.bf16.mxu1 %v8812_v6  ;;  %v4175_v5 = vsel %vm9460_vm10, %v4170_v14, %v4174_v20  ;;  %v4203_v10 = vrot.slane %v4201_v52, 4  ;;  %v9879_v34 = vpop.f32.mrf.mxu0  ;;  %v9881_v26 = vpop.f32.mrf.mxu1  ;;  %v8887_v20 = vld [vmem:[#allocation2 + $0x98] sm:$0xf]  ;;  %v8821_v23 = vld [vmem:[#allocation8 + $0x1c0] sm:$0xff]  }
 0x222   : > { %8341 = vmatmul.mubr.bf16.gmra.mxu1 %v7473_v29  ;;  %v4193_v22 = vor.u32 %v4192_v44, %v4188_v39  ;;  %v4206_v60 = vrot.slane %v4204_v54, 5  ;;  %v7498_v53 = vcombine.low %v4165_v47, %v4175_v5  ;;  %v4184_v24 = vrot.slane %v4183_v43, 4  ;;  %v3971_v29 = vld [vmem:[#allocation2 + $0xa8] sm:$0xf]  ;;  %8471 = vmatpush3.bf16.msra.mxu0 %v8817_v57  ;;  %v3974_v54 = vld [vmem:[#allocation2 + $0xb8] sm:$0xf] }
 0x223   : > { %8344 = vmatprep.mubr.bf16.mxu1 %v7474_v58  ;;  %v4212_v13 = vrot.slane %v4210_v46, 5  ;;  %v4216_v48 = vrot.slane %v4214_v0, 4  ;;  %v4220_v16 = vshll.u32 %v3969_v33, 16  ;;  %v7475_v37 = vcombine.low %v8884_v30, %v8885_v7  ;;  %v9883_v11 = vpop.f32.mrf.mxu0  ;;  %v9885_v45 = vpop.f32.mrf.mxu1  ;;  %8472 = vmatprep.subr.bf16.mxu0 %v8819_v27  ;;  %v8822_v0 = vld [vmem:[#allocation8 + $0x180] sm:$0xff]  }
 0x224   : > { %v4194_v56 = vrot.slane %v4193_v22, 4  ;;  %v4207_v9 = vor.u32 %v4206_v60, %v4203_v10  ;;  %8421 = vmatpush3.bf16.msra.mxu1 %v8812_v6  ;;  %11257 = vst [vmem:[#allocation20_spill] sm:$0xff] %v9885_v45  ;;  %8392 = vmatprep.mubr.bf16.mxu0 %v7498_v53  ;;  %v4189_v58 = vsel %vm9460_vm10, %v4184_v24, %v4188_v39  ;;  %v4225_v49 = vshrl.u32 %v3970_v1, 16  ;;  %v8900_v45 = vld [vmem:[#allocation2 + $0x104] sm:$0xf] }
 0x225   : > { %v4217_v41 = vor.u32 %v4216_v48, %v4212_v13  ;;  %v7476_v3 = vcombine.low %v8886_v63, %v8887_v20  ;;  %8422 = vmatprep.subr.bf16.mxu1 %v8815_v4  ;;  %v4222_v40 = vrot.slane %v4220_v16, 5  ;;  %v4228_v6 = vshll.u32 %v3970_v1, 16  ;;  %v9891_v12 = vpop.f32.mrf.mxu0  ;;  %v3977_v63 = vld [vmem:[#allocation2 + $0xc8] sm:$0xf] }
 0x226   : > { %v4199_v38 = vsel %vm9460_vm10, %v4194_v56, %v4198_v55  ;;  %v4208_v21 = vrot.slane %v4207_v9, 4  ;;  %11258 = vst [vmem:[#allocation21_spill] sm:$0xff] %v9891_v12  ;;  %v4227_v51 = vrot.slane %v4225_v49, 4  ;;  %v4234_v47 = vshll.u32 %v3971_v29, 16  ;;  %v9893_v39 = vpop.f32.mrf.mxu1  ;;  %v3975_v55 = vld [vmem:[#allocation2 + $0xbc] sm:$0x1]  ;;  %8473 = vmatpush3.bf16.msra.mxu0 %v8819_v27 }
 0x227   : > { %v7499_v28 = vcombine.low %v4189_v58, %v4199_v38  ;;  %v4218_v35 = vrot.slane %v4217_v41, 4  ;;  %v4230_v14 = vrot.slane %v4228_v6, 5  ;;  %v4238_v44 = vshrl.u32 %v3971_v29, 16  ;;  %v3976_v56 = vld [vmem:[#allocation2 + $0xc4] sm:$0xf]  ;;  %8474 = vmatprep.subr.bf16.mxu0 %v8821_v23 }
 0x228   : > { %v4213_v42 = vsel %vm9460_vm10, %v4208_v21, %v4212_v13  ;;  %v4244_v52 = vshll.u32 %v3972_v61, 16  ;;  %8423 = vmatpush3.bf16.msra.mxu1 %v8815_v4  ;;  %v4236_v43 = vrot.slane %v4234_v47, 5  ;;  %v4249_v33 = vshrl.u32 %v3973_v36, 16  ;;  %v9899_v5 = vpop.f32.mrf.mxu0  ;;  %v9901_v22 = vpop.f32.mrf.mxu1  ;;  %v8889_v58 = vld [vmem:[#allocation2 + $0xa8] sm:$0xf] }
 0x229   : > { %8393 = vmatmul.mubr.bf16.gmra.mxu0 %v7499_v28  ;;  %v4223_v57 = vsel %vm9460_vm10, %v4218_v35, %v4222_v40  ;;  %v4252_v46 = vshll.u32 %v3973_v36, 16  ;;  %8424 = vmatprep.subr.bf16.mxu1 %v8818_v59  ;;  %v4231_v60 = vor.u32 %v4230_v14, %v4227_v51  ;;  %v4240_v1 = vrot.slane %v4238_v44, 4  ;;  %v8890_v61 = vld [vmem:[#allocation2 + $0xb4] sm:$0xf]  ;;  %v8891_v49 = vld [vmem:[#allocation2 + $0xb8] sm:$0xf] }
 0x22a   : > { %v7500_v10 = vcombine.low %v4213_v42, %v4223_v57  ;;  %8345 = vmatmul.mubr.bf16.gmra.mxu1 %v7475_v37  ;;  %v4246_v53 = vrot.slane %v4244_v52, 5  ;;  %v4251_v4 = vrot.slane %v4249_v33, 4  ;;  %v4258_v13 = vshll.u32 %v3974_v54, 16  ;;  %v9903_v9 = vpop.f32.mrf.mxu0  ;;  %v9905_v16 = vpop.f32.mrf.mxu1  ;;  %v8888_v37 = vld [vmem:[#allocation2 + $0xa4] sm:$0xf]  ;;  %v9907_v40 = vld [vmem:[#allocation8 + $0x238] sm:$0xff]   ;;  %8475 = vmatpush3.bf16.msra.mxu0 %v8821_v23 }
 0x22b   : > { %8348 = vmatprep.mubr.bf16.mxu1 %v7476_v3  ;;  %v4254_v24 = vrot.slane %v4252_v46, 5  ;;  %v4262_v48 = vshrl.u32 %v3974_v54, 16  ;;  %v4232_v30 = vrot.slane %v4231_v60, 4  ;;  %v4241_v7 = vor.u32 %v4240_v1, %v4236_v43  ;;  %v3978_v21 = vld [vmem:[#allocation2 + $0xcc] sm:$0x1] }
 0x22c   : > { %8396 = vmatprep.mubr.bf16.mxu0 %v7500_v10  ;;  %v4268_v29 = vshll.u32 %v3975_v55, 16  ;;  %v7477_v41 = vcombine.low %v8888_v37, %v8889_v58  ;;  %8425 = vmatpush3.bf16.msra.mxu1 %v8818_v59  ;;  %v4260_v20 = vrot.slane %v4258_v13, 5  ;;  %v7478_v38 = vcombine.low %v8890_v61, %v8891_v49  ;;  %v9909_v6 = vpop.f32.mrf.mxu0  ;;  %v9911_v36 = vpop.f32.mrf.mxu1  ;;  %v3979_v52 = vld [vmem:[#allocation2 + $0xd4] sm:$0xf]  ;;  %v3980_v10 = vld [vmem:[#allocation2 + $0xd8] sm:$0xf] }
 0x22d   : > { %v4255_v27 = vor.u32 %v4254_v24, %v4251_v4  ;;  %v4264_v3 = vrot.slane %v4262_v48, 4  ;;  %8426 = vmatprep.subr.bf16.mxu1 %v8822_v0  ;;  %11259 = vst [vmem:[#allocation22_spill] sm:$0xff] %v9911_v36  ;;  %v4237_v28 = vsel %vm9460_vm10, %v4232_v30, %v4236_v43  ;;  %v4242_v35 = vrot.slane %v4241_v7, 4 }
 0x22e   : > { %v4270_v51 = vrot.slane %v4268_v29, 5  ;;  %v4273_v59 = vshrl.u32 %v3976_v56, 16  ;;  %v4276_v14 = vshll.u32 %v3976_v56, 16  ;;  %v4282_v44 = vshll.u32 %v3977_v63, 16  ;;  %v9915_v54 = vpop.f32.mrf.mxu0 }
 0x22f   : > { %v4256_v47 = vrot.slane %v4255_v27, 4  ;;  %v4265_v42 = vor.u32 %v4264_v3, %v4260_v20  ;;  %11260 = vst [vmem:[#allocation23_spill] sm:$0xff] %v9915_v54  ;;  %v4247_v57 = vsel %vm9460_vm10, %v4242_v35, %v4246_v53  ;;  %v4286_v33 = vshrl.u32 %v3977_v63, 16  ;;  %v9919_v43 = vpop.f32.mrf.mxu1  ;;  %v3981_v53 = vld [vmem:[#allocation2 + $0xdc] sm:$0x1] }
 0x230   : > { %v4275_v55 = vrot.slane %v4273_v59, 4  ;;  %v4292_v46 = vshll.u32 %v3978_v21, 16  ;;  %8427 = vmatpush3.bf16.msra.mxu1 %v8822_v0  ;;  %v7501_v60 = vcombine.low %v4237_v28, %v4247_v57  ;;  %v4278_v4 = vrot.slane %v4276_v14, 5  ;;  %v9924_v30 = vpop.f32.mrf.mxu0  ;;  %v3982_v3 = vld [vmem:[#allocation2 + $0xe4] sm:$0xf] }
 0x231   : > { %v4261_v23 = vsel %vm9460_vm10, %v4256_v47, %v4260_v20  ;;  %v4266_v1 = vrot.slane %v4265_v42, 4  ;;  %8508 = vmatprep.subr.bf16.mxu1 %v9907_v40  ;;  %v4284_v24 = vrot.slane %v4282_v44, 5  ;;  %v4288_v13 = vrot.slane %v4286_v33, 4  ;;  %v9926_v7 = vpop.f32.mrf.mxu1  ;;  %v3983_v47 = vld [vmem:[#allocation2 + $0xe8] sm:$0xf] }
 0x232   : > { %8349 = vmatmul.mubr.bf16.gmra.mxu1 %v7477_v41  ;;  %v4294_v48 = vrot.slane %v4292_v46, 5  ;;  %v4297_v56 = vshrl.u32 %v3979_v52, 16  ;;  %8397 = vmatmul.mubr.bf16.gmra.mxu0 %v7501_v60  ;;  %v4279_v29 = vor.u32 %v4278_v4, %v4275_v55  ;;  %v4300_v37 = vshll.u32 %v3979_v52, 16  ;;  %v9930_v61 = vpop.f32.mrf.mxu0  ;;  %v8892_v42 = vld [vmem:[#allocation2 + $0xc4] sm:$0xf] }
 0x233   : > { %v4271_v0 = vsel %vm9460_vm10, %v4266_v1, %v4270_v51  ;;  %8352 = vmatprep.mubr.bf16.mxu1 %v7478_v38  ;;  %v4306_v58 = vshll.u32 %v3980_v10, 16  ;;  %v4289_v27 = vor.u32 %v4288_v13, %v4284_v24  ;;  %v4310_v20 = vshrl.u32 %v3980_v10, 16  ;;  %v9932_v49 = vpop.f32.mrf.mxu1  ;;  %v8893_v14 = vld [vmem:[#allocation2 + $0xc8] sm:$0xf]  ;;  %v8894_v52 = vld [vmem:[#allocation2 + $0xd4] sm:$0xf] }
 0x234   : > { %v7502_v63 = vcombine.low %v4261_v23, %v4271_v0  ;;  %v4299_v41 = vrot.slane %v4297_v56, 4  ;;  %v4280_v21 = vrot.slane %v4279_v29, 4  ;;  %v4302_v28 = vrot.slane %v4300_v37, 5  ;;  %v8895_v57 = vld [vmem:[#allocation2 + $0xd8] sm:$0xf]  ;;  %v9934_v33 = vpop.f32.mrf.mxu0 }
 0x235   : > { %v4308_v35 = vrot.slane %v4306_v58, 5  ;;  %v4316_v59 = vshll.u32 %v3981_v53, 16  ;;  %v4290_v51 = vrot.slane %v4289_v27, 4  ;;  %v4312_v38 = vrot.slane %v4310_v20, 4  ;;  %v9936_v46 = vpop.f32.mrf.mxu1  ;;  %v3984_v1 = vld [vmem:[#allocation2 + $0xec] sm:$0x1] }
 0x236   : > { %8400 = vmatprep.mubr.bf16.mxu0 %v7502_v63  ;;  %v7479_v44 = vcombine.low %v8892_v42, %v8893_v14  ;;  %v7480_v55 = vcombine.low %v8894_v52, %v8895_v57  ;;  %11261 = vst [vmem:[#allocation24_spill] sm:$0xff] %v9936_v46  ;;  %v4285_v10 = vsel %vm9460_vm10, %v4280_v21, %v4284_v24  ;;  %v4321_v4 = vshrl.u32 %v3982_v3, 16  ;;  %v3985_v29 = vld [vmem:[#allocation2 + $0xf4] sm:$0xf]  ;;  %v9942_v37 = vpop.f32.mrf.mxu0  ;;  %v3986_v42 = vld [vmem:[#allocation2 + $0xf8] sm:$0xf] }
 0x237   : > { %v4303_v60 = vor.u32 %v4302_v28, %v4299_v41  ;;  %v4318_v23 = vrot.slane %v4316_v59, 5  ;;  %v4295_v13 = vsel %vm9460_vm10, %v4290_v51, %v4294_v48  ;;  %v4313_v53 = vor.u32 %v4312_v38, %v4308_v35  ;;  %11262 = vst [vmem:[#allocation25_spill] sm:$0xff] %v9942_v37  ;;  %v3987_v59 = vld [vmem:[#allocation2 + $0xfc] sm:$0x1] }
 0x238   : > { %v4324_v56 = vshll.u32 %v3982_v3, 16  ;;  %v4330_v0 = vshll.u32 %v3983_v47, 16  ;;  %v7503_v58 = vcombine.low %v4285_v10, %v4295_v13  ;;  %v4323_v27 = vrot.slane %v4321_v4, 4  ;;  %v9944_v14 = vpop.f32.mrf.mxu1 }
 0x239   : > { %v4304_v63 = vrot.slane %v4303_v60, 4  ;;  %v4334_v20 = vshrl.u32 %v3983_v47, 16  ;;  %v4314_v24 = vrot.slane %v4313_v53, 4  ;;  %v4340_v28 = vshll.u32 %v3984_v1, 16 }
 0x23a   : > { %8353 = vmatmul.mubr.bf16.gmra.mxu1 %v7479_v44  ;;  %v4326_v41 = vrot.slane %v4324_v56, 5  ;;  %v4332_v21 = vrot.slane %v4330_v0, 5  ;;  %8401 = vmatmul.mubr.bf16.gmra.mxu0 %v7503_v58  ;;  %v4345_v51 = vshrl.u32 %v3985_v29, 16  ;;  %v4348_v38 = vshll.u32 %v3985_v29, 16  ;;  %v9948_v52 = vpop.f32.mrf.mxu0  ;;  %v9950_v47 = vpop.f32.mrf.mxu1 }
 0x23b   : > { %v4309_v48 = vsel %vm9460_vm10, %v4304_v63, %v4308_v35  ;;  %8356 = vmatprep.mubr.bf16.mxu1 %v7480_v55  ;;  %v4336_v3 = vrot.slane %v4334_v20, 4  ;;  %v4319_v57 = vsel %vm9460_vm10, %v4314_v24, %v4318_v23  ;;  %v4342_v10 = vrot.slane %v4340_v28, 5  ;;  %v483_v35 = vld [vmem:[#allocation2 + $0x10c] sm:$0x1]  ;;  %v3988_v20 = vld [vmem:[#allocation2 + $0x104] sm:$0xf] }
 0x23c   : > { %v4327_v44 = vor.u32 %v4326_v41, %v4323_v27  ;;  %v4354_v60 = vshll.u32 %v3986_v42, 16  ;;  %v7504_v1 = vcombine.low %v4309_v48, %v4319_v57  ;;  %v4347_v13 = vrot.slane %v4345_v51, 4  ;;  %v9954_v55 = vpop.f32.mrf.mxu0  ;;  %v9956_v56 = vpop.f32.mrf.mxu1  ;;  %v8896_v27 = vld [vmem:[#allocation2 + $0xe4] sm:$0xf]  ;;  %v8897_v24 = vld [vmem:[#allocation2 + $0xe8] sm:$0xf] }
 0x23d   : > { %v4337_v4 = vor.u32 %v4336_v3, %v4332_v21  ;;  %v4350_v53 = vrot.slane %v4348_v38, 5  ;;  %v4358_v58 = vshrl.u32 %v3986_v42, 16  ;;  %v4364_v63 = vshll.u32 %v3987_v59, 16  ;;  %v8898_v28 = vld [vmem:[#allocation2 + $0xf4] sm:$0xf] }
 0x23e   : > { %v4328_v0 = vrot.slane %v4327_v44, 4  ;;  %v4356_v29 = vrot.slane %v4354_v60, 5  ;;  %8404 = vmatprep.mubr.bf16.mxu0 %v7504_v1  ;;  %v7481_v41 = vcombine.low %v8896_v27, %v8897_v24  ;;  %v8899_v48 = vld [vmem:[#allocation2 + $0xf8] sm:$0xf]  ;;  %v3989_v51 = vld [vmem:[#allocation2 + $0x108] sm:$0xf]  ;;  %v9958_v38 = vpop.f32.mrf.mxu0  ;;  %v9960_v57 = vpop.f32.mrf.mxu1 }
 0x23f   : > { %v4338_v37 = vrot.slane %v4337_v4, 4  ;;  %v4351_v23 = vor.u32 %v4350_v53, %v4347_v13  ;;  %v7482_v3 = vcombine.low %v8898_v28, %v8899_v48  ;;  %11263 = vst [vmem:[#allocation26_spill] sm:$0xff] %v9960_v57  ;;  %v4360_v42 = vrot.slane %v4358_v58, 4  ;;  %v9966_v1 = vld [vmem:[#allocation2 + $0x24] sm:$0xf] }
 0x240   : > { %v4333_v44 = vsel %vm9460_vm10, %v4328_v0, %v4332_v21  ;;  %v4366_v59 = vrot.slane %v4364_v63, 5  ;;  %v484_v60 = vsel %vm9392_vm7, 0, %v483_v35  ;;  %v4369_v53 = vshrl.u32 %v3988_v20, 16  ;;  %v9970_v24 = vpop.f32.mrf.mxu0  ;;  %v9972_v28 = vpop.f32.mrf.mxu1  ;;  %v9974_v63 = vld [vmem:[#allocation2 + $0x28] sm:$0xf] }
 0x241   : > { %v4343_v4 = vsel %vm9460_vm10, %v4338_v37, %v4342_v10  ;;  %v4352_v13 = vrot.slane %v4351_v23, 4  ;;  %485 = vst [vmem:[#allocation2 + $0x10c] sm:$0x1] %v484_v60  ;;  %v4372_v27 = vshll.u32 %v3988_v20, 16  ;;  %11264 = vst [vmem:[#allocation27_spill] sm:$0xff] %v9970_v24  ;;  %v4361_v21 = vor.u32 %v4360_v42, %v4356_v29 }
 0x242   : > { %v7505_v48 = vcombine.low %v4333_v44, %v4343_v4  ;;  %8357 = vmatmul.mubr.bf16.gmra.mxu1 %v7481_v41  ;;  %v4378_v0 = vshll.u32 %v3989_v51, 16  ;;  %v4382_v58 = vshrl.u32 %v3989_v51, 16  ;;  %v4371_v35 = vrot.slane %v4369_v53, 4  ;;  %v9977_v10 = vpop.f32.mrf.mxu0  ;;  %v9979_v23 = vpop.f32.mrf.mxu1  ;;  %v4698_v60 = vld [vmem:[#allocation2 + $0x20] sm:$0x8] }
 0x243   : > { %8360 = vmatprep.mubr.bf16.mxu1 %v7482_v3  ;;  %v4374_v57 = vrot.slane %v4372_v27, 5  ;;  %v4769_v37 = vshrl.u32 %v9966_v1, 16  ;;  %11265 = vst [vmem:[#allocation28_spill] sm:$0xff] %v9977_v10  ;;  %v4357_v20 = vsel %vm9460_vm10, %v4352_v13, %v4356_v29  ;;  %v4362_v44 = vrot.slane %v4361_v21, 4  ;;  %v9984_v53 = vld [vmem:[#allocation2 + $0x34] sm:$0xf] }
 0x244   : > { %8405 = vmatmul.mubr.bf16.gmra.mxu0 %v7505_v48  ;;  %v4380_v42 = vrot.slane %v4378_v0, 5  ;;  %v4384_v41 = vrot.slane %v4382_v58, 4  ;;  %v4778_v3 = vshrl.u32 %v9974_v63, 16  ;;  %v9986_v27 = vpop.f32.mrf.mxu0  ;;  %v9988_v54 = vpop.f32.mrf.mxu1  ;;  %v4772_v29 = vshll.u32 %v9966_v1, 16  ;;  %v8901_v24 = vld [vmem:[#allocation2 + $0x108] sm:$0xf] }
 0x245   : > { %v4375_v51 = vor.u32 %v4374_v57, %v4371_v35  ;;  %v4771_v4 = vrot.slane %v4769_v37, 7  ;;  %11266 = vst [vmem:[#allocation29_spill] sm:$0xff] %v9986_v27  ;;  %v4367_v48 = vsel %vm9460_vm10, %v4362_v44, %v4366_v59  ;;  %v4781_v13 = vshll.u32 %v9974_v63, 16  ;;  %v9994_v35 = vld [vmem:[#allocation2 + $0x38] sm:$0xf] }
 0x246   : > { %v4385_v46 = vor.u32 %v4384_v41, %v4380_v42  ;;  %v7506_v21 = vcombine.low %v4357_v20, %v4367_v48  ;;  %v4780_v57 = vrot.slane %v4778_v3, 7  ;;  %v4764_v58 = vshrl.u32 %v4698_v60, 16  ;;  %v9996_v37 = vpop.f32.mrf.mxu0  ;;  %v9998_v12 = vpop.f32.mrf.mxu1  ;;  %v10001_v60 = vld [vmem:[#allocation2 + $0x44] sm:$0xf] }
 0x247   : > { %v4376_v0 = vrot.slane %v4375_v51, 4  ;;  %11267 = vst [vmem:[#allocation30_spill] sm:$0xff] %v9996_v37  ;;  %11268 = vst [vmem:[#allocation31_spill] sm:$0xff] %v9998_v12  ;;  %v7483_v59 = vcombine.low %v8900_v45, %v8901_v24  ;;  %v4774_v44 = vor.u32 %v4772_v29, %v4771_v4  ;;  %v4791_v41 = vshrl.u32 %v9984_v53, 16 }
 0x248   : > { %v3990_v36 = vld [vmem:[#allocation2 + $0x10c] sm:$0x1]  ;;  %v4386_v62 = vrot.slane %v4385_v46, 4  ;;  %8408 = vmatprep.mubr.bf16.mxu0 %v7506_v21  ;;  %v7516_v20 = vrot.slane %v4764_v58, 11  ;;  %v4776_v51 = vrot.slane %v4771_v4, 4  ;;  %v4783_v3 = vor.u32 %v4781_v13, %v4780_v57  ;;  %v10003_v48 = vpop.f32.mrf.mxu0  ;;  %v10005_v8 = vpop.f32.mrf.mxu1 }
 0x249   : > { %v4388_v50 = vshll.u32 %v3990_v36, 16  ;;  %11269 = vst [vmem:[#allocation32_spill] sm:$0xff] %v10003_v48  ;;  %v4381_v46 = vsel %vm9460_vm10, %v4376_v0, %v4380_v42  ;;  %v7556_v45 = vcombine.low %v9966_v1, %v9974_v63  ;;  %v4793_v24 = vrot.slane %v4791_v41, 7  ;;  %v10012_v36 = vld [vmem:[#allocation2 + $0x48] sm:$0xf] }
 0x24a   : > { %8361 = vmatmul.mubr.bf16.gmra.mxu1 %v7483_v59  ;;  %v4800_v29 = vshrl.u32 %v9994_v35, 16  ;;  %v4775_v13 = vsel %vm9355_vm5, %v7516_v20, %v4774_v44  ;;  %v4784_v21 = vsel %vm9355_vm5, %v4776_v51, %v4783_v3  ;;  %v4794_v57 = vshll.u32 %v9984_v53, 16  ;;  %v4701_v58 = vld [vmem:[#allocation2 + $0x30] sm:$0x8]  ;;  %v10019_v42 = vpop.f32.mrf.mxu0  ;;  %v10021_v0 = vpop.f32.mrf.mxu1  ;;  %v4704_v3 = vld [vmem:[#allocation2 + $0x40] sm:$0x8] }
 0x24b   : > { %v4390_v4 = vrot.slane %v4388_v50, 5  ;;  %11270 = vst [vmem:[#allocation33_spill] sm:$0xff] %v10019_v42  ;;  %11271 = vst [vmem:[#allocation34_spill] sm:$0xff] %v10021_v0  ;;  %v7532_v1 = vcombine.low %v4775_v13, %v4784_v21  ;;  %v4803_v59 = vshll.u32 %v9994_v35, 16  ;;  %v4813_v41 = vshrl.u32 %v10001_v60, 16 }
 0x24c   : > { %v4802_v63 = vrot.slane %v4800_v29, 7  ;;  %v4816_v44 = vshll.u32 %v10001_v60, 16  ;;  %v4822_v20 = vshrl.u32 %v10012_v36, 16  ;;  %v4825_v51 = vshll.u32 %v10012_v36, 16  ;;  %v10030_v48 = vpop.f32.mrf.mxu0  ;;  %v10032_v12 = vpop.f32.mrf.mxu1  ;;  %v10040_v0 = vld [vmem:[#allocation2 + $0x58] sm:$0xf] }
 0x24d   : > { %v4391_v50 = vsel %vm9460_vm10, %v4386_v62, %v4390_v4  ;;  %11272 = vst [vmem:[#allocation35_spill] sm:$0xff] %v10030_v48  ;;  %8428 = vmatprep.mubr.bf16.mxu1 %v7532_v1  ;;  %v4815_v29 = vrot.slane %v4813_v41, 7  ;;  %v10036_v21 = vadd.f32 %v9853_v19, %v9868_v31  ;;  %v4786_v17 = vshrl.u32 %v4701_v58, 16  ;;  %v10038_v62 = vld [vmem:[#allocation2 + $0x54] sm:$0xf] }
 0x24e   : > { %v7507_v13 = vcombine.low %v4381_v46, %v4391_v50  ;;  %v4824_v4 = vrot.slane %v4822_v20, 7  ;;  %v4796_v42 = vor.u32 %v4794_v57, %v4793_v24  ;;  %v4798_v37 = vrot.slane %v4793_v24, 4  ;;  %v10042_v10 = vpop.f32.mrf.mxu0  ;;  %v10044_v48 = vpop.f32.mrf.mxu1  ;;  %v10049_v24 = vld [vmem:[#allocation2 + $0x64] sm:$0xf] }
 0x24f   : > { %11273 = vst [vmem:[#allocation36_spill] sm:$0xff] %v10036_v21  ;;  %v4805_v27 = vor.u32 %v4803_v59, %v4802_v63  ;;  %11274 = vst [vmem:[#allocation37_spill] sm:$0xff] %v10044_v48  ;;  %v7517_v46 = vrot.slane %v4786_v17, 11  ;;  %v4808_v1 = vshrl.u32 %v4704_v3, 16  ;;  %v4818_v41 = vor.u32 %v4816_v44, %v4815_v29 }
 0x250   : > { %8409 = vmatmul.mubr.bf16.gmra.mxu0 %v7507_v13  ;;  %v4820_v31 = vrot.slane %v4815_v29, 4  ;;  %v4827_v58 = vor.u32 %v4825_v51, %v4824_v4  ;;  %v4835_v57 = vshrl.u32 %v10038_v62, 16  ;;  %v10051_v63 = vpop.f32.mrf.mxu0  ;;  %v10053_v59 = vpop.f32.mrf.mxu1  ;;  %v7557_v50 = vcombine.low %v9984_v53, %v9994_v35  ;;  %v8828_v13 = vld [vmem:[#allocation8 + $0x230] sm:$0xff]  }
 0x251   : > { %8476 = vmatprep.mubr.bf16.mxu0 %v7556_v45  ;;  %v4806_v19 = vsel %vm9355_vm5, %v4798_v37, %v4805_v27  ;;  %11275 = vst [vmem:[#allocation38_spill] sm:$0xff] %v10051_v63  ;;  %v4797_v17 = vsel %vm9355_vm5, %v7517_v46, %v4796_v42  ;;  %v7518_v45 = vrot.slane %v4808_v1, 11  ;;  %v4844_v44 = vshrl.u32 %v10040_v0, 16  ;;  %v10060_v27 = vld [vmem:[#allocation2 + $0x68] sm:$0xf] }
 0x252   : > { %v7558_v37 = vcombine.low %v10001_v60, %v10012_v36  ;;  %v7533_v20 = vcombine.low %v4797_v17, %v4806_v19  ;;  %v4828_v51 = vsel %vm9355_vm5, %v4820_v31, %v4827_v58  ;;  %v4837_v3 = vrot.slane %v4835_v57, 7  ;;  %v10066_v29 = vpop.f32.mrf.mxu0  ;;  %v10068_v53 = vpop.f32.mrf.mxu1  ;;  %v4707_v36 = vld [vmem:[#allocation2 + $0x50] sm:$0x8]  ;;  %v4710_v58 = vld [vmem:[#allocation2 + $0x60] sm:$0x8]  ;;  %v8831_v63 = vld [vmem:[#allocation8 + $0x228] sm:$0xff]  }
 0x253   : > { %v4819_v35 = vsel %vm9355_vm5, %v7518_v45, %v4818_v41  ;;  %v4846_v42 = vrot.slane %v4844_v44, 7  ;;  %v10074_v4 = vadd.f32 %v9857_v15, %v9875_v18  ;;  %v4857_v60 = vshrl.u32 %v10049_v24, 16  ;;  %v10091_v44 = vld [vmem:[#allocation2 + $0x74] sm:$0xf] }
 0x254   : > { %8429 = vmatmul.mubr.bf16.vlgmr.msra.gmra.mxu1 %v7533_v20  ;;  %v7534_v46 = vcombine.low %v4819_v35, %v4828_v51  ;;  %v4838_v1 = vshll.u32 %v10038_v62, 16  ;;  %v4847_v19 = vshll.u32 %v10040_v0, 16  ;;  %v4866_v31 = vshrl.u32 %v10060_v27, 16  ;;  %v10080_v57 = vpop.f32.mrf.mxu0  ;;  %v10082_v41 = vpop.f32.mrf.mxu1 }
 0x255   : > { %11276 = vst [vmem:[#allocation39_spill] sm:$0xff] %v10074_v4  ;;  %11277 = vst [vmem:[#allocation40_spill] sm:$0xff] %v10080_v57  ;;  %8509 = vmatpush3.bf16.msra.mxu1 %v9907_v40  ;;  %v4859_v15 = vrot.slane %v4857_v60, 7  ;;  %v4860_v18 = vshll.u32 %v10049_v24, 16  ;;  %v4869_v17 = vshll.u32 %v10060_v27, 16  ;;  %v10089_v45 = vadd.f32 %v9861_v25, %v9881_v26 }
 0x256   : > { %8432 = vmatprep.mubr.bf16.mxu1 %v7534_v46  ;;  %v4868_v20 = vrot.slane %v4866_v31, 7  ;;  %8510 = vmatprep.subr.bf16.mxu1 %v8828_v13  ;;  %v10095_v51 = vadd.f32 %v9873_v32, %v9893_v39  ;;  %v4830_v35 = vshrl.u32 %v4707_v36, 16  ;;  %v4840_v40 = vor.u32 %v4838_v1, %v4837_v3  ;;  %v10097_v60 = vld [vmem:[#allocation2 + $0x78] sm:$0xf]  ;;  %v10099_v48 = vpop.f32.mrf.mxu0  ;;  %v10101_v4 = vpop.f32.mrf.mxu1 }
 0x257   : > { %11278 = vst [vmem:[#allocation41_spill] sm:$0xff] %v10089_v45  ;;  %11279 = vst [vmem:[#allocation42_spill] sm:$0xff] %v10101_v4  ;;  %v4842_v25 = vrot.slane %v4837_v3, 4  ;;  %v4849_v26 = vor.u32 %v4847_v19, %v4846_v42  ;;  %v4852_v45 = vshrl.u32 %v4710_v58, 16  ;;  %v4862_v46 = vor.u32 %v4860_v18, %v4859_v15  ;;  %v10111_v3 = vld [vmem:[#allocation2 + $0x84] sm:$0xf] }
 0x258   : > { %8477 = vmatmul.mubr.bf16.vlgmr.msra.gmra.mxu0 %v7557_v50  ;;  %v7519_v31 = vrot.slane %v4830_v35, 11  ;;  %v4864_v21 = vrot.slane %v4859_v15, 4  ;;  %v4871_v57 = vor.u32 %v4869_v17, %v4868_v20  ;;  %v4879_v32 = vshrl.u32 %v10091_v44, 16  ;;  %v10104_v39 = vpop.f32.mrf.mxu0  ;;  %v10106_v36 = vpop.f32.mrf.mxu1  ;;  %v10121_v15 = vld [vmem:[#allocation2 + $0x88] sm:$0xf] }
 0x259   : > { %8480 = vmatprep.mubr.bf16.mxu0 %v7558_v37  ;;  %11280 = vst [vmem:[#allocation43_spill] sm:$0xff] %v10104_v39  ;;  %v4850_v1 = vsel %vm9355_vm5, %v4842_v25, %v4849_v26  ;;  %8511 = vmatpush3.bf16.msra.mxu1 %v8828_v13  ;;  %v7520_v4 = vrot.slane %v4852_v45, 11  ;;  %v4888_v50 = vshrl.u32 %v10097_v60, 16  ;;  %v7559_v37 = vcombine.low %v10038_v62, %v10040_v0  ;;  %v8837_v39 = vld [vmem:[#allocation8 + $0x218] sm:$0xff]  }
 0x25a   : > { %v7560_v42 = vcombine.low %v10049_v24, %v10060_v27  ;;  %v4841_v19 = vsel %vm9355_vm5, %v7519_v31, %v4840_v40  ;;  %v4872_v58 = vsel %vm9355_vm5, %v4864_v21, %v4871_v57  ;;  %8512 = vmatprep.subr.bf16.mxu1 %v8831_v63  ;;  %v10123_v13 = vpop.f32.mrf.mxu0  ;;  %v10125_v18 = vpop.f32.mrf.mxu1  ;;  %v4881_v62 = vrot.slane %v4879_v32, 7  ;;  %v4713_v24 = vld [vmem:[#allocation2 + $0x70] sm:$0x8]  ;;  %v8834_v27 = vld [vmem:[#allocation8 + $0x220] sm:$0xff]  }
 0x25b   : > { %v7535_v17 = vcombine.low %v4841_v19, %v4850_v1  ;;  %v4863_v0 = vsel %vm9355_vm5, %v7520_v4, %v4862_v46  ;;  %v4890_v45 = vrot.slane %v4888_v50, 7  ;;  %v4882_v35 = vshll.u32 %v10091_v44, 16  ;;  %v4716_v32 = vld [vmem:[#allocation2 + $0x80] sm:$0x8]  ;;  %v10151_v19 = vld [vmem:[#allocation2 + $0x94] sm:$0xf] }
 0x25c   : > { %v7536_v20 = vcombine.low %v4863_v0, %v4872_v58  ;;  %v10132_v21 = vadd.f32 %v9879_v34, %v9901_v22  ;;  %v4901_v57 = vshrl.u32 %v10111_v3, 16  ;;  %v10135_v40 = vpop.f32.mrf.mxu0  ;;  %v10137_v25 = vpop.f32.mrf.mxu1  ;;  %v4891_v4 = vshll.u32 %v10097_v60, 16 }
 0x25d   : > { %11281 = vst [vmem:[#allocation44_spill] sm:$0xff] %v10135_v40  ;;  %8433 = vmatmul.mubr.bf16.gmra.mxu1 %v7535_v17  ;;  %v4904_v26 = vshll.u32 %v10111_v3, 16  ;;  %v4910_v46 = vshrl.u32 %v10121_v15, 16  ;;  %v10144_v31 = vadd.f32 %v9883_v11, %v9905_v16  ;;  %v4913_v22 = vshll.u32 %v10121_v15, 16 }
 0x25e   : > { %8436 = vmatprep.mubr.bf16.mxu1 %v7536_v20  ;;  %v4903_v34 = vrot.slane %v4901_v57, 7  ;;  %v10149_v1 = vadd.f32 %v9899_v5, %v9919_v43  ;;  %v4874_v50 = vshrl.u32 %v4713_v24, 16  ;;  %8513 = vmatpush3.bf16.msra.mxu1 %v8831_v63  ;;  %v10153_v58 = vpop.f32.mrf.mxu0  ;;  %v10155_v17 = vpop.f32.mrf.mxu1  ;;  %v4884_v16 = vor.u32 %v4882_v35, %v4881_v62  ;;  %v10157_v57 = vld [vmem:[#allocation2 + $0x98] sm:$0xf] }
 0x25f   : > { %11282 = vst [vmem:[#allocation45_spill] sm:$0xff] %v10153_v58  ;;  %11283 = vst [vmem:[#allocation46_spill] sm:$0xff] %v10155_v17  ;;  %v4912_v11 = vrot.slane %v4910_v46, 7  ;;  %v4886_v0 = vrot.slane %v4881_v62, 4  ;;  %v4893_v20 = vor.u32 %v4891_v4, %v4890_v45  ;;  %8514 = vmatprep.subr.bf16.mxu1 %v8834_v27  ;;  %v7561_v5 = vcombine.low %v10091_v44, %v10097_v60  ;;  %v10164_v62 = vld [vmem:[#allocation2 + $0xa4] sm:$0xf] }
 0x260   : > { %8481 = vmatmul.mubr.bf16.gmra.mxu0 %v7559_v37  ;;  %v7521_v43 = vrot.slane %v4874_v50, 11  ;;  %v4896_v63 = vshrl.u32 %v4716_v32, 16  ;;  %v4906_v24 = vor.u32 %v4904_v26, %v4903_v34  ;;  %v4908_v17 = vrot.slane %v4903_v34, 4  ;;  %v10166_v45 = vpop.f32.mrf.mxu0  ;;  %v10172_v26 = vld [vmem:[#allocation2 + $0xa8] sm:$0xf] }
 0x261   : > { %8484 = vmatprep.mubr.bf16.mxu0 %v7560_v42  ;;  %v4894_v58 = vsel %vm9355_vm5, %v4886_v0, %v4893_v20  ;;  %v4915_v37 = vor.u32 %v4913_v22, %v4912_v11  ;;  %v4923_v35 = vshrl.u32 %v10151_v19, 16  ;;  %11284 = vst [vmem:[#allocation47_spill] sm:$0xff] %v10166_v45  ;;  %v4926_v44 = vshll.u32 %v10151_v19, 16  ;;  %v4719_v20 = vld [vmem:[#allocation2 + $0x90] sm:$0x8] }
 0x262   : > { %v4885_v42 = vsel %vm9355_vm5, %v7521_v43, %v4884_v16  ;;  %v7522_v4 = vrot.slane %v4896_v63, 11  ;;  %v4932_v60 = vshrl.u32 %v10157_v57, 16  ;;  %8515 = vmatpush3.bf16.msra.mxu1 %v8834_v27  ;;  %v10174_v46 = vpop.f32.mrf.mxu1  ;;  %v4935_v50 = vshll.u32 %v10157_v57, 16  ;;  %v8840_v43 = vld [vmem:[#allocation8 + $0x210] sm:$0xff]  }
 0x263   : > { %v7537_v32 = vcombine.low %v4885_v42, %v4894_v58  ;;  %v4916_v34 = vsel %vm9355_vm5, %v4908_v17, %v4915_v37  ;;  %v4925_v22 = vrot.slane %v4923_v35, 7  ;;  %8516 = vmatprep.subr.bf16.mxu1 %v8837_v39  ;;  %v10183_v0 = vadd.f32 %v9903_v9, %v9926_v7 }
 0x264   : > { %v4907_v11 = vsel %vm9355_vm5, %v7522_v4, %v4906_v24  ;;  %v4934_v16 = vrot.slane %v4932_v60, 7  ;;  %v4945_v27 = vshrl.u32 %v10164_v62, 16  ;;  %v10186_v58 = vpop.f32.mrf.mxu1  ;;  %v4948_v63 = vshll.u32 %v10164_v62, 16  ;;  %v4722_v24 = vld [vmem:[#allocation2 + $0xa0] sm:$0x8] }
 0x265   : > { %8437 = vmatmul.mubr.bf16.gmra.mxu1 %v7537_v32  ;;  %v7538_v17 = vcombine.low %v4907_v11, %v4916_v34  ;;  %v4954_v37 = vshrl.u32 %v10172_v26, 16  ;;  %v4957_v35 = vshll.u32 %v10172_v26, 16  ;;  %v10191_v42 = vpop.f32.mrf.mxu0  ;;  %v7562_v9 = vcombine.low %v10111_v3, %v10121_v15  ;;  %v10199_v60 = vld [vmem:[#allocation2 + $0xb4] sm:$0xf]  ;;  %v8843_v3 = vld [vmem:[#allocation8 + $0x208] sm:$0xff]  }
 0x266   : > { %11285 = vst [vmem:[#allocation48_spill] sm:$0xff] %v10191_v42  ;;  %v4947_v7 = vrot.slane %v4945_v27, 7  ;;  %v10197_v4 = vadd.f32 %v9909_v6, %v9932_v49  ;;  %8517 = vmatpush3.bf16.msra.mxu1 %v8837_v39  ;;  %v10203_v34 = vadd.f32 %v9924_v30, %v9944_v14  ;;  %v4918_v11 = vshrl.u32 %v4719_v20, 16  ;;  %v10205_v42 = vld [vmem:[#allocation2 + $0xb8] sm:$0xf]  ;;  %v10209_v27 = vpop.f32.mrf.mxu1 }
 0x267   : > { %8440 = vmatprep.mubr.bf16.mxu1 %v7538_v17  ;;  %v4956_v32 = vrot.slane %v4954_v37, 7  ;;  %v4928_v45 = vor.u32 %v4926_v44, %v4925_v22  ;;  %v10207_v15 = vpop.f32.mrf.mxu0  ;;  %v4930_v6 = vrot.slane %v4925_v22, 4  ;;  %v4937_v49 = vor.u32 %v4935_v50, %v4934_v16  ;;  %8518 = vmatprep.subr.bf16.mxu1 %v8840_v43  ;;  %v10219_v50 = vld [vmem:[#allocation2 + $0xc4] sm:$0xf] }
 0x268   : > { %8485 = vmatmul.mubr.bf16.gmra.mxu0 %v7561_v5  ;;  %11286 = vst [vmem:[#allocation49_spill] sm:$0xff] %v10207_v15  ;;  %v4940_v39 = vshrl.u32 %v4722_v24, 16  ;;  %v4950_v5 = vor.u32 %v4948_v63, %v4947_v7  ;;  %v7523_v17 = vrot.slane %v4918_v11, 11  ;;  %v4952_v37 = vrot.slane %v4947_v7, 4  ;;  %v4725_v11 = vld [vmem:[#allocation2 + $0xb0] sm:$0x8] }
 0x269   : > { %8488 = vmatprep.mubr.bf16.mxu0 %v7562_v9  ;;  %v4959_v40 = vor.u32 %v4957_v35, %v4956_v32  ;;  %v4967_v30 = vshrl.u32 %v10199_v60, 16  ;;  %v10212_v14 = vpop.f32.mrf.mxu0  ;;  %v7563_v44 = vcombine.low %v10151_v19, %v10157_v57  ;;  %v4938_v20 = vsel %vm9355_vm5, %v4930_v6, %v4937_v49  ;;  %v10226_v9 = vld [vmem:[#allocation2 + $0xc8] sm:$0xf]  ;;  %v10228_v19 = vpop.f32.mrf.mxu1 }
 0x26a   : > { %11287 = vst [vmem:[#allocation50_spill] sm:$0xff] %v10212_v14  ;;  %v7524_v15 = vrot.slane %v4940_v39, 11  ;;  %v4976_v22 = vshrl.u32 %v10205_v42, 16  ;;  %8519 = vmatpush3.bf16.msra.mxu1 %v8840_v43  ;;  %v4929_v16 = vsel %vm9355_vm5, %v7523_v17, %v4928_v45  ;;  %v4970_v24 = vshll.u32 %v10199_v60, 16  ;;  %11288 = vst [vmem:[#allocation51_spill] sm:$0xff] %v10228_v19  ;;  %v8844_v39 = vld [vmem:[#allocation8 + $0x200] sm:$0xff]  }
 0x26b   : > { %v4960_v63 = vsel %vm9355_vm5, %v4952_v37, %v4959_v40  ;;  %v4969_v35 = vrot.slane %v4967_v30, 7  ;;  %8520 = vmatprep.subr.bf16.mxu1 %v8843_v3  ;;  %v7539_v57 = vcombine.low %v4929_v16, %v4938_v20  ;;  %v4979_v43 = vshll.u32 %v10205_v42, 16  ;;  %v10239_v17 = vpop.f32.mrf.mxu0  ;;  %v10357_v14 = vld [vmem:[#allocation2 + $0x114] sm:$0xf] }
 0x26c   : > { %v4951_v7 = vsel %vm9355_vm5, %v7524_v15, %v4950_v5  ;;  %v4978_v32 = vrot.slane %v4976_v22, 7  ;;  %v10235_v40 = vadd.f32 %v9930_v61, %v9950_v47  ;;  %v4989_v6 = vshrl.u32 %v10219_v50, 16  ;;  %11289 = vst [vmem:[#allocation52_spill] sm:$0xff] %v10239_v17  ;;  %v4728_v61 = vld [vmem:[#allocation2 + $0xc0] sm:$0x8] }
 0x26d   : > { %v7540_v45 = vcombine.low %v4951_v7, %v4960_v63  ;;  %v4992_v49 = vshll.u32 %v10219_v50, 16  ;;  %v7564_v37 = vcombine.low %v10164_v62, %v10172_v26  ;;  %8441 = vmatmul.mubr.bf16.gmra.mxu1 %v7539_v57  ;;  %v4998_v15 = vshrl.u32 %v10226_v9, 16  ;;  %v10255_v26 = vld [vmem:[#allocation2 + $0xd4] sm:$0xf] }
 0x26e   : > { %v5001_v5 = vshll.u32 %v10226_v9, 16  ;;  %v10247_v30 = vadd.f32 %v9934_v33, %v9956_v56  ;;  %v7565_v47 = vcombine.low %v10199_v60, %v10205_v42  ;;  %v4991_v20 = vrot.slane %v4989_v6, 7  ;;  %8521 = vmatpush3.bf16.msra.mxu1 %v8843_v3 }
 0x26f   : > { %8444 = vmatprep.mubr.bf16.mxu1 %v7540_v45  ;;  %v10253_v22 = vadd.f32 %v9948_v52, %v9972_v28  ;;  %v4962_v62 = vshrl.u32 %v4725_v11, 16  ;;  %v10257_v16 = vpop.f32.mrf.mxu1  ;;  %v5000_v63 = vrot.slane %v4998_v15, 7  ;;  %v4972_v33 = vor.u32 %v4970_v24, %v4969_v35  ;;  %8522 = vmatprep.subr.bf16.mxu1 %v8844_v39  ;;  %v10276_v15 = vld [vmem:[#allocation2 + $0xe8] sm:$0xf] }
 0x270   : > { %8489 = vmatmul.mubr.bf16.gmra.mxu0 %v7563_v44  ;;  %v4974_v56 = vrot.slane %v4969_v35, 4  ;;  %v4981_v57 = vor.u32 %v4979_v43, %v4978_v32  ;;  %v10259_v44 = vld [vmem:[#allocation2 + $0xd8] sm:$0xf]  ;;  %v4984_v42 = vshrl.u32 %v4728_v61, 16  ;;  %v4994_v60 = vor.u32 %v4992_v49, %v4991_v20  ;;  %v10270_v43 = vld [vmem:[#allocation2 + $0xe4] sm:$0xf] }
 0x271   : > { %8492 = vmatprep.mubr.bf16.mxu0 %v7564_v37  ;;  %v7525_v7 = vrot.slane %v4962_v62, 11  ;;  %v4996_v45 = vrot.slane %v4991_v20, 4  ;;  %v10263_v28 = vpop.f32.mrf.mxu1  ;;  %v7566_v11 = vcombine.low %v10219_v50, %v10226_v9  ;;  %v5003_v35 = vor.u32 %v5001_v5, %v5000_v63 }
 0x272   : > { %v10261_v52 = vpop.f32.mrf.mxu0  ;;  %v4982_v24 = vsel %vm9355_vm5, %v4974_v56, %v4981_v57  ;;  %v5011_v32 = vshrl.u32 %v10255_v26, 16  ;;  %v7526_v6 = vrot.slane %v4984_v42, 11  ;;  %v5014_v49 = vshll.u32 %v10255_v26, 16  ;;  %8523 = vmatpush3.bf16.msra.mxu1 %v8844_v39  ;;  %v4731_v57 = vld [vmem:[#allocation2 + $0xd0] sm:$0x8] }
 0x273   : > { %11290 = vst [vmem:[#allocation53_spill] sm:$0xff] %v10261_v52  ;;  %v4973_v3 = vsel %vm9355_vm5, %v7525_v7, %v4972_v33  ;;  %v5020_v37 = vshrl.u32 %v10259_v44, 16  ;;  %v5004_v50 = vsel %vm9355_vm5, %v4996_v45, %v5003_v35  ;;  %v5023_v5 = vshll.u32 %v10259_v44, 16  ;;  %v10281_v20 = vpop.f32.mrf.mxu1  ;;  %v4734_v35 = vld [vmem:[#allocation2 + $0xe0] sm:$0x8] }
 0x274   : > { %v7541_v61 = vcombine.low %v4973_v3, %v4982_v24  ;;  %v5013_v9 = vrot.slane %v5011_v32, 7  ;;  %v4995_v62 = vsel %vm9355_vm5, %v7526_v6, %v4994_v60  ;;  %v10287_v33 = vadd.f32 %v9954_v55, %v9979_v23  ;;  %v10290_v7 = vpop.f32.mrf.mxu0  ;;  %v10301_v32 = vld [vmem:[#allocation2 + $0xf4] sm:$0xf]  ;;  %v11292_v6 = vld [vmem:[#allocation28_spill] sm:$0xff] }
 0x275   : > { %v5022_v63 = vrot.slane %v5020_v37, 7  ;;  %v5033_v56 = vshrl.u32 %v10270_v43, 16  ;;  %11291 = vst [vmem:[#allocation54_spill] sm:$0xff] %v10290_v7  ;;  %v7542_v42 = vcombine.low %v4995_v62, %v5004_v50  ;;  %v5036_v45 = vshll.u32 %v10270_v43, 16  ;;  %v10309_v62 = vpop.f32.mrf.mxu1  ;;  %v429_v7 = vld [vmem:[#allocation2 + $0x110] sm:$0x8] }
 0x276   : > { %8445 = vmatmul.mubr.bf16.gmra.mxu1 %v7541_v61  ;;  %v5042_v39 = vshrl.u32 %v10276_v15, 16  ;;  %v5045_v24 = vshll.u32 %v10276_v15, 16  ;;  %v7567_v60 = vcombine.low %v10255_v26, %v10259_v44  ;;  %v10299_v23 = vadd.f32 %v9958_v38, %v9988_v54  ;;  %11293 = vst [vmem:[#allocation28_spill] sm:$0xff] %v10309_v62  ;;  %v10311_v38 = vpop.f32.mrf.mxu0 }
 0x277   : > { %v5035_v55 = vrot.slane %v5033_v56, 7  ;;  %8448 = vmatprep.mubr.bf16.mxu1 %v7542_v42  ;;  %v10305_v37 = vadd.f32 %v11292_v6, %v10005_v8  ;;  %v5006_v61 = vshrl.u32 %v4731_v57, 16  ;;  %v5016_v50 = vor.u32 %v5014_v49, %v5013_v9  ;;  %11294 = vst [vmem:[#allocation55_spill] sm:$0xff] %v10311_v38 }
 0x278   : > { %8493 = vmatmul.mubr.bf16.gmra.mxu0 %v7565_v47  ;;  %v5044_v3 = vrot.slane %v5042_v39, 7  ;;  %v10307_v47 = vld [vmem:[#allocation2 + $0xf8] sm:$0xf]  ;;  %v5018_v26 = vrot.slane %v5013_v9, 4  ;;  %v5025_v44 = vor.u32 %v5023_v5, %v5022_v63  ;;  %v5028_v56 = vshrl.u32 %v4734_v35, 16 }
 0x279   : > { %8496 = vmatprep.mubr.bf16.mxu0 %v7566_v11  ;;  %v5038_v54 = vor.u32 %v5036_v45, %v5035_v55  ;;  %v7527_v17 = vrot.slane %v5006_v61, 11  ;;  %v5040_v11 = vrot.slane %v5035_v55, 4  ;;  %v5055_v39 = vshrl.u32 %v10301_v32, 16  ;;  %v10319_v9 = vld [vmem:[#allocation2 + $0x104] sm:$0xf] }
 0x27a   : > { %v5047_v42 = vor.u32 %v5045_v24, %v5044_v3  ;;  %v7568_v8 = vcombine.low %v10270_v43, %v10276_v15  ;;  %v5026_v49 = vsel %vm9355_vm5, %v5018_v26, %v5025_v44  ;;  %v7528_v57 = vrot.slane %v5028_v56, 11  ;;  %v10326_v35 = vld [vmem:[#allocation2 + $0x108] sm:$0xf]  ;;  %v4737_v26 = vld [vmem:[#allocation2 + $0xf0] sm:$0x8]  ;;  %v10333_v44 = vpop.f32.mrf.mxu0 }
 0x27b   : > { %v5064_v6 = vshrl.u32 %v10307_v47, 16  ;;  %v5017_v5 = vsel %vm9355_vm5, %v7527_v17, %v5016_v50  ;;  %v5057_v45 = vrot.slane %v5055_v39, 7  ;;  %v5058_v24 = vshll.u32 %v10301_v32, 16  ;;  %11295 = vst [vmem:[#allocation56_spill] sm:$0xff] %v10333_v44  ;;  %v11296_v50 = vld [vmem:[#allocation34_spill] sm:$0xff]  ;;  %v11297_v56 = vld [vmem:[#allocation29_spill] sm:$0xff] }
 0x27c   : > { %v5048_v63 = vsel %vm9355_vm5, %v5040_v11, %v5047_v42  ;;  %v10328_v43 = vpop.f32.mrf.mxu1  ;;  %v7543_v15 = vcombine.low %v5017_v5, %v5026_v49  ;;  %v5039_v55 = vsel %vm9355_vm5, %v7528_v57, %v5038_v54  ;;  %v5067_v61 = vshll.u32 %v10307_v47, 16  ;;  %v11298_v57 = vld [vmem:[#allocation30_spill] sm:$0xff]  ;;  %v4740_v5 = vld [vmem:[#allocation2 + $0x100] sm:$0x8] }
 0x27d   : > { %v5066_v3 = vrot.slane %v5064_v6, 7  ;;  %v7544_v17 = vcombine.low %v5039_v55, %v5048_v63  ;;  %v10337_v11 = vadd.f32 %v11297_v56, %v11296_v50  ;;  %v5077_v42 = vshrl.u32 %v10319_v9, 16  ;;  %v11299_v50 = vld [vmem:[#allocation33_spill] sm:$0xff] }
 0x27e   : > { %v5080_v39 = vshll.u32 %v10319_v9, 16  ;;  %v10341_v62 = vpop.f32.mrf.mxu1  ;;  %8449 = vmatmul.mubr.bf16.gmra.mxu1 %v7543_v15  ;;  %v5086_v54 = vshrl.u32 %v10326_v35, 16  ;;  %v5089_v49 = vshll.u32 %v10326_v35, 16  ;;  %v10347_v6 = vadd.f32 %v11298_v57, %v10032_v12 }
 0x27f   : > { %8452 = vmatprep.mubr.bf16.mxu1 %v7544_v17  ;;  %v7569_v63 = vcombine.low %v10301_v32, %v10307_v47  ;;  %v5079_v55 = vrot.slane %v5077_v42, 7  ;;  %v10353_v56 = vadd.f32 %v11299_v50, %v10053_v59  ;;  %v5060_v44 = vor.u32 %v5058_v24, %v5057_v45 }
 0x280   : > { %8497 = vmatmul.mubr.bf16.gmra.mxu0 %v7567_v60  ;;  %v5050_v60 = vshrl.u32 %v4737_v26, 16  ;;  %v5088_v15 = vrot.slane %v5086_v54, 7  ;;  %v5062_v19 = vrot.slane %v5057_v45, 4  ;;  %v5069_v38 = vor.u32 %v5067_v61, %v5066_v3  ;;  %v10359_v32 = vpop.f32.mrf.mxu1  ;;  %v11301_v26 = vld [vmem:[#allocation35_spill] sm:$0xff] }
 0x281   : > { %8500 = vmatprep.mubr.bf16.mxu0 %v7568_v8  ;;  %v10355_v52 = vpop.f32.mrf.mxu0  ;;  %v5072_v57 = vshrl.u32 %v4740_v5, 16  ;;  %v5082_v8 = vor.u32 %v5080_v39, %v5079_v55  ;;  %v5084_v17 = vrot.slane %v5079_v55, 4  ;;  %v10365_v24 = vadd.f32 %v11301_v26, %v10068_v53  ;;  %v10371_v3 = vld [vmem:[#allocation2 + $0x118] sm:$0xf]  ;;  %v5775_v5 = vld [vmem:[#allocation2 + $0x28] sm:$0xf] }
 0x282   : > { %11300 = vst [vmem:[#allocation34_spill] sm:$0xff] %v10355_v52  ;;  %v7529_v12 = vrot.slane %v5050_v60, 11  ;;  %v5070_v59 = vsel %vm9355_vm5, %v5062_v19, %v5069_v38  ;;  %v5091_v47 = vor.u32 %v5089_v49, %v5088_v15  ;;  %v10369_v45 = vadd.f32 %v10042_v10, %v10082_v41  ;;  %v5774_v38 = vld [vmem:[#allocation2 + $0x24] sm:$0xf]  ;;  %v10393_v50 = vpop.f32.mrf.mxu1 }
 0x283   : > { %v7570_v61 = vcombine.low %v10319_v9, %v10326_v35  ;;  %v7530_v39 = vrot.slane %v5072_v57, 11  ;;  %v10379_v19 = vadd.f32 %v10066_v29, %v10106_v36  ;;  %v430_v41 = vsel %vm9342_vm2, 0, %v429_v7  ;;  %v5776_v9 = vld [vmem:[#allocation2 + $0x2c] sm:$0x1]  ;;  %v10386_v35 = vpop.f32.mrf.mxu0  ;;  %11304 = vst [vmem:[#allocation30_spill] sm:$0xff] %v10393_v50 }
 0x284   : > { %v5061_v42 = vsel %vm9355_vm5, %v7529_v12, %v5060_v44  ;;  %v5092_v54 = vsel %vm9355_vm5, %v5084_v17, %v5091_v47  ;;  %v5099_v49 = vshrl.u32 %v10357_v14, 16  ;;  %11303 = vst [vmem:[#allocation29_spill] sm:$0xff] %v10386_v35  ;;  %431 = vst [vmem:[#allocation2 + $0x110] sm:$0x8] %v430_v41  ;;  %v5102_v29 = vshll.u32 %v10357_v14, 16 }
 0x285   : > { %v7545_v53 = vcombine.low %v5061_v42, %v5070_v59  ;;  %v5083_v44 = vsel %vm9355_vm5, %v7530_v39, %v5082_v8  ;;  %v5108_v36 = vshrl.u32 %v10371_v3, 16  ;;  %v5111_v55 = vshll.u32 %v10371_v3, 16  ;;  %v10395_v39 = vpop.f32.mrf.mxu0 }
 0x286   : > { %v7546_v7 = vcombine.low %v5083_v44, %v5092_v54  ;;  %v5101_v60 = vrot.slane %v5099_v49, 7  ;;  %v5840_v15 = vshrl.u32 %v5774_v38, 16  ;;  %v5843_v12 = vshll.u32 %v5774_v38, 16  ;;  %11305 = vst [vmem:[#allocation33_spill] sm:$0xff] %v10395_v39  ;;  %v5778_v54 = vld [vmem:[#allocation2 + $0x38] sm:$0xf] }
 0x287   : > { %8453 = vmatmul.mubr.bf16.gmra.mxu1 %v7545_v53  ;;  %v5110_v57 = vrot.slane %v5108_v36, 7  ;;  %v5849_v17 = vshll.u32 %v5775_v5, 16  ;;  %v5853_v59 = vshrl.u32 %v5775_v5, 16  ;;  %v5859_v8 = vshll.u32 %v5776_v9, 16  ;;  %v5777_v53 = vld [vmem:[#allocation2 + $0x34] sm:$0xf] }
 0x288   : > { %8501 = vmatmul.mubr.bf16.gmra.mxu0 %v7569_v63  ;;  %8456 = vmatprep.mubr.bf16.mxu1 %v7546_v7  ;;  %v5106_v47 = vrot.slane %v5101_v60, 4  ;;  %v5842_v26 = vrot.slane %v5840_v15, 4  ;;  %v5845_v42 = vrot.slane %v5843_v12, 5  ;;  %v5104_v10 = vor.u32 %v5102_v29, %v5101_v60  ;;  %v5779_v29 = vld [vmem:[#allocation2 + $0x3c] sm:$0x1]  ;;  %v11307_v60 = vld [vmem:[#allocation36_spill] sm:$0xff] }
 0x289   : > { %8504 = vmatprep.mubr.bf16.mxu0 %v7570_v61  ;;  %v5113_v41 = vor.u32 %v5111_v55, %v5110_v57  ;;  %v5851_v50 = vrot.slane %v5849_v17, 5  ;;  %v5855_v63 = vrot.slane %v5853_v59, 4  ;;  %v11306_v61 = vld [vmem:[#allocation40_spill] sm:$0xff]  ;;  %v7571_v5 = vcombine.low %v10357_v14, %v10371_v3  ;;  %v10415_v14 = vpop.f32.mrf.mxu0 }
 0x28a   : > { %v10397_v49 = vpop.f32.mrf.mxu1  ;;  %v5846_v38 = vor.u32 %v5845_v42, %v5842_v26  ;;  %v10401_v44 = vadd.f32 %v11306_v61, %v10125_v18  ;;  %v10407_v9 = vadd.f32 %v10099_v48, %v10137_v25  ;;  %v5861_v7 = vrot.slane %v5859_v8, 5  ;;  %11308 = vst [vmem:[#allocation35_spill] sm:$0xff] %v10415_v14  ;;  %v5780_v42 = vld [vmem:[#allocation2 + $0x44] sm:$0xf] }
 0x28b   : > { %v5114_v36 = vsel %vm9355_vm5, %v5106_v47, %v5113_v41  ;;  %v5856_v55 = vor.u32 %v5855_v63, %v5851_v50  ;;  %v10413_v15 = vadd.f32 %v10174_v46, %v11307_v60  ;;  %v4743_v12 = vld [vmem:[#allocation2 + $0x110] sm:$0x8]  ;;  %v5864_v57 = vshrl.u32 %v5777_v53, 16 }
 0x28c   : > { %v5847_v18 = vrot.slane %v5846_v38, 4  ;;  %v5867_v17 = vshll.u32 %v5777_v53, 16  ;;  %v5873_v59 = vshll.u32 %v5778_v54, 16  ;;  %v5094_v3 = vshrl.u32 %v4743_v12, 16  ;;  %v10417_v61 = vpop.f32.mrf.mxu1  ;;  %v5781_v38 = vld [vmem:[#allocation2 + $0x48] sm:$0xf] }
 0x28d   : > { %v5857_v48 = vrot.slane %v5856_v55, 4  ;;  %v5877_v25 = vshrl.u32 %v5778_v54, 16  ;;  %v5883_v26 = vshll.u32 %v5779_v29, 16  ;;  %v5866_v46 = vrot.slane %v5864_v57, 4  ;;  %v5782_v29 = vld [vmem:[#allocation2 + $0x4c] sm:$0x1]  ;;  %v10423_v52 = vpop.f32.mrf.mxu0 }
 0x28e   : > { %v5852_v8 = vsel %vm9460_vm10, %v5847_v18, %v5851_v50  ;;  %v5869_v41 = vrot.slane %v5867_v17, 5  ;;  %v5875_v63 = vrot.slane %v5873_v59, 5  ;;  %v7531_v60 = vrot.slane %v5094_v3, 11  ;;  %11310 = vst [vmem:[#allocation16_spill] sm:$0xff] %v10423_v52  ;;  %v10427_v17 = vpop.f32.mrf.mxu1 }
 0x28f   : > { %v5862_v53 = vsel %vm9460_vm10, %v5857_v48, %v5861_v7  ;;  %v5879_v14 = vrot.slane %v5877_v25, 4  ;;  %v5885_v12 = vrot.slane %v5883_v26, 5  ;;  %v5888_v39 = vshrl.u32 %v5780_v42, 16 }
 0x290   : > { %8505 = vmatmul.mubr.bf16.gmra.mxu0 %v7571_v5  ;;  %v7580_v55 = vcombine.low %v5852_v8, %v5862_v53  ;;  %v5870_v54 = vor.u32 %v5869_v41, %v5866_v46  ;;  %v5891_v35 = vshll.u32 %v5780_v42, 16  ;;  %v5105_v50 = vsel %vm9355_vm5, %v7531_v60, %v5104_v10  ;;  %v5783_v41 = vld [vmem:[#allocation2 + $0x54] sm:$0xf]  ;;  %v11311_v53 = vld [vmem:[#allocation39_spill] sm:$0xff]  ;;  %v11312_v10 = vld [vmem:[#allocation41_spill] sm:$0xff] }
 0x291   : > { %v5880_v5 = vor.u32 %v5879_v14, %v5875_v63  ;;  %v5897_v18 = vshll.u32 %v5781_v38, 16  ;;  %v5901_v57 = vshrl.u32 %v5781_v38, 16  ;;  %v7547_v59 = vcombine.low %v5105_v50, %v5114_v36  ;;  %v5784_v38 = vld [vmem:[#allocation2 + $0x58] sm:$0xf]  ;;  %v10437_v36 = vpop.f32.mrf.mxu0  ;;  %v5786_v50 = vld [vmem:[#allocation2 + $0x64] sm:$0xf] }
 0x292   : > { %v5871_v3 = vrot.slane %v5870_v54, 4  ;;  %v5890_v7 = vrot.slane %v5888_v39, 4  ;;  %v5893_v48 = vrot.slane %v5891_v35, 5  ;;  %v5907_v46 = vshll.u32 %v5782_v29, 16  ;;  %11313 = vst [vmem:[#allocation40_spill] sm:$0xff] %v10437_v36 }
 0x293   : > { %v5881_v25 = vrot.slane %v5880_v5, 4  ;;  %v5899_v26 = vrot.slane %v5897_v18, 5  ;;  %v5903_v8 = vrot.slane %v5901_v57, 4  ;;  %8457 = vmatmul.mubr.bf16.gmra.mxu1 %v7547_v59  ;;  %v10431_v2 = vadd.f32 %v10186_v58, %v11311_v53  ;;  %v5785_v29 = vld [vmem:[#allocation2 + $0x5c] sm:$0x1]  ;;  %v10443_v58 = vpop.f32.mrf.mxu1 }
 0x294   : > { %v5894_v42 = vor.u32 %v5893_v48, %v5890_v7  ;;  %v10435_v14 = vadd.f32 %v10209_v27, %v11312_v10  ;;  %8524 = vmatprep.mubr.bf16.mxu1 %v7580_v55  ;;  %v5876_v35 = vsel %vm9460_vm10, %v5871_v3, %v5875_v63  ;;  %v5909_v54 = vrot.slane %v5907_v46, 5  ;;  %11314 = vst [vmem:[#allocation36_spill] sm:$0xff] %v10443_v58  ;;  %v10451_v46 = vpop.f32.mrf.mxu0  ;;  %v5788_v10 = vld [vmem:[#allocation2 + $0x6c] sm:$0x1] }
 0x295   : > { %v5886_v39 = vsel %vm9460_vm10, %v5881_v25, %v5885_v12  ;;  %v5904_v60 = vor.u32 %v5903_v8, %v5899_v26  ;;  %v10447_v27 = vadd.f32 %v10257_v16, %v10095_v51  ;;  %v5912_v57 = vshrl.u32 %v5783_v41, 16  ;;  %v5787_v25 = vld [vmem:[#allocation2 + $0x68] sm:$0xf]  ;;  %11315 = vst [vmem:[#allocation18_spill] sm:$0xff] %v10451_v46 }
 0x296   : > { %v7581_v5 = vcombine.low %v5876_v35, %v5886_v39  ;;  %v5895_v18 = vrot.slane %v5894_v42, 4  ;;  %v5915_v59 = vshll.u32 %v5783_v41, 16  ;;  %v5921_v7 = vshll.u32 %v5784_v38, 16 }
 0x297   : > { %v5905_v55 = vrot.slane %v5904_v60, 4  ;;  %v5925_v63 = vshrl.u32 %v5784_v38, 16  ;;  %v5914_v3 = vrot.slane %v5912_v57, 4  ;;  %v5931_v48 = vshll.u32 %v5785_v29, 16  ;;  %v10455_v35 = vpop.f32.mrf.mxu1 }
 0x298   : > { %v5900_v12 = vsel %vm9460_vm10, %v5895_v18, %v5899_v26  ;;  %v5936_v8 = vshrl.u32 %v5786_v50, 16  ;;  %v5917_v53 = vrot.slane %v5915_v59, 5  ;;  %v5923_v51 = vrot.slane %v5921_v7, 5  ;;  %v5789_v59 = vld [vmem:[#allocation2 + $0x74] sm:$0xf]  ;;  %v10465_v7 = vpop.f32.mrf.mxu0 }
 0x299   : > { %v5910_v42 = vsel %vm9460_vm10, %v5905_v55, %v5909_v54  ;;  %v5927_v16 = vrot.slane %v5925_v63, 4  ;;  %v5933_v38 = vrot.slane %v5931_v48, 5  ;;  %v5939_v60 = vshll.u32 %v5786_v50, 16  ;;  %v5790_v48 = vld [vmem:[#allocation2 + $0x78] sm:$0xf] }
 0x29a   : > { %v7582_v41 = vcombine.low %v5900_v12, %v5910_v42  ;;  %v5938_v39 = vrot.slane %v5936_v8, 4  ;;  %v5918_v26 = vor.u32 %v5917_v53, %v5914_v3  ;;  %v5945_v29 = vshll.u32 %v5787_v25, 16 }
 0x29b   : > { %v5928_v18 = vor.u32 %v5927_v16, %v5923_v51  ;;  %v5949_v57 = vshrl.u32 %v5787_v25, 16  ;;  %8525 = vmatmul.mubr.bf16.vlgmr.msra.gmra.mxu1 %v7581_v5  ;;  %v5941_v58 = vrot.slane %v5939_v60, 5  ;;  %v5955_v46 = vshll.u32 %v5788_v10, 16  ;;  %v10467_v5 = vpop.f32.mrf.mxu1  ;;  %v5792_v16 = vld [vmem:[#allocation2 + $0x84] sm:$0xf] }
 0x29c   : > { %v10459_v54 = vadd.f32 %v10263_v28, %v10132_v21  ;;  %v10463_v55 = vadd.f32 %v10281_v20, %v10144_v31  ;;  %8528 = vmatprep.mubr.bf16.mxu1 %v7582_v41  ;;  %v5919_v50 = vrot.slane %v5918_v26, 4  ;;  %v5947_v12 = vrot.slane %v5945_v29, 5  ;;  %v5791_v28 = vld [vmem:[#allocation2 + $0x7c] sm:$0x1] }
 0x29d   : > { %v5929_v63 = vrot.slane %v5928_v18, 4  ;;  %v5951_v3 = vrot.slane %v5949_v57, 4  ;;  %v5942_v25 = vor.u32 %v5941_v58, %v5938_v39  ;;  %v5957_v8 = vrot.slane %v5955_v46, 5  ;;  %v5793_v18 = vld [vmem:[#allocation2 + $0x88] sm:$0xf]  ;;  %v10479_v29 = vpop.f32.mrf.mxu1 }
 0x29e   : > { %v10471_v21 = vadd.f32 %v10328_v43, %v10149_v1  ;;  %v5924_v31 = vsel %vm9460_vm10, %v5919_v50, %v5923_v51  ;;  %v5960_v53 = vshrl.u32 %v5789_v59, 16  ;;  %v5963_v60 = vshll.u32 %v5789_v59, 16  ;;  %v10477_v58 = vpop.f32.mrf.mxu0  ;;  %v5794_v50 = vld [vmem:[#allocation2 + $0x8c] sm:$0x1] }
 0x29f   : > { %v5934_v20 = vsel %vm9460_vm10, %v5929_v63, %v5933_v38  ;;  %v5952_v42 = vor.u32 %v5951_v3, %v5947_v12  ;;  %v5943_v41 = vrot.slane %v5942_v25, 4  ;;  %v5969_v26 = vshll.u32 %v5790_v48, 16 }
 0x2a0   : > { %11316 = vst [vmem:[#allocation39_spill] sm:$0xff] %v10471_v21  ;;  %v7583_v10 = vcombine.low %v5924_v31, %v5934_v20  ;;  %v5962_v39 = vrot.slane %v5960_v53, 4  ;;  %v5973_v1 = vshrl.u32 %v5790_v48, 16  ;;  %v5979_v43 = vshll.u32 %v5791_v28, 16  ;;  %v10485_v53 = vpop.f32.mrf.mxu0 }
 0x2a1   : > { %v5953_v46 = vrot.slane %v5952_v42, 4  ;;  %v5948_v51 = vsel %vm9460_vm10, %v5943_v41, %v5947_v12  ;;  %v5965_v38 = vrot.slane %v5963_v60, 5  ;;  %v5971_v57 = vrot.slane %v5969_v26, 5  ;;  %v5795_v60 = vld [vmem:[#allocation2 + $0x94] sm:$0xf]  ;;  %v10487_v26 = vpop.f32.mrf.mxu1 }
 0x2a2   : > { %v5984_v63 = vshrl.u32 %v5792_v16, 16  ;;  %v5975_v3 = vrot.slane %v5973_v1, 4  ;;  %v5981_v25 = vrot.slane %v5979_v43, 5  ;;  %v5987_v31 = vshll.u32 %v5792_v16, 16  ;;  %v5796_v43 = vld [vmem:[#allocation2 + $0x98] sm:$0xf] }
 0x2a3   : > { %v5958_v59 = vsel %vm9460_vm10, %v5953_v46, %v5957_v8  ;;  %8529 = vmatmul.mubr.bf16.gmra.mxu1 %v7583_v10  ;;  %v5966_v48 = vor.u32 %v5965_v38, %v5962_v39  ;;  %v5993_v42 = vshll.u32 %v5793_v18, 16  ;;  %v5997_v12 = vshrl.u32 %v5793_v18, 16 }
 0x2a4   : > { %v7584_v20 = vcombine.low %v5948_v51, %v5958_v59  ;;  %v5986_v28 = vrot.slane %v5984_v63, 4  ;;  %v5976_v36 = vor.u32 %v5975_v3, %v5971_v57  ;;  %v5989_v52 = vrot.slane %v5987_v31, 5 }
 0x2a5   : > { %v6003_v41 = vshll.u32 %v5794_v50, 16  ;;  %v5967_v21 = vrot.slane %v5966_v48, 4  ;;  %v5995_v8 = vrot.slane %v5993_v42, 5  ;;  %v10491_v16 = vadd.f32 %v10341_v62, %v10183_v0  ;;  %v5797_v50 = vld [vmem:[#allocation2 + $0x9c] sm:$0x1]  ;;  %v10503_v0 = vpop.f32.mrf.mxu0 }
 0x2a6   : > { %8532 = vmatprep.mubr.bf16.mxu1 %v7584_v20  ;;  %v10495_v10 = vadd.f32 %v10359_v32, %v10197_v4  ;;  %v5977_v46 = vrot.slane %v5976_v36, 4  ;;  %v5990_v39 = vor.u32 %v5989_v52, %v5986_v28  ;;  %v5999_v1 = vrot.slane %v5997_v12, 4  ;;  %v5798_v36 = vld [vmem:[#allocation2 + $0xa4] sm:$0xf]  ;;  %v5799_v20 = vld [vmem:[#allocation2 + $0xa8] sm:$0xf] }
 0x2a7   : > { %11317 = vst [vmem:[#allocation41_spill] sm:$0xff] %v10491_v16  ;;  %v5972_v18 = vsel %vm9460_vm10, %v5967_v21, %v5971_v57  ;;  %v6005_v51 = vrot.slane %v6003_v41, 5  ;;  %v10501_v38 = vadd.f32 %v10397_v49, %v10203_v34  ;;  %v6008_v63 = vshrl.u32 %v5795_v60, 16  ;;  %v5800_v42 = vld [vmem:[#allocation2 + $0xac] sm:$0x1] }
 0x2a8   : > { %11318 = vst [vmem:[#allocation57_spill] sm:$0xff] %v10495_v10  ;;  %v5982_v4 = vsel %vm9460_vm10, %v5977_v46, %v5981_v25  ;;  %v5991_v62 = vrot.slane %v5990_v39, 4  ;;  %v6000_v32 = vor.u32 %v5999_v1, %v5995_v8  ;;  %v6011_v52 = vshll.u32 %v5795_v60, 16  ;;  %v10511_v46 = vpop.f32.mrf.mxu0  ;;  %v8846_v39 = vld [vmem:[#allocation9 + $0x38] sm:$0xff]  }
 0x2a9   : > { %11319 = vst [vmem:[#allocation58_spill] sm:$0xff] %v10501_v38  ;;  %v7585_v3 = vcombine.low %v5972_v18, %v5982_v4  ;;  %v6010_v21 = vrot.slane %v6008_v63, 4  ;;  %v6017_v57 = vshll.u32 %v5796_v43, 16  ;;  %v6021_v31 = vshrl.u32 %v5796_v43, 16  ;;  %8556 = vmatprep.subr.bf16.mxu0 %v8846_v39 }
 0x2aa   : > { %v10507_v59 = vpop.f32.mrf.mxu1  ;;  %v5996_v34 = vsel %vm9460_vm10, %v5991_v62, %v5995_v8  ;;  %v6001_v49 = vrot.slane %v6000_v32, 4  ;;  %v6013_v48 = vrot.slane %v6011_v52, 5  ;;  %v6027_v28 = vshll.u32 %v5797_v50, 16  ;;  %8557 = vmatpush3.bf16.msra.mxu0 %v8846_v39 }
 0x2ab   : > { %8533 = vmatmul.mubr.bf16.gmra.mxu1 %v7585_v3  ;;  %v6019_v25 = vrot.slane %v6017_v57, 5  ;;  %v6023_v12 = vrot.slane %v6021_v31, 4  ;;  %v6032_v41 = vshrl.u32 %v5798_v36, 16  ;;  %v6035_v60 = vshll.u32 %v5798_v36, 16  ;;  %v5801_v31 = vld [vmem:[#allocation2 + $0xb4] sm:$0xf] }
 0x2ac   : > { %v6006_v1 = vsel %vm9460_vm10, %v6001_v49, %v6005_v51  ;;  %v6014_v43 = vor.u32 %v6013_v48, %v6010_v21  ;;  %v6029_v18 = vrot.slane %v6027_v28, 5  ;;  %v6041_v63 = vshll.u32 %v5799_v20, 16  ;;  %v10515_v4 = vpop.f32.mrf.mxu1 }
 0x2ad   : > { %v7586_v8 = vcombine.low %v5996_v34, %v6006_v1  ;;  %v6024_v62 = vor.u32 %v6023_v12, %v6019_v25  ;;  %v6034_v50 = vrot.slane %v6032_v41, 4  ;;  %v6037_v32 = vrot.slane %v6035_v60, 5  ;;  %v5802_v34 = vld [vmem:[#allocation2 + $0xb8] sm:$0xf]  ;;  %v10525_v49 = vpop.f32.mrf.mxu0 }
 0x2ae   : > { %v6015_v52 = vrot.slane %v6014_v43, 4  ;;  %v6043_v3 = vrot.slane %v6041_v63, 5  ;;  %v6045_v57 = vshrl.u32 %v5799_v20, 16  ;;  %v6051_v36 = vshll.u32 %v5800_v42, 16  ;;  %v5803_v42 = vld [vmem:[#allocation2 + $0xbc] sm:$0x1]  ;;  %v10529_v12 = vpop.f32.mrf.mxu1 }
 0x2af   : > { %8536 = vmatprep.mubr.bf16.mxu1 %v7586_v8  ;;  %v6025_v38 = vrot.slane %v6024_v62, 4  ;;  %v6038_v10 = vor.u32 %v6037_v32, %v6034_v50  ;;  %v10519_v51 = vadd.f32 %v10417_v61, %v10235_v40  ;;  %v10523_v21 = vadd.f32 %v10427_v17, %v10247_v30  ;;  %v5804_v17 = vld [vmem:[#allocation2 + $0xc4] sm:$0xf]  ;;  %v10539_v32 = vpop.f32.mrf.mxu0 }
 0x2b0   : > { %v6020_v20 = vsel %vm9460_vm10, %v6015_v52, %v6019_v25  ;;  %v6047_v48 = vrot.slane %v6045_v57, 4  ;;  %v6053_v28 = vrot.slane %v6051_v36, 5  ;;  %v10535_v61 = vadd.f32 %v10455_v35, %v10253_v22  ;;  %v5805_v25 = vld [vmem:[#allocation2 + $0xc8] sm:$0xf]  ;;  %v10541_v52 = vpop.f32.mrf.mxu1 }
 0x2b1   : > { %11320 = vst [vmem:[#allocation59_spill] sm:$0xff] %v10519_v51  ;;  %11321 = vst [vmem:[#allocation60_spill] sm:$0xff] %v10523_v21  ;;  %v6030_v41 = vsel %vm9460_vm10, %v6025_v38, %v6029_v18  ;;  %v6039_v40 = vrot.slane %v6038_v10, 4  ;;  %v6056_v30 = vshrl.u32 %v5801_v31, 16  ;;  %v6059_v1 = vshll.u32 %v5801_v31, 16  ;;  %v8847_v10 = vld [vmem:[#allocation9 + $0x30] sm:$0xff]  }
 0x2b2   : > { %11322 = vst [vmem:[#allocation61_spill] sm:$0xff] %v10535_v61  ;;  %v7587_v60 = vcombine.low %v6020_v20, %v6030_v41  ;;  %v6048_v39 = vor.u32 %v6047_v48, %v6043_v3  ;;  %v6065_v43 = vshll.u32 %v5802_v34, 16  ;;  %v6069_v62 = vshrl.u32 %v5802_v34, 16  ;;  %v5806_v31 = vld [vmem:[#allocation2 + $0xcc] sm:$0x1]  ;;  %8558 = vmatprep.subr.bf16.mxu0 %v8847_v10 }
 0x2b3   : > { %v6044_v63 = vsel %vm9460_vm10, %v6039_v40, %v6043_v3  ;;  %v6058_v8 = vrot.slane %v6056_v30, 4  ;;  %v6075_v50 = vshll.u32 %v5803_v42, 16  ;;  %v6061_v22 = vrot.slane %v6059_v1, 5  ;;  %8559 = vmatpush3.bf16.msra.mxu0 %v8847_v10  ;;  %v10545_v1 = vpop.f32.mrf.mxu0  ;;  %v5807_v61 = vld [vmem:[#allocation2 + $0xd4] sm:$0xf] }
 0x2b4   : > { %8537 = vmatmul.mubr.bf16.gmra.mxu1 %v7587_v60  ;;  %v6049_v38 = vrot.slane %v6048_v39, 4  ;;  %v6067_v35 = vrot.slane %v6065_v43, 5  ;;  %v6080_v18 = vshrl.u32 %v5804_v17, 16  ;;  %v6071_v57 = vrot.slane %v6069_v62, 4 }
 0x2b5   : > { %v6077_v36 = vrot.slane %v6075_v50, 5  ;;  %v6083_v20 = vshll.u32 %v5804_v17, 16  ;;  %v6089_v48 = vshll.u32 %v5805_v25, 16  ;;  %v6062_v34 = vor.u32 %v6061_v22, %v6058_v8  ;;  %v5808_v8 = vld [vmem:[#allocation2 + $0xd8] sm:$0xf] }
 0x2b6   : > { %v6054_v3 = vsel %vm9460_vm10, %v6049_v38, %v6053_v28  ;;  %v6082_v42 = vrot.slane %v6080_v18, 4  ;;  %v6093_v41 = vshrl.u32 %v5805_v25, 16  ;;  %v6072_v30 = vor.u32 %v6071_v57, %v6067_v35 }
 0x2b7   : > { %v7588_v40 = vcombine.low %v6044_v63, %v6054_v3  ;;  %v6085_v60 = vrot.slane %v6083_v20, 5  ;;  %v6091_v39 = vrot.slane %v6089_v48, 5  ;;  %v6063_v43 = vrot.slane %v6062_v34, 4  ;;  %v5810_v48 = vld [vmem:[#allocation2 + $0xe4] sm:$0xf]  ;;  %v8848_v3 = vld [vmem:[#allocation9 + $0x28] sm:$0xff]  }
 0x2b8   : > { %v6095_v62 = vrot.slane %v6093_v41, 4  ;;  %v6099_v50 = vshll.u32 %v5806_v31, 16  ;;  %v10549_v17 = vadd.f32 %v10467_v5, %v10287_v33  ;;  %v6073_v28 = vrot.slane %v6072_v30, 4  ;;  %v5809_v5 = vld [vmem:[#allocation2 + $0xdc] sm:$0x1]  ;;  %8560 = vmatprep.subr.bf16.mxu0 %v8848_v3 }
 0x2b9   : > { %8540 = vmatprep.mubr.bf16.mxu1 %v7588_v40  ;;  %v6086_v25 = vor.u32 %v6085_v60, %v6082_v42  ;;  %v10555_v63 = vadd.f32 %v10479_v29, %v10299_v23  ;;  %v6068_v10 = vsel %vm9460_vm10, %v6063_v43, %v6067_v35  ;;  %v10561_v33 = vadd.f32 %v10507_v59, %v10305_v37  ;;  %v10565_v23 = vpop.f32.mrf.mxu0 }
 0x2ba   : > { %11323 = vst [vmem:[#allocation62_spill] sm:$0xff] %v10549_v17  ;;  %v10551_v21 = vpop.f32.mrf.mxu1  ;;  %v6096_v38 = vor.u32 %v6095_v62, %v6091_v39  ;;  %v6101_v22 = vrot.slane %v6099_v50, 5  ;;  %v6078_v18 = vsel %vm9460_vm10, %v6073_v28, %v6077_v36  ;;  %v6104_v31 = vshrl.u32 %v5807_v61, 16  ;;  %v5811_v36 = vld [vmem:[#allocation2 + $0xe8] sm:$0xf]  ;;  %8561 = vmatpush3.bf16.msra.mxu0 %v8848_v3 }
 0x2bb   : > { %11324 = vst [vmem:[#allocation63_spill] sm:$0xff] %v10555_v63  ;;  %v6087_v57 = vrot.slane %v6086_v25, 4  ;;  %v6107_v20 = vshll.u32 %v5807_v61, 16  ;;  %v7589_v35 = vcombine.low %v6068_v10, %v6078_v18  ;;  %v6113_v42 = vshll.u32 %v5808_v8, 16  ;;  %v5812_v62 = vld [vmem:[#allocation2 + $0xec] sm:$0x1] }
 0x2bc   : > { %v10567_v29 = vpop.f32.mrf.mxu1  ;;  %v6097_v34 = vrot.slane %v6096_v38, 4  ;;  %v6117_v41 = vshrl.u32 %v5808_v8, 16  ;;  %v6106_v59 = vrot.slane %v6104_v31, 4  ;;  %v6123_v30 = vshll.u32 %v5809_v5, 16  ;;  %v5813_v3 = vld [vmem:[#allocation2 + $0xf4] sm:$0xf] }
 0x2bd   : > { %v6092_v37 = vsel %vm9460_vm10, %v6087_v57, %v6091_v39  ;;  %v6109_v40 = vrot.slane %v6107_v20, 5  ;;  %8541 = vmatmul.mubr.bf16.gmra.mxu1 %v7589_v35  ;;  %v6115_v60 = vrot.slane %v6113_v42, 5  ;;  %v6128_v50 = vshrl.u32 %v5810_v48, 16 }
 0x2be   : > { %v6102_v61 = vsel %vm9460_vm10, %v6097_v34, %v6101_v22  ;;  %v6119_v43 = vrot.slane %v6117_v41, 4  ;;  %v6125_v8 = vrot.slane %v6123_v30, 5  ;;  %v6131_v10 = vshll.u32 %v5810_v48, 16  ;;  %v10575_v39 = vpop.f32.mrf.mxu1 }
 0x2bf   : > { %v7590_v28 = vcombine.low %v6092_v37, %v6102_v61  ;;  %v6110_v25 = vor.u32 %v6109_v40, %v6106_v59  ;;  %v6130_v18 = vrot.slane %v6128_v50, 4  ;;  %v6137_v57 = vshll.u32 %v5811_v36, 16  ;;  %v5814_v40 = vld [vmem:[#allocation2 + $0xf8] sm:$0xf] }
 0x2c0   : > { %v6120_v5 = vor.u32 %v6119_v43, %v6115_v60  ;;  %v6141_v31 = vshrl.u32 %v5811_v36, 16  ;;  %v6133_v22 = vrot.slane %v6131_v10, 5  ;;  %v6147_v35 = vshll.u32 %v5812_v62, 16  ;;  %v5815_v43 = vld [vmem:[#allocation2 + $0xfc] sm:$0x1] }
 0x2c1   : > { %v10573_v38 = vpop.f32.mrf.mxu0  ;;  %8544 = vmatprep.mubr.bf16.mxu1 %v7590_v28  ;;  %v6111_v20 = vrot.slane %v6110_v25, 4  ;;  %v10579_v34 = vadd.f32 %v10515_v4, %v10337_v11  ;;  %v6139_v41 = vrot.slane %v6137_v57, 5  ;;  %v10585_v59 = vadd.f32 %v10529_v12, %v10347_v6  ;;  %v10591_v11 = vpop.f32.mrf.mxu1  ;;  %v8849_v4 = vld [vmem:[#allocation9 + $0x20] sm:$0xff]  }
 0x2c2   : > { %v6121_v48 = vrot.slane %v6120_v5, 4  ;;  %v6143_v37 = vrot.slane %v6141_v31, 4  ;;  %v6134_v36 = vor.u32 %v6133_v22, %v6130_v18  ;;  %v6149_v61 = vrot.slane %v6147_v35, 5  ;;  %v5816_v25 = vld [vmem:[#allocation2 + $0x104] sm:$0xf]  ;;  %8562 = vmatprep.subr.bf16.mxu0 %v8849_v4 }
 0x2c3   : > { %v10581_v42 = vpop.f32.mrf.mxu0  ;;  %v6116_v30 = vsel %vm9460_vm10, %v6111_v20, %v6115_v60  ;;  %v10597_v6 = vadd.f32 %v10551_v21, %v10353_v56  ;;  %v6152_v12 = vshrl.u32 %v5813_v3, 16  ;;  %v6155_v5 = vshll.u32 %v5813_v3, 16  ;;  %v5817_v35 = vld [vmem:[#allocation2 + $0x108] sm:$0xf]  ;;  %8563 = vmatpush3.bf16.msra.mxu0 %v8849_v4 }
 0x2c4   : > { %v6126_v50 = vsel %vm9460_vm10, %v6121_v48, %v6125_v8  ;;  %v6144_v28 = vor.u32 %v6143_v37, %v6139_v41  ;;  %v6135_v60 = vrot.slane %v6134_v36, 4  ;;  %v6161_v18 = vshll.u32 %v5814_v40, 16  ;;  %v5818_v48 = vld [vmem:[#allocation2 + $0x10c] sm:$0x1] }
 0x2c5   : > { %v10589_v62 = vpop.f32.mrf.mxu0  ;;  %v7591_v10 = vcombine.low %v6116_v30, %v6126_v50  ;;  %v6154_v31 = vrot.slane %v6152_v12, 4  ;;  %v6165_v20 = vshrl.u32 %v5814_v40, 16  ;;  %v6171_v22 = vshll.u32 %v5815_v43, 16 }
 0x2c6   : > { %v6145_v57 = vrot.slane %v6144_v28, 4  ;;  %v6140_v56 = vsel %vm9460_vm10, %v6135_v60, %v6139_v41  ;;  %v6157_v21 = vrot.slane %v6155_v5, 5  ;;  %v6163_v8 = vrot.slane %v6161_v18, 5  ;;  %v486_v60 = vld [vmem:[#allocation2 + $0x11c] sm:$0x1] }
 0x2c7   : > { %v10599_v63 = vpop.f32.mrf.mxu0  ;;  %8545 = vmatmul.mubr.bf16.gmra.mxu1 %v7591_v10  ;;  %v6176_v37 = vshrl.u32 %v5816_v25, 16  ;;  %v6167_v36 = vrot.slane %v6165_v20, 4  ;;  %v6173_v50 = vrot.slane %v6171_v22, 5  ;;  %v6179_v40 = vshll.u32 %v5816_v25, 16  ;;  %v8850_v20 = vld [vmem:[#allocation9 + $0x18] sm:$0xff]  }
 0x2c8   : > { %11325 = vst [vmem:[#allocation64_spill] sm:$0xff] %v10599_v63  ;;  %v6150_v3 = vsel %vm9460_vm10, %v6145_v57, %v6149_v61  ;;  %v6158_v28 = vor.u32 %v6157_v21, %v6154_v31  ;;  %v6185_v17 = vshll.u32 %v5817_v35, 16  ;;  %v6189_v16 = vshrl.u32 %v5817_v35, 16  ;;  %v5819_v57 = vld [vmem:[#allocation2 + $0x114] sm:$0xf]  ;;  %8564 = vmatprep.subr.bf16.mxu0 %v8850_v20 }
 0x2c9   : > { %v7592_v43 = vcombine.low %v6140_v56, %v6150_v3  ;;  %v6178_v12 = vrot.slane %v6176_v37, 4  ;;  %v6168_v10 = vor.u32 %v6167_v36, %v6163_v8  ;;  %v6181_v51 = vrot.slane %v6179_v40, 5  ;;  %v5820_v21 = vld [vmem:[#allocation2 + $0x118] sm:$0xf]  ;;  %v8851_v37 = vld [vmem:[#allocation9 + $0x10] sm:$0xff]   ;;  %8565 = vmatpush3.bf16.msra.mxu0 %v8850_v20 }
 0x2ca   : > { %v8266_v30 = vpop.f32.mrf.mxu1  ;;  %v6195_v41 = vshll.u32 %v5818_v48, 16  ;;  %v6159_v18 = vrot.slane %v6158_v28, 4  ;;  %v6187_v63 = vrot.slane %v6185_v17, 5  ;;  %v10609_v61 = vadd.f32 %v10567_v29, %v10365_v24  ;;  %8566 = vmatprep.subr.bf16.mxu0 %v8851_v37 }
 0x2cb   : > { %8548 = vmatprep.mubr.bf16.mxu1 %v7592_v43  ;;  %v10613_v25 = vadd.f32 %v10575_v39, %v10369_v45  ;;  %v6169_v22 = vrot.slane %v6168_v10, 4  ;;  %v6182_v35 = vor.u32 %v6181_v51, %v6178_v12  ;;  %v6191_v56 = vrot.slane %v6189_v16, 4 }
 0x2cc   : > { %v2820_v4 = vpop.f32.mrf.mxu1  ;;  %v6164_v17 = vsel %vm9460_vm10, %v6159_v18, %v6163_v8  ;;  %v6197_v3 = vrot.slane %v6195_v41, 5  ;;  %v10620_v24 = vadd.f32 %v8266_v30, %v10379_v19  ;;  %v487_v45 = vsel %vm9392_vm7, 0, %v486_v60 }
 0x2cd   : > { %v10605_v5 = vpop.f32.mrf.mxu0  ;;  %v6174_v16 = vsel %vm9460_vm10, %v6169_v22, %v6173_v50  ;;  %v6183_v51 = vrot.slane %v6182_v35, 4  ;;  %v6192_v36 = vor.u32 %v6191_v56, %v6187_v63  ;;  %488 = vst [vmem:[#allocation2 + $0x11c] sm:$0x1] %v487_v45  ;;  %v6200_v40 = vshrl.u32 %v5819_v57, 16  ;;  %8567 = vmatpush3.bf16.msra.mxu0 %v8851_v37 }
 0x2ce   : > { %v8267_v31 = vpop.f32.mrf.mxu1  ;;  %v7593_v8 = vcombine.low %v6164_v17, %v6174_v16  ;;  %v6203_v28 = vshll.u32 %v5819_v57, 16  ;;  %v6209_v19 = vshll.u32 %v5820_v21, 16  ;;  %v6213_v30 = vshrl.u32 %v5820_v21, 16  ;;  %v11327_v17 = vld [vmem:[#allocation44_spill] sm:$0xff]  ;;  %v11328_v16 = vld [vmem:[#allocation45_spill] sm:$0xff] }
 0x2cf   : > { %v10615_v48 = vpop.f32.mrf.mxu0  ;;  %v6188_v10 = vsel %vm9460_vm10, %v6183_v51, %v6187_v63  ;;  %v6193_v41 = vrot.slane %v6192_v36, 4  ;;  %v6202_v60 = vrot.slane %v6200_v40, 4  ;;  %v10633_v50 = vadd.f32 %v2820_v4, %v10401_v44 }
 0x2d0   : > { %v10624_v39 = vpop.f32.mrf.mxu1  ;;  %8549 = vmatmul.mubr.bf16.gmra.mxu1 %v7593_v8  ;;  %v6205_v22 = vrot.slane %v6203_v28, 5  ;;  %v6211_v35 = vrot.slane %v6209_v19, 5  ;;  %v6215_v20 = vrot.slane %v6213_v30, 4  ;;  %v2866_v57 = vadd.f32 %v8267_v31, %v10407_v9  ;;  %v11329_v8 = vld [vmem:[#allocation31_spill] sm:$0xff]  ;;  %v11331_v19 = vld [vmem:[#allocation37_spill] sm:$0xff]  ;;  %v11332_v30 = vld [vmem:[#allocation32_spill] sm:$0xff] }
 0x2d1   : > { %v10628_v43 = vpop.f32.mrf.mxu0  ;;  %v6198_v21 = vsel %vm9460_vm10, %v6193_v41, %v6197_v3  ;;  %v3559_v63 = vadd.f32 %v10123_v13, %v10413_v15  ;;  %v3557_v29 = vadd.f32 %v11327_v17, %v10431_v2  ;;  %v3560_v51 = vadd.f32 %v11328_v16, %v10435_v14  ;;  %v11330_v28 = vld [vmem:[#allocation27_spill] sm:$0xff] }
 0x2d2   : > { %v8334_v12 = vpop.f32.mrf.mxu1  ;;  %v7594_v44 = vcombine.low %v6188_v10, %v6198_v21  ;;  %v6206_v4 = vor.u32 %v6205_v22, %v6202_v60  ;;  %v6216_v45 = vor.u32 %v6215_v20, %v6211_v35  ;;  %v2095_v3 = vadd.f32 %v11330_v28, %v11329_v8  ;;  %v11334_v20 = vld [vmem:[#allocation42_spill] sm:$0xff]  ;;  %v11337_v17 = vld [vmem:[#allocation43_spill] sm:$0xff] }
 0x2d3   : > { %v10635_v18 = vpop.f32.mrf.mxu0  ;;  %v3913_v40 = vadd.f32 %v8334_v12, %v3559_v63  ;;  %v2099_v13 = vadd.f32 %v11332_v30, %v11331_v19  ;;  %v11333_v12 = vld [vmem:[#allocation48_spill] sm:$0xff]  ;;  %v11336_v63 = vld [vmem:[#allocation46_spill] sm:$0xff]  ;;  %v10685_v47 = vadd.f32 %v10485_v53, %v10579_v34  ;;  %v10704_v53 = vadd.f32 %v10539_v32, %v10609_v61  ;;  %v11340_v34 = vld [vmem:[#allocation39_spill] sm:$0xff] }
 0x2d4   : > { %v3784_v56 = vpop.f32.mrf.mxu1  ;;  %8552 = vmatprep.mubr.bf16.mxu1 %v7594_v44  ;;  %v5821_v15 = vld [vmem:[#allocation2 + $0x11c] sm:$0x1]  ;;  %v6207_v2 = vrot.slane %v6206_v4, 4  ;;  %v6217_v41 = vrot.slane %v6216_v45, 4  ;;  %v3563_v22 = vadd.f32 %v11333_v12, %v10447_v27  ;;  %v2852_v44 = vadd.f32 %v10487_v26, %v2095_v3  ;;  %v11338_v27 = vld [vmem:[#allocation49_spill] sm:$0xff]  ;;  %v11342_v61 = vld [vmem:[#allocation64_spill] sm:$0xff] }
 0x2d5   : > { %v3911_v31 = vadd.f32 %v3784_v56, %v3557_v29  ;;  %v6219_v60 = vshll.u32 %v5821_v15, 16  ;;  %v11335_v56 = vld [vmem:[#allocation38_spill] sm:$0xff]  ;;  %v2107_v29 = vadd.f32 %v11337_v17, %v11336_v63  ;;  %v2856_v4 = vadd.f32 %v10541_v52, %v2099_v13 }
 0x2d6   : > { %v8335_v36 = vpop.f32.mrf.mxu1  ;;  %v2103_v21 = vadd.f32 %v11335_v56, %v11334_v20  ;;  %v3561_v28 = vadd.f32 %v11338_v27, %v10459_v54  ;;  %v10681_v54 = vadd.f32 %v10477_v58, %v10561_v33  ;;  %v10724_v32 = vadd.f32 %v10589_v62, %v2866_v57  ;;  %v11343_v56 = vld [vmem:[#allocation41_spill] sm:$0xff]  ;;  %v8853_v27 = vld [vmem:[#allocation9] sm:$0xff]  }
 0x2d7   : > { %v8386_v9 = vpop.f32.mrf.mxu0  ;;  %v10650_v37 = vadd.f32 %v8335_v36, %v3560_v51  ;;  %v6212_v51 = vsel %vm9460_vm10, %v6207_v2, %v6211_v35  ;;  %v6221_v45 = vrot.slane %v6219_v60, 5  ;;  %v2864_v26 = vadd.f32 %v10624_v39, %v2107_v29  ;;  %v11339_v35 = vld [vmem:[#allocation50_spill] sm:$0xff]  ;;  %v8852_v2 = vld [vmem:[#allocation9 + $0x8] sm:$0xff]  }
 0x2d8   : > { %v10652_v10 = vpop.f32.mrf.mxu1  ;;  %v2860_v19 = vadd.f32 %v10591_v11, %v2103_v21  ;;  %v3564_v13 = vadd.f32 %v11339_v35, %v10463_v55  ;;  %v10691_v39 = vadd.f32 %v10503_v0, %v10585_v59  ;;  %v10694_v55 = vadd.f32 %v10511_v46, %v2856_v4  ;;  %8568 = vmatprep.subr.bf16.mxu0 %v8852_v2  ;;  %v11341_v59 = vld [vmem:[#allocation53_spill] sm:$0xff]  ;;  %v11344_v21 = vld [vmem:[#allocation54_spill] sm:$0xff] }
 0x2d9   : > { %v4554_v14 = vpop.f32.mrf.mxu0  ;;  %v6222_v15 = vsel %vm9460_vm10, %v6217_v41, %v6221_v45  ;;  %v10708_v0 = vadd.f32 %v10545_v1, %v10613_v25  ;;  %v10721_v41 = vadd.f32 %v10581_v42, %v10633_v50  ;;  %v10727_v1 = vadd.f32 %v11342_v61, %v2864_v26  ;;  %8569 = vmatpush3.bf16.msra.mxu0 %v8852_v2  ;;  %v11345_v29 = vld [vmem:[#allocation57_spill] sm:$0xff]  ;;  %v11348_v45 = vld [vmem:[#allocation34_spill] sm:$0xff] }
 0x2da   : > { %v8338_v16 = vpop.f32.mrf.mxu1  ;;  %v7595_v60 = vcombine.low %v6212_v51, %v6222_v15  ;;  %v10711_v46 = vadd.f32 %v10565_v23, %v2860_v19  ;;  %v10730_v20 = vadd.f32 %v10605_v5, %v3913_v40  ;;  %v3565_v42 = vadd.f32 %v11344_v21, %v11343_v56  ;;  %v11347_v51 = vld [vmem:[#allocation58_spill] sm:$0xff]  ;;  %v11349_v15 = vld [vmem:[#allocation59_spill] sm:$0xff]  ;;  %v11350_v26 = vld [vmem:[#allocation29_spill] sm:$0xff]  ;;  %8570 = vmatprep.subr.bf16.mxu0 %v8853_v27 }
 0x2db   : > { %v10664_v36 = vpop.f32.mrf.mxu0  ;;  %v3917_v8 = vadd.f32 %v8338_v16, %v3563_v22  ;;  %v10677_v22 = vadd.f32 %v10465_v7, %v2852_v44  ;;  %v10698_v7 = vadd.f32 %v10525_v49, %v10597_v6  ;;  %v10715_v49 = vadd.f32 %v10573_v38, %v10620_v24  ;;  %v11346_v44 = vld [vmem:[#allocation55_spill] sm:$0xff]  ;;  %v11354_v56 = vld [vmem:[#allocation16_spill] sm:$0xff] }
 0x2dc   : > { %v3800_v30 = vpop.f32.mrf.mxu1  ;;  %8553 = vmatmul.mubr.bf16.gmra.mxu1 %v7595_v60  ;;  %v3567_v6 = vadd.f32 %v11341_v59, %v11340_v34  ;;  %v10733_v38 = vadd.f32 %v10615_v48, %v3911_v31  ;;  %v3568_v4 = vadd.f32 %v11346_v44, %v11345_v29  ;;  %v11351_v60 = vld [vmem:[#allocation60_spill] sm:$0xff]  ;;  %v11355_v44 = vld [vmem:[#allocation62_spill] sm:$0xff] }
 0x2dd   : > { %v10672_v52 = vpop.f32.mrf.mxu0  ;;  %v3915_v3 = vadd.f32 %v3800_v30, %v3561_v28  ;;  %v10737_v50 = vadd.f32 %v8386_v9, %v3917_v8  ;;  %v3571_v8 = vadd.f32 %v11348_v45, %v11347_v51  ;;  %8571 = vmatpush3.bf16.msra.mxu0 %v8853_v27  ;;  %v11358_v27 = vld [vmem:[#allocation18_spill] sm:$0xff] }
 0x2de   : > { %v8339_v12 = vpop.f32.mrf.mxu1 }
 0x2df   : > { %v10687_v11 = vadd.f32 %v8339_v12, %v3564_v13  ;;  %v8390_v58 = vpop.f32.mrf.mxu0  ;;  %v10739_v62 = vadd.f32 %v4554_v14, %v3915_v3  ;;  %v3569_v3 = vadd.f32 %v11350_v26, %v11349_v15  ;;  %v11352_v12 = vld [vmem:[#allocation33_spill] sm:$0xff] }
 0x2e0   : > { %v10700_v33 = vpop.f32.mrf.mxu1 }
 0x2e1   : > { %v4570_v23 = vpop.f32.mrf.mxu0 }
 0x2e2   : > { %v8342_v25 = vpop.f32.mrf.mxu1 }
 0x2e3   : > { %v3921_v24 = vadd.f32 %v8342_v25, %v3567_v6  ;;  %v10741_v57 = vpop.f32.mrf.mxu0 }
 0x2e4   : > { %v3816_v63 = vpop.f32.mrf.mxu1 }
 0x2e5   : > { %v3919_v17 = vadd.f32 %v3816_v63, %v3565_v42  ;;  %v10745_v5 = vadd.f32 %v8390_v58, %v3921_v24  ;;  %v10747_v40 = vpop.f32.mrf.mxu0  ;;  %v3572_v58 = vadd.f32 %v11352_v12, %v11351_v60  ;;  %v11353_v24 = vld [vmem:[#allocation61_spill] sm:$0xff] }
 0x2e6   : > { %v8343_v48 = vpop.f32.mrf.mxu1  ;;  %v3575_v21 = vadd.f32 %v11354_v56, %v11353_v24 }
 0x2e7   : > { %v10749_v31 = vadd.f32 %v8343_v48, %v3568_v4  ;;  %v10751_v16 = vadd.f32 %v4570_v23, %v3919_v17  ;;  %v11356_v4 = vld [vmem:[#allocation40_spill] sm:$0xff] }
 0x2e8   : > { %v10753_v9 = vpop.f32.mrf.mxu1  ;;  %v3573_v48 = vadd.f32 %v11356_v4, %v11355_v44 }
 0x2e9   : > { %v8394_v14 = vpop.f32.mrf.mxu0 }
 0x2ea   : > { %v8346_v28 = vpop.f32.mrf.mxu1 }
 0x2eb   : > { %v4586_v19 = vpop.f32.mrf.mxu0  ;;  %v3925_v30 = vadd.f32 %v8346_v28, %v3571_v8  ;;  %v11357_v8 = vld [vmem:[#allocation63_spill] sm:$0xff] }
 0x2ec   : > { %v3832_v35 = vpop.f32.mrf.mxu1  ;;  %v3576_v28 = vadd.f32 %v11358_v27, %v11357_v8 }
 0x2ed   : > { %v8395_v13 = vpop.f32.mrf.mxu0  ;;  %v3923_v2 = vadd.f32 %v3832_v35, %v3569_v3  ;;  %v10761_v34 = vadd.f32 %v8394_v14, %v3925_v30 }
 0x2ee   : > { %v8347_v59 = vpop.f32.mrf.mxu1 }
 0x2ef   : > { %v10763_v6 = vpop.f32.mrf.mxu0  ;;  %v3926_v61 = vadd.f32 %v8347_v59, %v3572_v58  ;;  %v10765_v23 = vadd.f32 %v4586_v19, %v3923_v2 }
 0x2f0   : > { %v10767_v25 = vpop.f32.mrf.mxu1 }
 0x2f1   : > { %v10771_v42 = vadd.f32 %v8395_v13, %v3926_v61 }
 0x2f2   : > { %v8350_v63 = vpop.f32.mrf.mxu1  ;;  %v8398_v17 = vpop.f32.mrf.mxu0 }
 0x2f3   : > { %v3929_v29 = vadd.f32 %v8350_v63, %v3575_v21 }
 0x2f4   : > { %v3848_v14 = vpop.f32.mrf.mxu1  ;;  %v4602_v51 = vpop.f32.mrf.mxu0 }
 0x2f5   : > { %v3927_v45 = vadd.f32 %v3848_v14, %v3573_v48  ;;  %v10777_v19 = vadd.f32 %v8398_v17, %v3929_v29 }
 0x2f6   : > { %v8351_v30 = vpop.f32.mrf.mxu1  ;;  %v8399_v15 = vpop.f32.mrf.mxu0 }
 0x2f7   : > { %v3930_v26 = vadd.f32 %v8351_v30, %v3576_v28  ;;  %v10779_v3 = vadd.f32 %v4602_v51, %v3927_v45 }
 0x2f8   : > { %v3851_v35 = vpop.f32.mrf.mxu1  ;;  %v10781_v13 = vpop.f32.mrf.mxu0 }
 0x2f9   : > { %v10784_v2 = vadd.f32 %v3851_v35, %v10677_v22  ;;  %v10786_v60 = vadd.f32 %v8399_v15, %v3930_v26 }
 0x2fa   : > { %v8354_v12 = vpop.f32.mrf.mxu1  ;;  %v8402_v58 = vpop.f32.mrf.mxu0 }
 0x2fb   : > { %v3933_v59 = vadd.f32 %v8354_v12, %v10681_v54 }
 0x2fc   : > { %v3864_v61 = vpop.f32.mrf.mxu1  ;;  %v4618_v24 = vpop.f32.mrf.mxu0 }
 0x2fd   : > { %v3931_v56 = vadd.f32 %v3864_v61, %v10685_v47  ;;  %v10790_v21 = vadd.f32 %v8402_v58, %v3933_v59 }
 0x2fe   : > { %v8355_v63 = vpop.f32.mrf.mxu1  ;;  %v8403_v17 = vpop.f32.mrf.mxu0 }
 0x2ff   : > { %v3934_v29 = vadd.f32 %v8355_v63, %v10691_v39  ;;  %v10793_v44 = vadd.f32 %v4618_v24, %v3931_v56 }
 0x300   : > { %v3867_v22 = vpop.f32.mrf.mxu1  ;;  %v4621_v4 = vpop.f32.mrf.mxu0 }
 0x301   : > { %v3932_v48 = vadd.f32 %v3867_v22, %v10694_v55  ;;  %v10796_v14 = vadd.f32 %v8403_v17, %v3934_v29 }
 0x302   : > { %v8358_v51 = vpop.f32.mrf.mxu1 }
 0x303   : > { %v3937_v54 = vadd.f32 %v8358_v51, %v10698_v7  ;;  %v10799_v45 = vadd.f32 %v4621_v4, %v3932_v48 }
 0x304   : > { %v8406_v47 = vpop.f32.mrf.mxu0  ;;  %v3880_v8 = vpop.f32.mrf.mxu1 }
 0x305   : > { %v3935_v27 = vadd.f32 %v3880_v8, %v10704_v53  ;;  %v10802_v28 = vadd.f32 %v8406_v47, %v3937_v54 }
 0x306   : > { %v4634_v39 = vpop.f32.mrf.mxu0  ;;  %v8359_v30 = vpop.f32.mrf.mxu1 }
 0x307   : > { %v3938_v15 = vadd.f32 %v8359_v30, %v10708_v0  ;;  %v10805_v26 = vadd.f32 %v4634_v39, %v3935_v27 }
 0x308   : > { %v8407_v55 = vpop.f32.mrf.mxu0  ;;  %v3883_v35 = vpop.f32.mrf.mxu1 }
 0x309   : > { %v3936_v12 = vadd.f32 %v3883_v35, %v10711_v46  ;;  %v10808_v58 = vadd.f32 %v8407_v55, %v3938_v15 }
 0x30a   : > { %v4637_v7 = vpop.f32.mrf.mxu0  ;;  %v8362_v59 = vpop.f32.mrf.mxu1 }
 0x30b   : > { %v3941_v61 = vadd.f32 %v8362_v59, %v10715_v49  ;;  %v10811_v24 = vadd.f32 %v4637_v7, %v3936_v12 }
 0x30c   : > { %v3896_v53 = vpop.f32.mrf.mxu1 }
 0x30d   : > { %v3939_v56 = vadd.f32 %v3896_v53, %v10721_v41 }
 0x30e   : > { %v8363_v63 = vpop.f32.mrf.mxu1 }
 0x30f   : > { %v3942_v0 = vadd.f32 %v8363_v63, %v10724_v32 }
 0x310   : > { %v8410_v17 = vpop.f32.mrf.mxu0  ;;  %v3899_v29 = vpop.f32.mrf.mxu1 }
 0x311   : > { %v3940_v22 = vadd.f32 %v3899_v29, %v10727_v1  ;;  %v10816_v4 = vadd.f32 %v8410_v17, %v3941_v61 }
 0x312   : > { %v4650_v46 = vpop.f32.mrf.mxu0 }
 0x313   : > { %v10818_v48 = vadd.f32 %v4650_v46, %v3939_v56 }
 0x314   : > { %v8411_v51 = vpop.f32.mrf.mxu0  ;;  %v8430_v54 = vpop.f32.mrf.mxu1 }
 0x315   : > { %v10820_v49 = vadd.f32 %v8411_v51, %v3942_v0  ;;  %v10823_v8 = vadd.f32 %v8430_v54, %v10730_v20 }
 0x316   : > { %v4653_v47 = vpop.f32.mrf.mxu0  ;;  %v5261_v41 = vpop.f32.mrf.mxu1 }
 0x317   : > { %v10825_v27 = vadd.f32 %v4653_v47, %v3940_v22  ;;  %v10828_v32 = vadd.f32 %v5261_v41, %v10733_v38 }
 0x318   : > { %v10830_v1 = vpop.f32.mrf.mxu1  ;;  %v10847_v59 = vpop.f32.mrf.mxu0 }
 0x31a   : > { %v10832_v39 = vpop.f32.mrf.mxu1  ;;  %v10854_v56 = vpop.f32.mrf.mxu0 }
 0x31c   : > { %v10858_v0 = vpop.f32.mrf.mxu0 }
 0x31d   : > { %v8434_v30 = vpop.f32.mrf.mxu1 }
 0x31e   : > { %v10835_v15 = vadd.f32 %v8434_v30, %v10737_v50  ;;  %v10866_v46 = vpop.f32.mrf.mxu0 }
 0x31f   : > { %v5277_v55 = vpop.f32.mrf.mxu1 }
 0x320   : > { %v10838_v35 = vadd.f32 %v5277_v55, %v10739_v62  ;;  %v10873_v47 = vpop.f32.mrf.mxu0 }
 0x321   : > { %v10840_v20 = vpop.f32.mrf.mxu1 }
 0x322   : > { %v10881_v55 = vpop.f32.mrf.mxu0 }
 0x323   : > { %v10842_v12 = vpop.f32.mrf.mxu1 }
 0x325   : > { %v8438_v7 = vpop.f32.mrf.mxu1 }
 0x326   : > { %v10845_v38 = vadd.f32 %v8438_v7, %v10745_v5 }
 0x327   : > { %v5293_v61 = vpop.f32.mrf.mxu1 }
 0x328   : > { %v10850_v53 = vadd.f32 %v5293_v61, %v10751_v16  ;;  %v10888_v61 = vpop.f32.mrf.mxu0 }
 0x329   : > { %v10852_v50 = vpop.f32.mrf.mxu1 }
 0x32b   : > { %v10856_v62 = vpop.f32.mrf.mxu1 }
 0x32d   : > { %v8442_v63 = vpop.f32.mrf.mxu1 }
 0x32e   : > { %v10861_v17 = vadd.f32 %v8442_v63, %v10761_v34 }
 0x32f   : > { %v5309_v5 = vpop.f32.mrf.mxu1 }
 0x330   : > { %v10864_v29 = vadd.f32 %v5309_v5, %v10765_v23 }
 0x331   : > { %v8443_v22 = vpop.f32.mrf.mxu1 }
 0x332   : > { %v10869_v16 = vadd.f32 %v8443_v22, %v10771_v42 }
 0x333   : > { %v10871_v51 = vpop.f32.mrf.mxu1 }
 0x336   : > { %v8446_v54 = vpop.f32.mrf.mxu1 }
 0x337   : > { %v10876_v41 = vadd.f32 %v8446_v54, %v10777_v19 }
 0x338   : > { %v5325_v34 = vpop.f32.mrf.mxu1 }
 0x339   : > { %v10879_v30 = vadd.f32 %v5325_v34, %v10779_v3  ;;  %v10896_v3 = vpop.f32.mrf.mxu0 }
 0x33a   : > { %v8447_v23 = vpop.f32.mrf.mxu1 }
 0x33b   : > { %11359 = vst [vmem:[#allocation17_spill] sm:$0xff] %v10879_v30  ;;  %v10884_v7 = vadd.f32 %v8447_v23, %v10786_v60 }
 0x33c   : > { %v10886_v42 = vpop.f32.mrf.mxu1 }
 0x33d   : > { %11360 = vst [vmem:[#allocation44_spill] sm:$0xff] %v10884_v7  ;;  %11361 = vst [vmem:[#allocation45_spill] sm:$0xff] %v10886_v42  ;;  %v10904_v7 = vpop.f32.mrf.mxu0 }
 0x33e   : > { %v8450_v63 = vpop.f32.mrf.mxu1 }
 0x33f   : > { %v10891_v5 = vadd.f32 %v8450_v63, %v10790_v21 }
 0x340   : > { %v5341_v19 = vpop.f32.mrf.mxu1 }
 0x341   : > { %11362 = vst [vmem:[#allocation31_spill] sm:$0xff] %v10891_v5  ;;  %v10894_v22 = vadd.f32 %v5341_v19, %v10793_v44  ;;  %v10912_v19 = vpop.f32.mrf.mxu0 }
 0x342   : > { %v8451_v54 = vpop.f32.mrf.mxu1 }
 0x343   : > { %11363 = vst [vmem:[#allocation27_spill] sm:$0xff] %v10894_v22  ;;  %v10899_v34 = vadd.f32 %v8451_v54, %v10796_v14 }
 0x344   : > { %v5344_v60 = vpop.f32.mrf.mxu1 }
 0x345   : > { %11364 = vst [vmem:[#allocation37_spill] sm:$0xff] %v10899_v34  ;;  %v10902_v23 = vadd.f32 %v5344_v60, %v10799_v45  ;;  %v10920_v60 = vpop.f32.mrf.mxu0  ;;  %v11371_v34 = vld [vmem:[#allocation19_spill] sm:$0xff] }
 0x347   : > { %11365 = vst [vmem:[#allocation32_spill] sm:$0xff] %v10902_v23  ;;  %v8454_v30 = vpop.f32.mrf.mxu1  ;;  %v11370_v23 = vld [vmem:[#allocation20_spill] sm:$0xff]  ;;  %v10925_v5 = vpop.f32.mrf.mxu0 }
 0x348   : > { %v10907_v21 = vadd.f32 %v8454_v30, %v10802_v28  ;;  %v2079_v28 = vadd.f32 %v11371_v34, %v11370_v23  ;;  %v11372_v30 = vld [vmem:[#allocation51_spill] sm:$0xff]  ;;  %v11376_v23 = vld [vmem:[#allocation28_spill] sm:$0xff] }
 0x349   : > { %v5357_v63 = vpop.f32.mrf.mxu1 }
 0x34a   : > { %11366 = vst [vmem:[#allocation48_spill] sm:$0xff] %v10907_v21  ;;  %v10910_v44 = vadd.f32 %v5357_v63, %v10805_v26  ;;  %v2836_v21 = vadd.f32 %v11372_v30, %v2079_v28  ;;  %v11373_v63 = vld [vmem:[#allocation47_spill] sm:$0xff] }
 0x34b   : > { %v8455_v22 = vpop.f32.mrf.mxu1 }
 0x34c   : > { %11367 = vst [vmem:[#allocation42_spill] sm:$0xff] %v10910_v44  ;;  %v10915_v14 = vadd.f32 %v8455_v22, %v10808_v58  ;;  %v3558_v44 = vadd.f32 %v11373_v63, %v2836_v21  ;;  %v11374_v58 = vld [vmem:[#allocation22_spill] sm:$0xff]  ;;  %v11375_v22 = vld [vmem:[#allocation21_spill] sm:$0xff]  ;;  %v4668_v21 = vadd.f32 %v10628_v43, %v10650_v37 }
 0x34d   : > { %v5360_v54 = vpop.f32.mrf.mxu1 }
 0x34e   : > { %11368 = vst [vmem:[#allocation38_spill] sm:$0xff] %v10915_v14  ;;  %v10918_v45 = vadd.f32 %v5360_v54, %v10811_v24  ;;  %v2083_v14 = vadd.f32 %v11375_v22, %v11374_v58  ;;  %v10933_v24 = vpop.f32.mrf.mxu0  ;;  %v5391_v58 = vadd.f32 %v10830_v1, %v4668_v21 }
 0x350   : > { %11369 = vst [vmem:[#allocation46_spill] sm:$0xff] %v10918_v45  ;;  %v3912_v45 = vadd.f32 %v10652_v10, %v3558_v44  ;;  %v2840_v28 = vadd.f32 %v11376_v23, %v2083_v14  ;;  %v11377_v44 = vld [vmem:[#allocation52_spill] sm:$0xff] }
 0x351   : > { %v11378_v23 = vld [vmem:[#allocation24_spill] sm:$0xff] }
 0x352   : > { %v4666_v22 = vadd.f32 %v10635_v18, %v3912_v45  ;;  %v3562_v14 = vadd.f32 %v11377_v44, %v2840_v28  ;;  %v11380_v28 = vld [vmem:[#allocation30_spill] sm:$0xff] }
 0x353   : > { %v8458_v26 = vpop.f32.mrf.mxu1 }
 0x354   : > { %v10929_v42 = vadd.f32 %v8458_v26, %v10816_v4  ;;  %v10945_v26 = vpop.f32.mrf.mxu0  ;;  %v5389_v43 = vadd.f32 %v10832_v39, %v4666_v22  ;;  %v3916_v18 = vadd.f32 %v10700_v33, %v3562_v14  ;;  %v5745_v39 = vadd.f32 %v10858_v0, %v5391_v58 }
 0x355   : > { %v5373_v54 = vpop.f32.mrf.mxu1 }
 0x356   : > { %v10937_v34 = vadd.f32 %v5373_v54, %v10818_v48  ;;  %v5744_v48 = vadd.f32 %v10847_v59, %v10823_v8  ;;  %v10961_v45 = vpop.f32.mrf.mxu0  ;;  %v10966_v8 = vld [vmem:[%s11202_s4] ss:$0 sm:$0xff]  ;;  %v5743_v22 = vadd.f32 %v10866_v46, %v5389_v43  ;;  %v4670_v44 = vadd.f32 %v10672_v52, %v3916_v18 }
 0x357   : > { %v8459_v30 = vpop.f32.mrf.mxu1 }
 0x358   : > { %v10943_v4 = vadd.f32 %v8459_v30, %v10820_v49  ;;  %v5742_v49 = vadd.f32 %v10854_v56, %v10828_v32  ;;  %v11379_v30 = vld [vmem:[#allocation23_spill] sm:$0xff]  ;;  %v4672_v32 = vadd.f32 %v10664_v36, %v10687_v11  ;;  %v10976_v14 = vpop.f32.mrf.mxu0  ;;  %v5748_v36 = vadd.f32 %v10873_v47, %v10835_v15  ;;  %v11381_v11 = vld [vmem:[#allocation56_spill] sm:$0xff] }
 0x359   : > { %v5376_v63 = vpop.f32.mrf.mxu1  ;;  %v2087_v1 = vadd.f32 %v11379_v30, %v11378_v23  ;;  %v5393_v23 = vadd.f32 %v10842_v12, %v4670_v44  ;;  %v11384_v44 = vld [vmem:[#allocation36_spill] sm:$0xff] }
 0x35a   : > { %v10950_v10 = vadd.f32 %v5376_v63, %v10825_v27 }
 0x35b   : > { %v8526_v54 = vpop.f32.mrf.mxu1  ;;  %v2844_v21 = vadd.f32 %v11380_v28, %v2087_v1 }
 0x35c   : > { %v6498_v37 = vadd.f32 %v8526_v54, %v5744_v48  ;;  %v5395_v48 = vadd.f32 %v10840_v20, %v4672_v32  ;;  %v5746_v20 = vadd.f32 %v10881_v55, %v10838_v35  ;;  %v11383_v32 = vld [vmem:[#allocation25_spill] sm:$0xff]  ;;  %v4676_v35 = vadd.f32 %v10741_v57, %v10749_v31 }
 0x35d   : > { %v6369_v27 = vpop.f32.mrf.mxu1 }
 0x35e   : > { %v6496_v59 = vadd.f32 %v6369_v27, %v5742_v49  ;;  %v6537_v63 = vadd.f32 %v10966_v8, %v6498_v37  ;;  %v3566_v37 = vadd.f32 %v11381_v11, %v2844_v21  ;;  %v10988_v27 = vpop.f32.mrf.mxu0  ;;  %v5749_v15 = vadd.f32 %v10888_v61, %v5395_v48  ;;  %v11382_v21 = vld [vmem:[#allocation26_spill] sm:$0xff] }
 0x35f   : > { %v8527_v56 = vpop.f32.mrf.mxu1  ;;  %v5399_v61 = vadd.f32 %v10852_v50, %v4676_v35  ;;  %v5750_v50 = vadd.f32 %v10912_v19, %v10850_v53 }
 0x360   : > { %v6499_v33 = vadd.f32 %v8527_v56, %v5745_v39  ;;  %v6535_v0 = vadd.f32 %v10966_v8, %v6496_v59  ;;  %v6569_v52 = vmax.f32 %v6537_v63, 0.0  ;;  %v3920_v18 = vadd.f32 %v10753_v9, %v3566_v37 }
 0x361   : > { %v6372_v54 = vpop.f32.mrf.mxu1  ;;  %v2091_v56 = vadd.f32 %v11383_v32, %v11382_v21  ;;  %v5747_v9 = vadd.f32 %v10896_v3, %v5393_v23 }
 0x362   : > { %v6538_v58 = vadd.f32 %v10966_v8, %v6499_v33  ;;  %v6497_v49 = vadd.f32 %v6372_v54, %v5743_v22  ;;  %v6567_v47 = vmax.f32 %v6535_v0, 0.0  ;;  %v4674_v48 = vadd.f32 %v10747_v40, %v3920_v18  ;;  %v11000_v0 = vpop.f32.mrf.mxu0 }
 0x363   : > { %v8530_v46 = vpop.f32.mrf.mxu1  ;;  %v2848_v54 = vadd.f32 %v11384_v44, %v2091_v56  ;;  %v5754_v44 = vadd.f32 %v10945_v26, %v10864_v29 }
 0x364   : > { %v6570_v43 = vmax.f32 %v6538_v58, 0.0  ;;  %v6536_v30 = vadd.f32 %v10966_v8, %v6497_v49  ;;  %v6502_v1 = vadd.f32 %v8530_v46, %v5748_v36  ;;  %v5752_v36 = vadd.f32 %v10904_v7, %v10845_v38 }
 0x365   : > { %v6385_v59 = vpop.f32.mrf.mxu1  ;;  %v5397_v3 = vadd.f32 %v10856_v62, %v4674_v48 }
 0x366   : > { %v6600_v39 = vpack.c.bf16 %v6570_v43, %v6569_v52  ;;  %v6568_v28 = vmax.f32 %v6536_v30, 0.0  ;;  %v6500_v12 = vadd.f32 %v6385_v59, %v5746_v20  ;;  %v6541_v63 = vadd.f32 %v10966_v8, %v6502_v1  ;;  %v11385_v20 = vld [vmem:[#allocation35_spill] sm:$0xff]  ;;  %v11011_v43 = vpop.f32.mrf.mxu0 }
 0x367   : > { %v8531_v55 = vpop.f32.mrf.mxu1  ;;  %v3570_v52 = vadd.f32 %v11385_v20, %v2848_v54  ;;  %v5753_v1 = vadd.f32 %v10920_v60, %v5399_v61 }
 0x368   : > { %v6503_v33 = vadd.f32 %v8531_v55, %v5749_v15  ;;  %v6599_v22 = vpack.c.bf16 %v6568_v28, %v6567_v47  ;;  %v6539_v49 = vadd.f32 %v10966_v8, %v6500_v12  ;;  %v6573_v40 = vmax.f32 %v6541_v63, 0.0  ;;  %v5682_v28 = vpop.f32.mrf.mxu0 }
 0x369   : > { %v6388_v58 = vpop.f32.mrf.mxu1  ;;  %v3924_v59 = vadd.f32 %v10767_v25, %v3570_v52  ;;  %v5751_v47 = vadd.f32 %v10925_v5, %v5397_v3  ;;  %v5756_v25 = vadd.f32 %v10933_v24, %v10861_v17  ;;  %v5757_v17 = vadd.f32 %v10961_v45, %v10869_v16  ;;  %v11387_v52 = vld [vmem:[#allocation17_spill] sm:$0xff] }
 0x36a   : > { %v6542_v57 = vadd.f32 %v10966_v8, %v6503_v33  ;;  %v6501_v31 = vadd.f32 %v6388_v58, %v5747_v9  ;;  %8572 = vmatprep.mubr.bf16.mxu0 %v6599_v22  ;;  %v6571_v38 = vmax.f32 %v6539_v49, 0.0  ;;  %v8498_v9 = vpop.f32.mrf.mxu0 }
 0x36b   : > { %v8534_v11 = vpop.f32.mrf.mxu1  ;;  %8573 = vmatmul.mubr.bf16.vlgmr.msra.gmra.mxu0 %v6600_v39  ;;  %v4678_v56 = vadd.f32 %v10763_v6, %v3924_v59  ;;  %v11388_v59 = vld [vmem:[#allocation44_spill] sm:$0xff] }
 0x36c   : > { %v6574_v37 = vmax.f32 %v6542_v57, 0.0  ;;  %v6540_v23 = vadd.f32 %v10966_v8, %v6501_v31  ;;  %v6506_v46 = vadd.f32 %v8534_v11, %v5752_v36  ;;  %v5695_v57 = vpop.f32.mrf.mxu0 }
 0x36d   : > { %v6401_v30 = vpop.f32.mrf.mxu1  ;;  %v5401_v33 = vadd.f32 %v10871_v51, %v4678_v56 }
 0x36e   : > { %v6602_v7 = vpack.c.bf16 %v6574_v37, %v6573_v40  ;;  %v6572_v62 = vmax.f32 %v6540_v23, 0.0  ;;  %v6504_v18 = vadd.f32 %v6401_v30, %v5750_v50  ;;  %v6545_v53 = vadd.f32 %v10966_v8, %v6506_v46  ;;  %v8499_v16 = vpop.f32.mrf.mxu0 }
 0x36f   : > { %v8535_v15 = vpop.f32.mrf.mxu1  ;;  %v5755_v51 = vadd.f32 %v10976_v14, %v5401_v33  ;;  %v4682_v50 = vadd.f32 %v10781_v13, %v10784_v2  ;;  %v5760_v23 = vadd.f32 %v10988_v27, %v10876_v41  ;;  %v11386_v14 = vld [vmem:[#allocation45_spill] sm:$0xff]  ;;  %v5758_v30 = vadd.f32 %v11000_v0, %v11387_v52 }
 0x370   : > { %v6507_v19 = vadd.f32 %v8535_v15, %v5753_v1  ;;  %v6601_v39 = vpack.c.bf16 %v6572_v62, %v6571_v38  ;;  %v6543_v21 = vadd.f32 %v10966_v8, %v6504_v18  ;;  %v6577_v35 = vmax.f32 %v6545_v53, 0.0  ;;  %v5698_v13 = vpop.f32.mrf.mxu0 }
 0x371   : > { %v6404_v12 = vpop.f32.mrf.mxu1  ;;  %v5405_v46 = vadd.f32 %v11386_v14, %v4682_v50  ;;  %v5761_v15 = vadd.f32 %v11011_v43, %v11388_v59  ;;  %v11394_v14 = vld [vmem:[#allocation42_spill] sm:$0xff] }
 0x372   : > { %v6546_v32 = vadd.f32 %v10966_v8, %v6507_v19  ;;  %v6505_v60 = vadd.f32 %v6404_v12, %v5751_v47  ;;  %8576 = vmatprep.mubr.bf16.mxu0 %v6601_v39  ;;  %v6575_v54 = vmax.f32 %v6543_v21, 0.0  ;;  %v8502_v0 = vpop.f32.mrf.mxu0 }
 0x373   : > { %8577 = vmatmul.mubr.bf16.gmra.mxu0 %v6602_v7  ;;  %v5759_v47 = vadd.f32 %v5682_v28, %v5405_v46 }
 0x374   : > { %v6578_v55 = vmax.f32 %v6546_v32, 0.0  ;;  %v6544_v63 = vadd.f32 %v10966_v8, %v6505_v60  ;;  %v8538_v5 = vpop.f32.mrf.mxu1  ;;  %v11389_v60 = vld [vmem:[#allocation31_spill] sm:$0xff]  ;;  %v5711_v28 = vpop.f32.mrf.mxu0 }
 0x375   : > { %v6510_v22 = vadd.f32 %v8538_v5, %v5756_v25  ;;  %v5764_v56 = vadd.f32 %v8498_v9, %v11389_v60  ;;  %v11390_v5 = vld [vmem:[#allocation27_spill] sm:$0xff]  ;;  %v5766_v46 = vadd.f32 %v5711_v28, %v11394_v14 }
 0x376   : > { %v6604_v61 = vpack.c.bf16 %v6578_v55, %v6577_v35  ;;  %v6576_v48 = vmax.f32 %v6544_v63, 0.0  ;;  %v6417_v6 = vpop.f32.mrf.mxu1  ;;  %v5762_v33 = vadd.f32 %v5695_v57, %v11390_v5 }
 0x377   : > { %v6508_v58 = vadd.f32 %v6417_v6, %v5754_v44  ;;  %v6549_v31 = vadd.f32 %v10966_v8, %v6510_v22  ;;  %v11391_v6 = vld [vmem:[#allocation37_spill] sm:$0xff] }
 0x378   : > { %v8539_v24 = vpop.f32.mrf.mxu1  ;;  %v6603_v49 = vpack.c.bf16 %v6576_v48, %v6575_v54 }
 0x379   : > { %v6511_v36 = vadd.f32 %v8539_v24, %v5757_v17  ;;  %v6547_v29 = vadd.f32 %v10966_v8, %v6508_v58  ;;  %v6581_v45 = vmax.f32 %v6549_v31, 0.0  ;;  %v5765_v58 = vadd.f32 %v8499_v16, %v11391_v6  ;;  %v11392_v31 = vld [vmem:[#allocation32_spill] sm:$0xff] }
 0x37a   : > { %v6420_v3 = vpop.f32.mrf.mxu1  ;;  %8580 = vmatprep.mubr.bf16.mxu0 %v6603_v49 }
 0x37b   : > { %v6550_v26 = vadd.f32 %v10966_v8, %v6511_v36  ;;  %v6509_v11 = vadd.f32 %v6420_v3, %v5755_v51  ;;  %8581 = vmatmul.mubr.bf16.gmra.mxu0 %v6604_v61  ;;  %v6579_v1 = vmax.f32 %v6547_v29, 0.0  ;;  %v5763_v36 = vadd.f32 %v5698_v13, %v11392_v31  ;;  %v8503_v51 = vpop.f32.mrf.mxu0 }
 0x37d   : > { %v6582_v40 = vmax.f32 %v6550_v26, 0.0  ;;  %v6548_v37 = vadd.f32 %v10966_v8, %v6509_v11  ;;  %v8542_v20 = vpop.f32.mrf.mxu1 }
 0x37e   : > { %v6514_v62 = vadd.f32 %v8542_v20, %v5760_v23 }
 0x37f   : > { %v6606_v38 = vpack.c.bf16 %v6582_v40, %v6581_v45  ;;  %v6580_v7 = vmax.f32 %v6548_v37, 0.0  ;;  %v6433_v18 = vpop.f32.mrf.mxu1  ;;  %v11393_v45 = vld [vmem:[#allocation48_spill] sm:$0xff]  ;;  %v5714_v37 = vpop.f32.mrf.mxu0 }
 0x380   : > { %v6512_v2 = vadd.f32 %v6433_v18, %v5758_v30  ;;  %v6553_v41 = vadd.f32 %v10966_v8, %v6514_v62  ;;  %v5768_v40 = vadd.f32 %v8502_v0, %v11393_v45  ;;  %v11395_v18 = vld [vmem:[#allocation38_spill] sm:$0xff]  ;;  %v8903_v45 = vld [vmem:[%s9312_s30] sm:$0xff]  }
 0x381   : > { %v6605_v53 = vpack.c.bf16 %v6580_v7, %v6579_v1  ;;  %v8543_v19 = vpop.f32.mrf.mxu1  ;;  %v5769_v13 = vadd.f32 %v8503_v51, %v11395_v18  ;;  %v6880_v14 = vunpack.c.h.bf16 %v8903_v45 }
 0x382   : > { %v6515_v27 = vadd.f32 %v8543_v19, %v5761_v15  ;;  %v6551_v12 = vadd.f32 %v10966_v8, %v6512_v2  ;;  %v6585_v25 = vmax.f32 %v6553_v41, 0.0  ;;  %v11396_v19 = vld [vmem:[#allocation46_spill] sm:$0xff] }
 0x383   : > { %8584 = vmatprep.mubr.bf16.mxu0 %v6605_v53  ;;  %v6436_v39 = vpop.f32.mrf.mxu1  ;;  %v5767_v41 = vadd.f32 %v5714_v37, %v11396_v19  ;;  %v8905_v19 = vld [vmem:[%s9312_s30 + $0x10] sm:$0xff]  }
 0x384   : > { %8585 = vmatmul.mubr.bf16.gmra.mxu0 %v6606_v38  ;;  %v6554_v21 = vadd.f32 %v10966_v8, %v6515_v27  ;;  %v6513_v32 = vadd.f32 %v6436_v39, %v5759_v47  ;;  %v6583_v22 = vmax.f32 %v6551_v12, 0.0  ;;  %v8506_v38 = vpop.f32.mrf.mxu0 }
 0x386   : > { %v6586_v35 = vmax.f32 %v6554_v21, 0.0  ;;  %v6552_v43 = vadd.f32 %v10966_v8, %v6513_v32  ;;  %v5727_v27 = vpop.f32.mrf.mxu0 }
 0x387   : > { %v8546_v55 = vpop.f32.mrf.mxu1  ;;  %v5770_v5 = vadd.f32 %v5727_v27, %v10937_v34 }
 0x388   : > { %v6518_v63 = vadd.f32 %v8546_v55, %v5764_v56  ;;  %v6608_v44 = vpack.c.bf16 %v6586_v35, %v6585_v25  ;;  %v6584_v54 = vmax.f32 %v6552_v43, 0.0  ;;  %v8507_v56 = vpop.f32.mrf.mxu0  ;;  %v5772_v25 = vadd.f32 %v8506_v38, %v10929_v42 }
 0x389   : > { %v6449_v61 = vpop.f32.mrf.mxu1 }
 0x38a   : > { %v6516_v48 = vadd.f32 %v6449_v61, %v5762_v33  ;;  %v6607_v24 = vpack.c.bf16 %v6584_v54, %v6583_v22  ;;  %v6557_v9 = vadd.f32 %v10966_v8, %v6518_v63  ;;  %v5730_v22 = vpop.f32.mrf.mxu0  ;;  %v5773_v54 = vadd.f32 %v8507_v56, %v10943_v4 }
 0x38b   : > { %v8547_v17 = vpop.f32.mrf.mxu1  ;;  %v5771_v6 = vadd.f32 %v5730_v22, %v10950_v10  ;;  %v11073_v10 = vld [vmem:[%s11204_s6] ss:$0 sm:$0xff] }
 0x38c   : > { %v6519_v49 = vadd.f32 %v8547_v17, %v5765_v58  ;;  %8588 = vmatprep.mubr.bf16.mxu0 %v6607_v24  ;;  %v6555_v57 = vadd.f32 %v10966_v8, %v6516_v48  ;;  %v6589_v11 = vmax.f32 %v6557_v9, 0.0 }
 0x38d   : > { %v6452_v3 = vpop.f32.mrf.mxu1  ;;  %8589 = vmatmul.mubr.bf16.gmra.mxu0 %v6608_v44 }
 0x38e   : > { %v6558_v29 = vadd.f32 %v10966_v8, %v6519_v49  ;;  %v6517_v26 = vadd.f32 %v6452_v3, %v5763_v36  ;;  %v6587_v20 = vmax.f32 %v6555_v57, 0.0 }
 0x390   : > { %v6590_v50 = vmax.f32 %v6558_v29, 0.0  ;;  %v6556_v16 = vadd.f32 %v10966_v8, %v6517_v26  ;;  %v8550_v23 = vpop.f32.mrf.mxu1 }
 0x391   : > { %v6522_v1 = vadd.f32 %v8550_v23, %v5768_v40 }
 0x392   : > { %v6610_v52 = vpack.c.bf16 %v6590_v50, %v6589_v11  ;;  %v6588_v30 = vmax.f32 %v6556_v16, 0.0  ;;  %v6465_v7 = vpop.f32.mrf.mxu1  ;;  %v8902_v11 = vld [vmem:[%s9312_s30 + $0x8] sm:$0xff]  }
 0x393   : > { %v6520_v62 = vadd.f32 %v6465_v7, %v5766_v46  ;;  %v6561_v15 = vadd.f32 %v10966_v8, %v6522_v1  ;;  %v6881_v50 = vunpack.c.l.bf16 %v8902_v11  ;;  %v6882_v37 = vunpack.c.h.bf16 %v8902_v11 }
 0x394   : > { %v6609_v2 = vpack.c.bf16 %v6588_v30, %v6587_v20  ;;  %v8551_v59 = vpop.f32.mrf.mxu1 }
 0x395   : > { %v6523_v53 = vadd.f32 %v8551_v59, %v5769_v13  ;;  %v6559_v39 = vadd.f32 %v10966_v8, %v6520_v62  ;;  %v6593_v21 = vmax.f32 %v6561_v15, 0.0  ;;  %v8904_v62 = vld [vmem:[%s9312_s30 + $0x18] sm:$0xff]  }
 0x396   : > { %8592 = vmatprep.mubr.bf16.mxu0 %v6609_v2  ;;  %v6468_v47 = vpop.f32.mrf.mxu1  ;;  %v6885_v18 = vunpack.c.l.bf16 %v8904_v62  ;;  %v6886_v27 = vunpack.c.h.bf16 %v8904_v62 }
 0x397   : > { %8593 = vmatmul.mubr.bf16.gmra.mxu0 %v6610_v52  ;;  %v6562_v0 = vadd.f32 %v10966_v8, %v6523_v53  ;;  %v6521_v12 = vadd.f32 %v6468_v47, %v5767_v41  ;;  %v6591_v35 = vmax.f32 %v6559_v39, 0.0  ;;  %v6883_v41 = vunpack.c.l.bf16 %v8905_v19 }
 0x399   : > { %v6594_v32 = vmax.f32 %v6562_v0, 0.0  ;;  %v6560_v60 = vadd.f32 %v10966_v8, %v6521_v12 }
 0x39b   : > { %v6612_v43 = vpack.c.bf16 %v6594_v32, %v6593_v21  ;;  %v6592_v55 = vmax.f32 %v6560_v60, 0.0 }
 0x39c   : > { %v8554_v63 = vpop.f32.mrf.mxu1 }
 0x39d   : > { %v6526_v33 = vadd.f32 %v8554_v63, %v5772_v25  ;;  %v6611_v28 = vpack.c.bf16 %v6592_v55, %v6591_v35  ;;  %v6884_v25 = vunpack.c.h.bf16 %v8905_v19 }
 0x39e   : > { %v6481_v44 = vpop.f32.mrf.mxu1 }
 0x39f   : > { %v6524_v61 = vadd.f32 %v6481_v44, %v5770_v5  ;;  %8596 = vmatprep.mubr.bf16.mxu0 %v6611_v28  ;;  %v6565_v42 = vadd.f32 %v10966_v8, %v6526_v33  ;;  %v8906_v33 = vld [vmem:[%s9312_s30 + $0x28] sm:$0xff]  }
 0x3a0   : > { %v8555_v48 = vpop.f32.mrf.mxu1  ;;  %8597 = vmatmul.mubr.bf16.gmra.mxu0 %v6612_v43  ;;  %v6889_v28 = vunpack.c.l.bf16 %v8906_v33 }
 0x3a1   : > { %v6527_v58 = vadd.f32 %v8555_v48, %v5773_v54  ;;  %v6563_v24 = vadd.f32 %v10966_v8, %v6524_v61  ;;  %v6597_v49 = vmax.f32 %v6565_v42, 0.0 }
 0x3a2   : > { %v6484_v17 = vpop.f32.mrf.mxu1 }
 0x3a3   : > { %v6566_v34 = vadd.f32 %v10966_v8, %v6527_v58  ;;  %v6525_v9 = vadd.f32 %v6484_v17, %v5771_v6  ;;  %v6595_v36 = vmax.f32 %v6563_v24, 0.0  ;;  %v8907_v6 = vld [vmem:[%s9312_s30 + $0x20] sm:$0xff]   ;;  %v6890_v58 = vunpack.c.h.bf16 %v8906_v33 }
 0x3a4   : > { %v6887_v42 = vunpack.c.l.bf16 %v8907_v6 }
 0x3a5   : > { %v6598_v31 = vmax.f32 %v6566_v34, 0.0  ;;  %v6564_v4 = vadd.f32 %v10966_v8, %v6525_v9  ;;  %v6879_v8 = vunpack.c.l.bf16 %v8903_v45 }
 0x3a7   : > { %v6614_v51 = vpack.c.bf16 %v6598_v31, %v6597_v49  ;;  %v6596_v3 = vmax.f32 %v6564_v4, 0.0 }
 0x3a9   : > { %v6613_v57 = vpack.c.bf16 %v6596_v3, %v6595_v36 }
 0x3ab   : > { %8600 = vmatprep.mubr.bf16.mxu0 %v6613_v57 }
 0x3ac   : > { %8601 = vmatmul.mubr.bf16.gmra.mxu0 %v6614_v51  ;;  %v6888_v51 = vunpack.c.h.bf16 %v8907_v6 }
 0x42b   : > { %v8574_v29 = vpop.f32.mrf.mxu0 }
 0x42c   : > { %v6849_v26 = vadd.f32 %v8574_v29, %v11073_v10 }
 0x42d   : > { %v6713_v16 = vpop.f32.mrf.mxu0 }
 0x42e   : > { %v6847_v40 = vadd.f32 %v11073_v10, %v6713_v16  ;;  %v6913_v46 = vadd.f32 %v6881_v50, %v6849_v26 }
 0x42f   : > { %v8575_v23 = vpop.f32.mrf.mxu0 }
 0x430   : > { %v6850_v20 = vadd.f32 %v8575_v23, %v11073_v10  ;;  %v6911_v30 = vadd.f32 %v6879_v8, %v6847_v40  ;;  %v6945_v13 = vmax.f32 %v6913_v46, 0.0  ;;  %v8908_v40 = vld [vmem:[%s9312_s30 + $0x38] sm:$0xff]  }
 0x431   : > { %v6716_v52 = vpop.f32.mrf.mxu0 }
 0x432   : > { %v6914_v1 = vadd.f32 %v6882_v37, %v6850_v20  ;;  %v6848_v38 = vadd.f32 %v11073_v10, %v6716_v52  ;;  %v6943_v47 = vmax.f32 %v6911_v30, 0.0  ;;  %v6893_v37 = vunpack.c.l.bf16 %v8908_v40  ;;  %v8909_v30 = vld [vmem:[%s9312_s30 + $0x30] sm:$0xff]  }
 0x433   : > { %v8578_v7 = vpop.f32.mrf.mxu0 }
 0x434   : > { %v6946_v2 = vmax.f32 %v6914_v1, 0.0  ;;  %v6912_v59 = vadd.f32 %v6880_v14, %v6848_v38  ;;  %v6853_v15 = vadd.f32 %v8578_v7, %v11073_v10  ;;  %v6891_v1 = vunpack.c.l.bf16 %v8909_v30 }
 0x435   : > { %v6729_v53 = vpop.f32.mrf.mxu0  ;;  %v6894_v38 = vunpack.c.h.bf16 %v8908_v40 }
 0x436   : > { %v7725_v39 = vpack.c.bf16 %v6946_v2, %v6945_v13  ;;  %v6944_v0 = vmax.f32 %v6912_v59, 0.0  ;;  %v6851_v12 = vadd.f32 %v11073_v10, %v6729_v53  ;;  %v6917_v60 = vadd.f32 %v6885_v18, %v6853_v15 }
 0x437   : > { %v8579_v21 = vpop.f32.mrf.mxu0  ;;  %v6892_v2 = vunpack.c.h.bf16 %v8909_v30 }
 0x438   : > { %7797 = vst [vmem:[%s11087_s10 + $0x8] sm:$0xff] %v7725_v39   ;;  %v7720_v32 = vpack.c.bf16 %v6944_v0, %v6943_v47  ;;  %v6854_v56 = vadd.f32 %v8579_v21, %v11073_v10  ;;  %v6915_v43 = vadd.f32 %v6883_v41, %v6851_v12  ;;  %v6949_v22 = vmax.f32 %v6917_v60, 0.0  ;;  %v8910_v0 = vld [vmem:[%s9312_s30 + $0x48] sm:$0xff]  }
 0x439   : > { %v6732_v35 = vpop.f32.mrf.mxu0  ;;  %v6897_v12 = vunpack.c.l.bf16 %v8910_v0 }
 0x43a   : > { %7721 = vst [vmem:[%s11087_s10] sm:$0xff] %v7720_v32   ;;  %v6918_v55 = vadd.f32 %v6886_v27, %v6854_v56  ;;  %v6852_v63 = vadd.f32 %v11073_v10, %v6732_v35  ;;  %v6947_v17 = vmax.f32 %v6915_v43, 0.0  ;;  %v8911_v35 = vld [vmem:[%s9312_s30 + $0x40] sm:$0xff]  }
 0x43b   : > { %v8582_v5 = vpop.f32.mrf.mxu0  ;;  %v6895_v43 = vunpack.c.l.bf16 %v8911_v35 }
 0x43c   : > { %v6950_v44 = vmax.f32 %v6918_v55, 0.0  ;;  %v6916_v54 = vadd.f32 %v6884_v25, %v6852_v63  ;;  %v6857_v61 = vadd.f32 %v8582_v5, %v11073_v10  ;;  %v6898_v5 = vunpack.c.h.bf16 %v8910_v0 }
 0x43d   : > { %v6745_v48 = vpop.f32.mrf.mxu0 }
 0x43e   : > { %v7735_v24 = vpack.c.bf16 %v6950_v44, %v6949_v22  ;;  %v6948_v34 = vmax.f32 %v6916_v54, 0.0  ;;  %v6855_v9 = vadd.f32 %v11073_v10, %v6745_v48  ;;  %v6921_v4 = vadd.f32 %v6889_v28, %v6857_v61 }
 0x43f   : > { %v8583_v49 = vpop.f32.mrf.mxu0  ;;  %v6896_v28 = vunpack.c.h.bf16 %v8911_v35 }
 0x440   : > { %7799 = vst [vmem:[%s11087_s10 + $0x18] sm:$0xff] %v7735_v24   ;;  %v7730_v31 = vpack.c.bf16 %v6948_v34, %v6947_v17  ;;  %v6858_v36 = vadd.f32 %v8583_v49, %v11073_v10  ;;  %v6919_v57 = vadd.f32 %v6887_v42, %v6855_v9  ;;  %v6953_v11 = vmax.f32 %v6921_v4, 0.0  ;;  %v8912_v9 = vld [vmem:[%s9312_s30 + $0x58] sm:$0xff]  }
 0x441   : > { %v6748_v3 = vpop.f32.mrf.mxu0  ;;  %v6901_v49 = vunpack.c.l.bf16 %v8912_v9 }
 0x442   : > { %7798 = vst [vmem:[%s11087_s10 + $0x10] sm:$0xff] %v7730_v31   ;;  %v6922_v29 = vadd.f32 %v6890_v58, %v6858_v36  ;;  %v6856_v26 = vadd.f32 %v11073_v10, %v6748_v3  ;;  %v6951_v23 = vmax.f32 %v6919_v57, 0.0  ;;  %v8913_v57 = vld [vmem:[%s9312_s30 + $0x50] sm:$0xff]  }
 0x444   : > { %v6954_v50 = vmax.f32 %v6922_v29, 0.0  ;;  %v6920_v16 = vadd.f32 %v6888_v51, %v6856_v26  ;;  %v8586_v45 = vpop.f32.mrf.mxu0  ;;  %v6899_v29 = vunpack.c.l.bf16 %v8913_v57  ;;  %v6902_v26 = vunpack.c.h.bf16 %v8912_v9 }
 0x445   : > { %v6861_v8 = vadd.f32 %v8586_v45, %v11073_v10 }
 0x446   : > { %v7745_v14 = vpack.c.bf16 %v6954_v50, %v6953_v11  ;;  %v6952_v46 = vmax.f32 %v6920_v16, 0.0  ;;  %v6761_v20 = vpop.f32.mrf.mxu0 }
 0x447   : > { %v6859_v52 = vadd.f32 %v11073_v10, %v6761_v20  ;;  %v6925_v18 = vadd.f32 %v6893_v37, %v6861_v8  ;;  %v6900_v8 = vunpack.c.h.bf16 %v8913_v57 }
 0x448   : > { %7801 = vst [vmem:[%s11087_s10 + $0x28] sm:$0xff] %v7745_v14   ;;  %v7740_v7 = vpack.c.bf16 %v6952_v46, %v6951_v23  ;;  %v8587_v62 = vpop.f32.mrf.mxu0 }
 0x449   : > { %v6862_v13 = vadd.f32 %v8587_v62, %v11073_v10  ;;  %v6923_v15 = vadd.f32 %v6891_v1, %v6859_v52  ;;  %v6957_v41 = vmax.f32 %v6925_v18, 0.0  ;;  %v8914_v1 = vld [vmem:[%s9312_s30 + $0x68] sm:$0xff]  }
 0x44a   : > { %7800 = vst [vmem:[%s11087_s10 + $0x20] sm:$0xff] %v7740_v7   ;;  %v6764_v59 = vpop.f32.mrf.mxu0 }
 0x44b   : > { %v6926_v53 = vadd.f32 %v6894_v38, %v6862_v13  ;;  %v6860_v19 = vadd.f32 %v11073_v10, %v6764_v59  ;;  %v6955_v21 = vmax.f32 %v6923_v15, 0.0  ;;  %v6905_v38 = vunpack.c.l.bf16 %v8914_v1 }
 0x44d   : > { %v6958_v27 = vmax.f32 %v6926_v53, 0.0  ;;  %v6924_v47 = vadd.f32 %v6892_v2, %v6860_v19  ;;  %v8590_v39 = vpop.f32.mrf.mxu0  ;;  %v8915_v53 = vld [vmem:[%s9312_s30 + $0x60] sm:$0xff]  }
 0x44e   : > { %v6865_v56 = vadd.f32 %v8590_v39, %v11073_v10  ;;  %v6903_v19 = vunpack.c.l.bf16 %v8915_v53  ;;  %v6904_v0 = vunpack.c.h.bf16 %v8915_v53 }
 0x44f   : > { %v7755_v32 = vpack.c.bf16 %v6958_v27, %v6957_v41  ;;  %v6956_v60 = vmax.f32 %v6924_v47, 0.0  ;;  %v6777_v25 = vpop.f32.mrf.mxu0  ;;  %v6906_v41 = vunpack.c.h.bf16 %v8914_v1 }
 0x450   : > { %v6863_v63 = vadd.f32 %v11073_v10, %v6777_v25  ;;  %v6929_v22 = vadd.f32 %v6897_v12, %v6865_v56 }
 0x451   : > { %7803 = vst [vmem:[%s11087_s10 + $0x38] sm:$0xff] %v7755_v32   ;;  %v7750_v55 = vpack.c.bf16 %v6956_v60, %v6955_v21  ;;  %v8591_v33 = vpop.f32.mrf.mxu0 }
 0x452   : > { %v6866_v44 = vadd.f32 %v8591_v33, %v11073_v10  ;;  %v6927_v61 = vadd.f32 %v6895_v43, %v6863_v63  ;;  %v6961_v42 = vmax.f32 %v6929_v22, 0.0  ;;  %v8916_v22 = vld [vmem:[%s9312_s30 + $0x78] sm:$0xff]  }
 0x453   : > { %7802 = vst [vmem:[%s11087_s10 + $0x30] sm:$0xff] %v7750_v55   ;;  %v6780_v54 = vpop.f32.mrf.mxu0 }
 0x454   : > { %v6930_v48 = vadd.f32 %v6898_v5, %v6866_v44  ;;  %v6864_v6 = vadd.f32 %v11073_v10, %v6780_v54  ;;  %v6959_v31 = vmax.f32 %v6927_v61, 0.0  ;;  %v6909_v44 = vunpack.c.l.bf16 %v8916_v22 }
 0x456   : > { %v6962_v58 = vmax.f32 %v6930_v48, 0.0  ;;  %v6928_v17 = vadd.f32 %v6896_v28, %v6864_v6  ;;  %v8917_v48 = vld [vmem:[%s9312_s30 + $0x70] sm:$0xff]   ;;  %s9028_s30 = sshll.u32 %s9121_s27, 4  ;;  %s9029_s30 = int_to_ptr.vmem [resolvable:$false] %s9028_s30 }
 0x457   : > { %v8594_v24 = vpop.f32.mrf.mxu0  ;;  %v6907_v6 = vunpack.c.l.bf16 %v8917_v48  ;;  %s9030_s1 = scalar_lea.vmem %s9029_s30, 4096  ;;  %p9031_p0 = scmp.lt.s32.totalorder %s11148_s18, %s9029_s30 }
 0x458   : > { %v6869_v34 = vadd.f32 %v8594_v24, %v11073_v10  ;;  %v7765_v4 = vpack.c.bf16 %v6962_v58, %v6961_v42  ;;  %v6960_v36 = vmax.f32 %v6928_v17, 0.0  ;;  %v6910_v42 = vunpack.c.h.bf16 %v8916_v22  ;;  %p9032_p3 = scmp.lt.s32.totalorder %s9030_s1, %s9024_s21 }
 0x459   : > { %v6793_v51 = vpop.f32.mrf.mxu0 }
 0x45a   : > { %v6867_v3 = vadd.f32 %v11073_v10, %v6793_v51  ;;  %7805 = vst [vmem:[%s11087_s10 + $0x48] sm:$0xff] %v7765_v4   ;;  %v7760_v11 = vpack.c.bf16 %v6960_v36, %v6959_v31  ;;  %v6933_v16 = vadd.f32 %v6901_v49, %v6869_v34  ;;  %v6908_v34 = vunpack.c.h.bf16 %v8917_v48  ;;  %p9033_p2 = por %p9032_p3, %p9031_p0 }
 0x45b   : > { %v8595_v50 = vpop.f32.mrf.mxu0 }
 0x45c   : > { %v6870_v45 = vadd.f32 %v8595_v50, %v11073_v10  ;;  %7804 = vst [vmem:[%s11087_s10 + $0x40] sm:$0xff] %v7760_v11   ;;  %v6931_v37 = vadd.f32 %v6899_v29, %v6867_v3  ;;  %v6965_v46 = vmax.f32 %v6933_v16, 0.0  ;;  %p9034_p11 = pnand %p9033_p2, %p9027_p13 }
 0x45d   : > { %v6796_v40 = vpop.f32.mrf.mxu0 }
 0x45e   : > { %v6934_v23 = vadd.f32 %v6902_v26, %v6870_v45  ;;  %v6868_v14 = vadd.f32 %v11073_v10, %v6796_v40  ;;  %v6963_v7 = vmax.f32 %v6931_v37, 0.0 }
 0x460   : > { %v6966_v20 = vmax.f32 %v6934_v23, 0.0  ;;  %v6932_v52 = vadd.f32 %v6900_v8, %v6868_v14  ;;  %v8598_v30 = vpop.f32.mrf.mxu0 }
 0x461   : > { %v6873_v13 = vadd.f32 %v8598_v30, %v11073_v10 }
 0x462   : > { %v7775_v62 = vpack.c.bf16 %v6966_v20, %v6965_v46  ;;  %v6964_v18 = vmax.f32 %v6932_v52, 0.0  ;;  %v6809_v2 = vpop.f32.mrf.mxu0 }
 0x463   : > { %v6871_v15 = vadd.f32 %v11073_v10, %v6809_v2  ;;  %v6937_v47 = vadd.f32 %v6905_v38, %v6873_v13 }
 0x464   : > { %7807 = vst [vmem:[%s11087_s10 + $0x58] sm:$0xff] %v7775_v62   ;;  %v7770_v59 = vpack.c.bf16 %v6964_v18, %v6963_v7  ;;  %v8599_v27 = vpop.f32.mrf.mxu0 }
 0x465   : > { %v6874_v39 = vadd.f32 %v8599_v27, %v11073_v10  ;;  %v6935_v21 = vadd.f32 %v6903_v19, %v6871_v15  ;;  %v6969_v56 = vmax.f32 %v6937_v47, 0.0 }
 0x466   : > { %7806 = vst [vmem:[%s11087_s10 + $0x50] sm:$0xff] %v7770_v59   ;;  %v6812_v12 = vpop.f32.mrf.mxu0 }
 0x467   : > { %v6938_v32 = vadd.f32 %v6906_v41, %v6874_v39  ;;  %v6872_v60 = vadd.f32 %v11073_v10, %v6812_v12  ;;  %v6967_v43 = vmax.f32 %v6935_v21, 0.0 }
 0x469   : > { %v6970_v25 = vmax.f32 %v6938_v32, 0.0  ;;  %v6936_v35 = vadd.f32 %v6904_v0, %v6872_v60 }
 0x46b   : > { %v7785_v55 = vpack.c.bf16 %v6970_v25, %v6969_v56  ;;  %v6968_v63 = vmax.f32 %v6936_v35, 0.0 }
 0x46c   : > { %v8602_v5 = vpop.f32.mrf.mxu0 }
 0x46d   : > { %7809 = vst [vmem:[%s11087_s10 + $0x68] sm:$0xff] %v7785_v55   ;;  %v7780_v33 = vpack.c.bf16 %v6968_v63, %v6967_v43  ;;  %v6877_v28 = vadd.f32 %v8602_v5, %v11073_v10 }
 0x46e   : > { %v6825_v54 = vpop.f32.mrf.mxu0 }
 0x46f   : > { %7808 = vst [vmem:[%s11087_s10 + $0x60] sm:$0xff] %v7780_v33   ;;  %v6875_v61 = vadd.f32 %v11073_v10, %v6825_v54  ;;  %v6941_v17 = vadd.f32 %v6909_v44, %v6877_v28 }
 0x470   : > { %v8603_v58 = vpop.f32.mrf.mxu0 }
 0x471   : > { %v6878_v24 = vadd.f32 %v8603_v58, %v11073_v10  ;;  %v6939_v49 = vadd.f32 %v6907_v6, %v6875_v61  ;;  %v6973_v36 = vmax.f32 %v6941_v17, 0.0 }
 0x472   : > { %v6828_v9 = vpop.f32.mrf.mxu0 }
 0x473   : > { %v6942_v31 = vadd.f32 %v6910_v42, %v6878_v24  ;;  %v6876_v4 = vadd.f32 %v11073_v10, %v6828_v9  ;;  %v6971_v57 = vmax.f32 %v6939_v49, 0.0 }
 0x475   : > { %v6974_v51 = vmax.f32 %v6942_v31, 0.0  ;;  %v6940_v3 = vadd.f32 %v6908_v34, %v6876_v4 }
 0x477   : > { %v7795_v29 = vpack.c.bf16 %v6974_v51, %v6973_v36  ;;  %v6972_v26 = vmax.f32 %v6940_v3, 0.0 }
 0x479   : > { %7811 = vst [vmem:[%s11087_s10 + $0x78] sm:$0xff] %v7795_v29   ;;  %v7790_v10 = vpack.c.bf16 %v6972_v26, %v6971_v57 }
 0x47b   : > { %7810 = vst [vmem:[%s11087_s10 + $0x70] sm:$0xff] %v7790_v10  }
 0x47c   : > { %9037 = shalt.err (!%p9034_p11)
}
 0x47d   : > { %s9038_s3 = scalar_lea.hbm %s11146_s20, 2048  ;;  %s9042_s13 = scalar_lea.hbm %s11205_s7, 4096 }
 0x47e   : > { %p9039_p10 = scmp.ne.s32.totalorder %s11146_s20, %s9038_s3  ;;  %p9043_p12 = scmp.lt.s32.totalorder %s11146_s20, %s11205_s7 }
 0x47f   : > { %p9044_p9 = scmp.lt.s32.totalorder %s9042_s13, %s9038_s3 }
 0x480   : > { %p9040_p7 = pnand %p9039_p10, %p11397_p4 }
 0x481   : > { %p9045_p5 = por %p9044_p9, %p9043_p12 }
 0x482   : > { %p9041_p6 = pneg %p9040_p7 }
 0x484   : > { %p9046_p1 = pnand %p9045_p5, %p9041_p6 }
 0x486   : > { %9049 = shalt.err (!%p9046_p1)
}
 0x487   : > { %s9122_s17 = smov 64   ;;  %s9123_s19 = smov 4  }
 0x488   : > { %8634 = dma.vmem_to_hbm [thread:$0]  (%p11397_p4), %s11148_s18, 2048, %s11146_s20, %s7136_s5, %s9122_s17, %s9122_s17, %s9123_s19  }
 0x489 PF: > { %s7167_s22 = sand.u32 1, %s9092_s24   ;;  %p11398_p8 = scmp.ne.s32.totalorder %s11222_s12, 0 }
 0x48a   : > { %p11399_p13 = scmp.ge.s32.totalorder %s9112_s29, 2  ;;  %s7168_s21 = scalar_lea.sflag [#allocation5], %s7167_s22 }
 0x48c   : > { %p8651_p0 = pnand %p11399_p13, %p11398_p8 }
 0x48e   : > { %p8652_p3 = pneg %p8651_p0 }
 0x490   : > { %9087 = dma.done.wait (%p8652_p3), %s7168_s21, 2048  }
 0x491   : > { %9089 = vsyncadd (%p8652_p3), %s7168_s21, 4294965248  ;;  %s25_s29 = sadd.s32 1, %s9112_s29   ;;  %s11400_s24 = smov %s9096_s25 }
 0x492   : > { %p22_p2 = scmp.ge.s32.totalorder %s25_s29, 4   ;;  %s11401_s25 = smov %s9100_s26 }
 0x493   : > { %s11402_s26 = smov %s9285_s15  ;;  %s11403_s27 = smov %s9108_s28 }
 0x494   : > { %s11404_s28 = smov %s11406_s16  ;;  %24 = sbr.rel (!%p22_p2) target bundleno = 12 (0xc), region = 117 }
 0x499   :  { %7173 = vsyncpa [#allocation4], 1 }
 0x49a   :  { %7175 = vsyncpa [#allocation4 + $0x1], 1 }
 0x49b   :  { %7176 = vsyncpa [#allocation7], 1 }
 0x49c   :  { %7177 = vsyncpa [#allocation10], 1 }
 0x49d   :  { %7178 = vsyncpa [#allocation5], 1 }
 0x49e   :  { %7180 = vsyncpa [#allocation5 + $0x1], 1 }

</bundles_post_ra>
